<compile_context>
chip_gen: v7x
topology: tpu7x:2x2x1
jax: 0.10.0
libtpu: 0.0.40
codegen_flags: <defaults>
</compile_context>

<pallas_src>
import jax
import jax.numpy as jnp
from jax import lax
from jax.experimental import pallas as pl
from jax.experimental.pallas import tpu as pltpu

EPS = 1e-5  # PyTorch BatchNorm2d default eps


def residual_block_kernel(x_ref, w1_ref, g1_ref, bt1_ref, a_ref,
                          w2_ref, g2_ref, bt2_ref, out_ref,
                          pad_ref, patch_ref, act_ref, ssum_ref, ssq_ref):
    B, H, W, C = x_ref.shape
    inv_n = 1.0 / float(B * H * W)

    def zero_stats():
        ssum_ref[...] = jnp.zeros_like(ssum_ref)
        ssq_ref[...] = jnp.zeros_like(ssq_ref)

    def conv3x3(src_hwc, w_ref):
        # src_hwc: (H, W, C) f32.  3x3 "same" conv as a single im2col matmul.
        # Interior write only -- the 1-pixel zero border (padding=1) and the
        # unused padded columns stay zero from the one-time zero fill below.
        pad_ref[1:H + 1, 1:W + 1, :] = src_hwc
        for dy in range(3):
            for dx in range(3):
                t = dy * 3 + dx
                patch_ref[:, t * C:(t + 1) * C] = (
                    pad_ref[dy:dy + H, dx:dx + W, :]
                    .reshape(H * W, C).astype(jnp.bfloat16))
        # bf16 x bf16 inputs, f32 accumulation on the MXU.
        return jnp.dot(patch_ref[...], w_ref[...],
                       preferred_element_type=jnp.float32)

    def accumulate_stats(y):
        ssum_ref[...] += jnp.sum(y, axis=0, keepdims=True)
        ssq_ref[...] += jnp.sum(y * y, axis=0, keepdims=True)

    def bn_scale_shift(g_ref, bt_ref):
        # Training-mode BatchNorm2d: biased variance over (N, H, W), folded
        # into one per-channel scale/shift.
        mean = ssum_ref[...] * inv_n
        var = ssq_ref[...] * inv_n - mean * mean
        scale = g_ref[...] * lax.rsqrt(var + EPS)
        shift = bt_ref[...] - mean * scale
        return scale, shift

    # One-time zero fill of the small per-image padded scratch.
    pad_ref[...] = jnp.zeros_like(pad_ref)
    zero_stats()

    # ---- pass 1: conv1 per image, accumulate BN1 batch statistics ----------
    # (conv biases intentionally omitted: train-mode BN cancels them exactly)
    @pl.loop(0, B)
    def _(b):
        y = conv3x3(x_ref[b], w1_ref)          # (H*W, C) f32
        act_ref[b] = y
        accumulate_stats(y)

    scale1, shift1 = bn_scale_shift(g1_ref, bt1_ref)
    zero_stats()

    # ---- pass 2: BN1 + PReLU + conv2 per image, accumulate BN2 stats -------
    @pl.loop(0, B)
    def _(b):
        h = act_ref[b] * scale1 + shift1
        h = jnp.where(h > 0, h, h * a_ref[...])        # PReLU, single parameter
        y = conv3x3(h.reshape(H, W, C), w2_ref)
        act_ref[b] = y
        accumulate_stats(y)

    scale2, shift2 = bn_scale_shift(g2_ref, bt2_ref)

    # ---- pass 3: BN2 + residual add -----------------------------------------
    @pl.loop(0, B)
    def _(b):
        r = act_ref[b] * scale2 + shift2
        out_ref[b] = x_ref[b] + r.reshape(H, W, C)


def fold_conv_weight(w_hwio):
    """(3, 3, Cin, Cout) HWIO conv weight -> (9*Cin, Cout) bf16 im2col matrix."""
    kh, kw, cin, cout = w_hwio.shape
    return w_hwio.reshape(kh * kw * cin, cout).astype(jnp.bfloat16)


def residual_block(x, params):
    """x: [B, H, W, C] float32, NHWC (no layout transposes at the boundary)."""
    B, H, W, C = x.shape
    wp = ((W + 2 + 7) // 8) * 8            # sublane-friendly padded width
    w1 = fold_conv_weight(params["w1"])
    w2 = fold_conv_weight(params["w2"])
    # Conv biases b1/b2 are NOT passed: a per-channel bias feeding a
    # training-mode BatchNorm is exactly cancelled by the mean subtraction.

    scratch = [
        pltpu.VMEM((H + 2, wp, C), jnp.float32),    # zero-padded image
        pltpu.VMEM((H * W, 9 * C), jnp.bfloat16),   # im2col patches (bf16)
        pltpu.VMEM((B, H * W, C), jnp.float32),     # per-image conv activations
        pltpu.VMEM((1, C), jnp.float32),            # per-channel sum
        pltpu.VMEM((1, C), jnp.float32),            # per-channel sum of squares
    ]
    # Explicit VMEM budget: >= the 32 MiB scoped default everywhere, never
    # above v7x's 64 MiB physical VMEM.
    need = 2 * (B * H * W * C * 4 * 2              # x + out
                + (H + 2) * wp * C * 4             # padded image
                + H * W * 9 * C * 2                # patches
                + B * H * W * C * 4                # activations
                + 2 * 9 * C * C * 2)               # weights
    vmem_limit = int(min(64 * 2 ** 20, max(32 * 2 ** 20, need)))

    vmem = pl.BlockSpec(memory_space=pltpu.MemorySpace.VMEM)
    return pl.pallas_call(
        residual_block_kernel,
        out_shape=jax.ShapeDtypeStruct((B, H, W, C), jnp.float32),
        in_specs=[vmem] * 8,
        out_specs=vmem,
        scratch_shapes=scratch,
        compiler_params=pltpu.CompilerParams(vmem_limit_bytes=vmem_limit),
    )(x, w1, params["g1"], params["bt1"], params["a"],
      w2, params["g2"], params["bt2"])


def reference(x, p):
    """Pure-JAX NHWC reference of the PyTorch forward (train-mode BN, f32)."""
    def conv(inp, w, b):
        y = lax.conv_general_dilated(inp, w, (1, 1), "SAME",
                                     dimension_numbers=("NHWC", "HWIO", "NHWC"))
        return y + b.reshape(1, 1, 1, -1)

    def bn(y, g, bt):
        m = jnp.mean(y, axis=(0, 1, 2), keepdims=True)
        v = jnp.mean((y - m) ** 2, axis=(0, 1, 2), keepdims=True)
        return (y - m) * lax.rsqrt(v + EPS) * g.reshape(1, 1, 1, -1) \
            + bt.reshape(1, 1, 1, -1)

    h = bn(conv(x, p["w1"], p["b1"]), p["g1"], p["bt1"])
    h = jnp.where(h > 0, h, p["a"].reshape(()) * h)
    h = bn(conv(h, p["w2"], p["b2"]), p["g2"], p["bt2"])
    return x + h


def init_params(key, channels):
    """Synthetic init matching ResidualBlock(channels):
    Conv2d(C,C,3,pad=1) x2 (stored HWIO), BatchNorm2d(C) x2, PReLU(1 param)."""
    k1, k2, k3, k4 = jax.random.split(key, 4)
    C = channels
    return {
        "w1": 0.1 * jax.random.normal(k1, (3, 3, C, C), jnp.float32),
        "b1": 0.05 * jax.random.normal(k2, (C,), jnp.float32),
        "g1": jnp.ones((1, C), jnp.float32),       # BN weight init = 1
        "bt1": jnp.zeros((1, C), jnp.float32),     # BN bias   init = 0
        "a": jnp.full((1, 1), 0.25, jnp.float32),  # PReLU default init
        "w2": 0.1 * jax.random.normal(k3, (3, 3, C, C), jnp.float32),
        "b2": 0.05 * jax.random.normal(k4, (C,), jnp.float32),
        "g2": jnp.ones((1, C), jnp.float32),
        "bt2": jnp.zeros((1, C), jnp.float32),
    }


if __name__ == "__main__":
    # SRGAN instantiates ResidualBlock(64); small spatial extent for the demo.
    B, H, W, C = 2, 16, 16, 64
    key = jax.random.PRNGKey(0)
    kx, kp = jax.random.split(key)
    x = jax.random.normal(kx, (B, H, W, C), jnp.float32)
    params = init_params(kp, C)

    out = jax.block_until_ready(residual_block(x, params))
    ref = jax.block_until_ready(reference(x, params))

    assert out.shape == (B, H, W, C)
    max_err = float(jnp.max(jnp.abs(out - ref)))
    # bf16 MXU inputs (f32 accumulation) -> tolerance looser than pure f32.
    assert jnp.allclose(out, ref, rtol=2e-2, atol=5e-2), max_err
    print("KERNEL_OK")
</pallas_src>

<mosaic_0001>
module attributes {stable_mosaic.version = 11 : i64} {
  func.func @residual_block_kernel(%arg0: memref<2x16x16x64xf32, #tpu.memory_space<vmem>>, %arg1: memref<576x64xbf16, #tpu.memory_space<vmem>>, %arg2: memref<1x64xf32, #tpu.memory_space<vmem>>, %arg3: memref<1x64xf32, #tpu.memory_space<vmem>>, %arg4: memref<1x1xf32, #tpu.memory_space<vmem>>, %arg5: memref<576x64xbf16, #tpu.memory_space<vmem>>, %arg6: memref<1x64xf32, #tpu.memory_space<vmem>>, %arg7: memref<1x64xf32, #tpu.memory_space<vmem>>, %arg8: memref<2x16x16x64xf32, #tpu.memory_space<vmem>>, %arg9: memref<18x24x64xf32, #tpu.memory_space<vmem>>, %arg10: memref<256x576xbf16, #tpu.memory_space<vmem>>, %arg11: memref<2x256x64xf32, #tpu.memory_space<vmem>>, %arg12: memref<1x64xf32, #tpu.memory_space<vmem>>, %arg13: memref<1x64xf32, #tpu.memory_space<vmem>>) attributes {dimension_semantics = [], scalar_prefetch = 0 : i64, scratch_operands = 5 : i64, tpu.core_type = #tpu.core_type<tc>} {
    %cst = arith.constant 0.000000e+00 : f32
    %0 = vector.broadcast %cst : f32 to vector<18x24x64xf32>
    %c0 = arith.constant 0 : index
    %c0_0 = arith.constant 0 : index
    %c0_1 = arith.constant 0 : index
    %1 = vector.load %arg9[%c0, %c0_0, %c0_1] : memref<18x24x64xf32, #tpu.memory_space<vmem>>, vector<18x24x64xf32>
    tpu.vector_store %arg9[%c0, %c0_0, %c0_1], %0 {strides = array<i32>} : memref<18x24x64xf32, #tpu.memory_space<vmem>>, vector<18x24x64xf32>,
    %cst_2 = arith.constant 0.000000e+00 : f32
    %2 = vector.broadcast %cst_2 : f32 to vector<1x64xf32>
    %c0_3 = arith.constant 0 : index
    %c0_4 = arith.constant 0 : index
    %3 = vector.load %arg12[%c0_3, %c0_4] : memref<1x64xf32, #tpu.memory_space<vmem>>, vector<1x64xf32>
    tpu.vector_store %arg12[%c0_3, %c0_4], %2 {strides = array<i32>} : memref<1x64xf32, #tpu.memory_space<vmem>>, vector<1x64xf32>,
    %cst_5 = arith.constant 0.000000e+00 : f32
    %4 = vector.broadcast %cst_5 : f32 to vector<1x64xf32>
    %c0_6 = arith.constant 0 : index
    %c0_7 = arith.constant 0 : index
    %5 = vector.load %arg13[%c0_6, %c0_7] : memref<1x64xf32, #tpu.memory_space<vmem>>, vector<1x64xf32>
    tpu.vector_store %arg13[%c0_6, %c0_7], %4 {strides = array<i32>} : memref<1x64xf32, #tpu.memory_space<vmem>>, vector<1x64xf32>,
    %c0_i32 = arith.constant 0 : i32
    %c2_i32 = arith.constant 2 : i32
    %6 = arith.addi %c0_i32, %c2_i32 : i32
    %c1_i32 = arith.constant 1 : i32
    scf.for %arg14 = %c0_i32 to %6 step %c1_i32  : i32 {
      %c1_i32_45 = arith.constant 1 : i32
      %45 = arith.muli %arg14, %c1_i32_45 : i32
      %c0_i32_46 = arith.constant 0 : i32
      %46 = arith.addi %c0_i32_46, %45 : i32
      %47 = arith.index_cast %46 : i32 to index
      %c0_47 = arith.constant 0 : index
      %c0_48 = arith.constant 0 : index
      %c0_49 = arith.constant 0 : index
      %48 = vector.load %arg0[%47, %c0_47, %c0_48, %c0_49] : memref<2x16x16x64xf32, #tpu.memory_space<vmem>>, vector<1x16x16x64xf32>
      %49 = vector.shape_cast %48 : vector<1x16x16x64xf32> to vector<16x16x64xf32>
      %c1 = arith.constant 1 : index
      %c1_50 = arith.constant 1 : index
      %c0_51 = arith.constant 0 : index
      %50 = vector.load %arg9[%c1, %c1_50, %c0_51] : memref<18x24x64xf32, #tpu.memory_space<vmem>>, vector<16x16x64xf32>
      tpu.vector_store %arg9[%c1, %c1_50, %c0_51], %49 {strides = array<i32>} : memref<18x24x64xf32, #tpu.memory_space<vmem>>, vector<16x16x64xf32>,
      %c0_52 = arith.constant 0 : index
      %c0_53 = arith.constant 0 : index
      %c0_54 = arith.constant 0 : index
      %51 = vector.load %arg9[%c0_52, %c0_53, %c0_54] : memref<18x24x64xf32, #tpu.memory_space<vmem>>, vector<16x16x64xf32>
      %52 = vector.shape_cast %51 : vector<16x16x64xf32> to vector<256x64xf32>
      %53 = arith.truncf %52 : vector<256x64xf32> to vector<256x64xbf16>
      %c0_55 = arith.constant 0 : index
      %c0_56 = arith.constant 0 : index
      %54 = vector.load %arg10[%c0_55, %c0_56] : memref<256x576xbf16, #tpu.memory_space<vmem>>, vector<256x64xbf16>
      tpu.vector_store %arg10[%c0_55, %c0_56], %53 {strides = array<i32>} : memref<256x576xbf16, #tpu.memory_space<vmem>>, vector<256x64xbf16>,
      %c0_57 = arith.constant 0 : index
      %c1_58 = arith.constant 1 : index
      %c0_59 = arith.constant 0 : index
      %55 = vector.load %arg9[%c0_57, %c1_58, %c0_59] : memref<18x24x64xf32, #tpu.memory_space<vmem>>, vector<16x16x64xf32>
      %56 = vector.shape_cast %55 : vector<16x16x64xf32> to vector<256x64xf32>
      %57 = arith.truncf %56 : vector<256x64xf32> to vector<256x64xbf16>
      %c0_60 = arith.constant 0 : index
      %c64 = arith.constant 64 : index
      %58 = vector.load %arg10[%c0_60, %c64] : memref<256x576xbf16, #tpu.memory_space<vmem>>, vector<256x64xbf16>
      tpu.vector_store %arg10[%c0_60, %c64], %57 {strides = array<i32>} : memref<256x576xbf16, #tpu.memory_space<vmem>>, vector<256x64xbf16>,
      %c0_61 = arith.constant 0 : index
      %c2 = arith.constant 2 : index
      %c0_62 = arith.constant 0 : index
      %59 = vector.load %arg9[%c0_61, %c2, %c0_62] : memref<18x24x64xf32, #tpu.memory_space<vmem>>, vector<16x16x64xf32>
      %60 = vector.shape_cast %59 : vector<16x16x64xf32> to vector<256x64xf32>
      %61 = arith.truncf %60 : vector<256x64xf32> to vector<256x64xbf16>
      %c0_63 = arith.constant 0 : index
      %c128 = arith.constant 128 : index
      %62 = vector.load %arg10[%c0_63, %c128] : memref<256x576xbf16, #tpu.memory_space<vmem>>, vector<256x64xbf16>
      tpu.vector_store %arg10[%c0_63, %c128], %61 {strides = array<i32>} : memref<256x576xbf16, #tpu.memory_space<vmem>>, vector<256x64xbf16>,
      %c1_64 = arith.constant 1 : index
      %c0_65 = arith.constant 0 : index
      %c0_66 = arith.constant 0 : index
      %63 = vector.load %arg9[%c1_64, %c0_65, %c0_66] : memref<18x24x64xf32, #tpu.memory_space<vmem>>, vector<16x16x64xf32>
      %64 = vector.shape_cast %63 : vector<16x16x64xf32> to vector<256x64xf32>
      %65 = arith.truncf %64 : vector<256x64xf32> to vector<256x64xbf16>
      %c0_67 = arith.constant 0 : index
      %c192 = arith.constant 192 : index
      %66 = vector.load %arg10[%c0_67, %c192] : memref<256x576xbf16, #tpu.memory_space<vmem>>, vector<256x64xbf16>
      tpu.vector_store %arg10[%c0_67, %c192], %65 {strides = array<i32>} : memref<256x576xbf16, #tpu.memory_space<vmem>>, vector<256x64xbf16>,
      %c1_68 = arith.constant 1 : index
      %c1_69 = arith.constant 1 : index
      %c0_70 = arith.constant 0 : index
      %67 = vector.load %arg9[%c1_68, %c1_69, %c0_70] : memref<18x24x64xf32, #tpu.memory_space<vmem>>, vector<16x16x64xf32>
      %68 = vector.shape_cast %67 : vector<16x16x64xf32> to vector<256x64xf32>
      %69 = arith.truncf %68 : vector<256x64xf32> to vector<256x64xbf16>
      %c0_71 = arith.constant 0 : index
      %c256 = arith.constant 256 : index
      %70 = vector.load %arg10[%c0_71, %c256] : memref<256x576xbf16, #tpu.memory_space<vmem>>, vector<256x64xbf16>
      tpu.vector_store %arg10[%c0_71, %c256], %69 {strides = array<i32>} : memref<256x576xbf16, #tpu.memory_space<vmem>>, vector<256x64xbf16>,
      %c1_72 = arith.constant 1 : index
      %c2_73 = arith.constant 2 : index
      %c0_74 = arith.constant 0 : index
      %71 = vector.load %arg9[%c1_72, %c2_73, %c0_74] : memref<18x24x64xf32, #tpu.memory_space<vmem>>, vector<16x16x64xf32>
      %72 = vector.shape_cast %71 : vector<16x16x64xf32> to vector<256x64xf32>
      %73 = arith.truncf %72 : vector<256x64xf32> to vector<256x64xbf16>
      %c0_75 = arith.constant 0 : index
      %c320 = arith.constant 320 : index
      %74 = vector.load %arg10[%c0_75, %c320] : memref<256x576xbf16, #tpu.memory_space<vmem>>, vector<256x64xbf16>
      tpu.vector_store %arg10[%c0_75, %c320], %73 {strides = array<i32>} : memref<256x576xbf16, #tpu.memory_space<vmem>>, vector<256x64xbf16>,
      %c2_76 = arith.constant 2 : index
      %c0_77 = arith.constant 0 : index
      %c0_78 = arith.constant 0 : index
      %75 = vector.load %arg9[%c2_76, %c0_77, %c0_78] : memref<18x24x64xf32, #tpu.memory_space<vmem>>, vector<16x16x64xf32>
      %76 = vector.shape_cast %75 : vector<16x16x64xf32> to vector<256x64xf32>
      %77 = arith.truncf %76 : vector<256x64xf32> to vector<256x64xbf16>
      %c0_79 = arith.constant 0 : index
      %c384 = arith.constant 384 : index
      %78 = vector.load %arg10[%c0_79, %c384] : memref<256x576xbf16, #tpu.memory_space<vmem>>, vector<256x64xbf16>
      tpu.vector_store %arg10[%c0_79, %c384], %77 {strides = array<i32>} : memref<256x576xbf16, #tpu.memory_space<vmem>>, vector<256x64xbf16>,
      %c2_80 = arith.constant 2 : index
      %c1_81 = arith.constant 1 : index
      %c0_82 = arith.constant 0 : index
      %79 = vector.load %arg9[%c2_80, %c1_81, %c0_82] : memref<18x24x64xf32, #tpu.memory_space<vmem>>, vector<16x16x64xf32>
      %80 = vector.shape_cast %79 : vector<16x16x64xf32> to vector<256x64xf32>
      %81 = arith.truncf %80 : vector<256x64xf32> to vector<256x64xbf16>
      %c0_83 = arith.constant 0 : index
      %c448 = arith.constant 448 : index
      %82 = vector.load %arg10[%c0_83, %c448] : memref<256x576xbf16, #tpu.memory_space<vmem>>, vector<256x64xbf16>
      tpu.vector_store %arg10[%c0_83, %c448], %81 {strides = array<i32>} : memref<256x576xbf16, #tpu.memory_space<vmem>>, vector<256x64xbf16>,
      %c2_84 = arith.constant 2 : index
      %c2_85 = arith.constant 2 : index
      %c0_86 = arith.constant 0 : index
      %83 = vector.load %arg9[%c2_84, %c2_85, %c0_86] : memref<18x24x64xf32, #tpu.memory_space<vmem>>, vector<16x16x64xf32>
      %84 = vector.shape_cast %83 : vector<16x16x64xf32> to vector<256x64xf32>
      %85 = arith.truncf %84 : vector<256x64xf32> to vector<256x64xbf16>
      %c0_87 = arith.constant 0 : index
      %c512 = arith.constant 512 : index
      %86 = vector.load %arg10[%c0_87, %c512] : memref<256x576xbf16, #tpu.memory_space<vmem>>, vector<256x64xbf16>
      tpu.vector_store %arg10[%c0_87, %c512], %85 {strides = array<i32>} : memref<256x576xbf16, #tpu.memory_space<vmem>>, vector<256x64xbf16>,
      %c0_88 = arith.constant 0 : index
      %c0_89 = arith.constant 0 : index
      %87 = vector.load %arg10[%c0_88, %c0_89] : memref<256x576xbf16, #tpu.memory_space<vmem>>, vector<256x576xbf16>
      %c0_90 = arith.constant 0 : index
      %c0_91 = arith.constant 0 : index
      %88 = vector.load %arg1[%c0_90, %c0_91] : memref<576x64xbf16, #tpu.memory_space<vmem>>, vector<576x64xbf16>
      %cst_92 = arith.constant dense<0.000000e+00> : vector<256x64xf32>
      %89 = tpu.matmul %87, %88, %cst_92 {dimension_numbers = #tpu.dot_dimension_numbers<[1], [0], [0], [1], [0, 0, 1, 1], [], []>} : vector<256x576xbf16>, vector<576x64xbf16>, vector<256x64xf32> -> vector<256x64xf32>
      %90 = arith.index_cast %46 : i32 to index
      %c0_93 = arith.constant 0 : index
      %c0_94 = arith.constant 0 : index
      %91 = vector.load %arg11[%90, %c0_93, %c0_94] : memref<2x256x64xf32, #tpu.memory_space<vmem>>, vector<1x256x64xf32>
      %92 = vector.shape_cast %91 : vector<1x256x64xf32> to vector<256x64xf32>
      %93 = vector.shape_cast %89 : vector<256x64xf32> to vector<1x256x64xf32>
      tpu.vector_store %arg11[%90, %c0_93, %c0_94], %93 {strides = array<i32>} : memref<2x256x64xf32, #tpu.memory_space<vmem>>, vector<1x256x64xf32>,
      %c0_95 = arith.constant 0 : index
      %c0_96 = arith.constant 0 : index
      %94 = vector.load %arg12[%c0_95, %c0_96] : memref<1x64xf32, #tpu.memory_space<vmem>>, vector<1x64xf32>
      %cst_97 = arith.constant dense<0.000000e+00> : vector<64xf32>
      %95 = vector.multi_reduction <add>, %89, %cst_97 [0] : vector<256x64xf32> to vector<64xf32>
      %96 = vector.shape_cast %95 : vector<64xf32> to vector<1x64xf32>
      %97 = arith.addf %94, %96 : vector<1x64xf32>
      %c0_98 = arith.constant 0 : index
      %c0_99 = arith.constant 0 : index
      %98 = vector.load %arg12[%c0_98, %c0_99] : memref<1x64xf32, #tpu.memory_space<vmem>>, vector<1x64xf32>
      tpu.vector_store %arg12[%c0_98, %c0_99], %97 {strides = array<i32>} : memref<1x64xf32, #tpu.memory_space<vmem>>, vector<1x64xf32>,
      %c0_100 = arith.constant 0 : index
      %c0_101 = arith.constant 0 : index
      %99 = vector.load %arg13[%c0_100, %c0_101] : memref<1x64xf32, #tpu.memory_space<vmem>>, vector<1x64xf32>
      %100 = arith.mulf %89, %89 : vector<256x64xf32>
      %cst_102 = arith.constant dense<0.000000e+00> : vector<64xf32>
      %101 = vector.multi_reduction <add>, %100, %cst_102 [0] : vector<256x64xf32> to vector<64xf32>
      %102 = vector.shape_cast %101 : vector<64xf32> to vector<1x64xf32>
      %103 = arith.addf %99, %102 : vector<1x64xf32>
      %c0_103 = arith.constant 0 : index
      %c0_104 = arith.constant 0 : index
      %104 = vector.load %arg13[%c0_103, %c0_104] : memref<1x64xf32, #tpu.memory_space<vmem>>, vector<1x64xf32>
      tpu.vector_store %arg13[%c0_103, %c0_104], %103 {strides = array<i32>} : memref<1x64xf32, #tpu.memory_space<vmem>>, vector<1x64xf32>,
    }
    %c2_i32_8 = arith.constant 2 : i32
    %c0_9 = arith.constant 0 : index
    %c0_10 = arith.constant 0 : index
    %7 = vector.load %arg12[%c0_9, %c0_10] : memref<1x64xf32, #tpu.memory_space<vmem>>, vector<1x64xf32>
    %cst_11 = arith.constant 0.001953125 : f32
    %8 = vector.broadcast %cst_11 : f32 to vector<1x64xf32>
    %9 = arith.mulf %7, %8 : vector<1x64xf32>
    %c0_12 = arith.constant 0 : index
    %c0_13 = arith.constant 0 : index
    %10 = vector.load %arg13[%c0_12, %c0_13] : memref<1x64xf32, #tpu.memory_space<vmem>>, vector<1x64xf32>
    %cst_14 = arith.constant 0.001953125 : f32
    %11 = vector.broadcast %cst_14 : f32 to vector<1x64xf32>
    %12 = arith.mulf %10, %11 : vector<1x64xf32>
    %13 = arith.mulf %9, %9 : vector<1x64xf32>
    %14 = arith.subf %12, %13 : vector<1x64xf32>
    %c0_15 = arith.constant 0 : index
    %c0_16 = arith.constant 0 : index
    %15 = vector.load %arg2[%c0_15, %c0_16] : memref<1x64xf32, #tpu.memory_space<vmem>>, vector<1x64xf32>
    %cst_17 = arith.constant 9.99999974E-6 : f32
    %16 = vector.broadcast %cst_17 : f32 to vector<1x64xf32>
    %17 = arith.addf %14, %16 : vector<1x64xf32>
    %18 = math.rsqrt %17 : vector<1x64xf32>
    %19 = arith.mulf %15, %18 : vector<1x64xf32>
    %c0_18 = arith.constant 0 : index
    %c0_19 = arith.constant 0 : index
    %20 = vector.load %arg3[%c0_18, %c0_19] : memref<1x64xf32, #tpu.memory_space<vmem>>, vector<1x64xf32>
    %21 = arith.mulf %9, %19 : vector<1x64xf32>
    %22 = arith.subf %20, %21 : vector<1x64xf32>
    %cst_20 = arith.constant 0.000000e+00 : f32
    %23 = vector.broadcast %cst_20 : f32 to vector<1x64xf32>
    %c0_21 = arith.constant 0 : index
    %c0_22 = arith.constant 0 : index
    %24 = vector.load %arg12[%c0_21, %c0_22] : memref<1x64xf32, #tpu.memory_space<vmem>>, vector<1x64xf32>
    tpu.vector_store %arg12[%c0_21, %c0_22], %23 {strides = array<i32>} : memref<1x64xf32, #tpu.memory_space<vmem>>, vector<1x64xf32>,
    %cst_23 = arith.constant 0.000000e+00 : f32
    %25 = vector.broadcast %cst_23 : f32 to vector<1x64xf32>
    %c0_24 = arith.constant 0 : index
    %c0_25 = arith.constant 0 : index
    %26 = vector.load %arg13[%c0_24, %c0_25] : memref<1x64xf32, #tpu.memory_space<vmem>>, vector<1x64xf32>
    tpu.vector_store %arg13[%c0_24, %c0_25], %25 {strides = array<i32>} : memref<1x64xf32, #tpu.memory_space<vmem>>, vector<1x64xf32>,
    %c0_i32_26 = arith.constant 0 : i32
    %c2_i32_27 = arith.constant 2 : i32
    %27 = arith.addi %c0_i32_26, %c2_i32_27 : i32
    %c1_i32_28 = arith.constant 1 : i32
    scf.for %arg14 = %c0_i32_26 to %27 step %c1_i32_28  : i32 {
      %c1_i32_45 = arith.constant 1 : i32
      %45 = arith.muli %arg14, %c1_i32_45 : i32
      %c0_i32_46 = arith.constant 0 : i32
      %46 = arith.addi %c0_i32_46, %45 : i32
      %47 = arith.index_cast %46 : i32 to index
      %c0_47 = arith.constant 0 : index
      %c0_48 = arith.constant 0 : index
      %48 = vector.load %arg11[%47, %c0_47, %c0_48] : memref<2x256x64xf32, #tpu.memory_space<vmem>>, vector<1x256x64xf32>
      %49 = vector.shape_cast %48 : vector<1x256x64xf32> to vector<256x64xf32>
      %50 = vector.broadcast %19 : vector<1x64xf32> to vector<256x64xf32>
      %51 = arith.mulf %49, %50 : vector<256x64xf32>
      %52 = vector.broadcast %22 : vector<1x64xf32> to vector<256x64xf32>
      %53 = arith.addf %51, %52 : vector<256x64xf32>
      %cst_49 = arith.constant 0.000000e+00 : f32
      %54 = vector.broadcast %cst_49 : f32 to vector<256x64xf32>
      %55 = arith.cmpf ogt, %53, %54 : vector<256x64xf32>
      %c0_50 = arith.constant 0 : index
      %c0_51 = arith.constant 0 : index
      %56 = vector.load %arg4[%c0_50, %c0_51] : memref<1x1xf32, #tpu.memory_space<vmem>>, vector<1x1xf32>
      %57 = vector.broadcast %56 : vector<1x1xf32> to vector<256x64xf32>
      %58 = arith.mulf %53, %57 : vector<256x64xf32>
      %59 = arith.select %55, %53, %58 : vector<256x64xi1>, vector<256x64xf32>
      %60 = vector.shape_cast %59 : vector<256x64xf32> to vector<16x16x64xf32>
      %c1 = arith.constant 1 : index
      %c1_52 = arith.constant 1 : index
      %c0_53 = arith.constant 0 : index
      %61 = vector.load %arg9[%c1, %c1_52, %c0_53] : memref<18x24x64xf32, #tpu.memory_space<vmem>>, vector<16x16x64xf32>
      tpu.vector_store %arg9[%c1, %c1_52, %c0_53], %60 {strides = array<i32>} : memref<18x24x64xf32, #tpu.memory_space<vmem>>, vector<16x16x64xf32>,
      %c0_54 = arith.constant 0 : index
      %c0_55 = arith.constant 0 : index
      %c0_56 = arith.constant 0 : index
      %62 = vector.load %arg9[%c0_54, %c0_55, %c0_56] : memref<18x24x64xf32, #tpu.memory_space<vmem>>, vector<16x16x64xf32>
      %63 = vector.shape_cast %62 : vector<16x16x64xf32> to vector<256x64xf32>
      %64 = arith.truncf %63 : vector<256x64xf32> to vector<256x64xbf16>
      %c0_57 = arith.constant 0 : index
      %c0_58 = arith.constant 0 : index
      %65 = vector.load %arg10[%c0_57, %c0_58] : memref<256x576xbf16, #tpu.memory_space<vmem>>, vector<256x64xbf16>
      tpu.vector_store %arg10[%c0_57, %c0_58], %64 {strides = array<i32>} : memref<256x576xbf16, #tpu.memory_space<vmem>>, vector<256x64xbf16>,
      %c0_59 = arith.constant 0 : index
      %c1_60 = arith.constant 1 : index
      %c0_61 = arith.constant 0 : index
      %66 = vector.load %arg9[%c0_59, %c1_60, %c0_61] : memref<18x24x64xf32, #tpu.memory_space<vmem>>, vector<16x16x64xf32>
      %67 = vector.shape_cast %66 : vector<16x16x64xf32> to vector<256x64xf32>
      %68 = arith.truncf %67 : vector<256x64xf32> to vector<256x64xbf16>
      %c0_62 = arith.constant 0 : index
      %c64 = arith.constant 64 : index
      %69 = vector.load %arg10[%c0_62, %c64] : memref<256x576xbf16, #tpu.memory_space<vmem>>, vector<256x64xbf16>
      tpu.vector_store %arg10[%c0_62, %c64], %68 {strides = array<i32>} : memref<256x576xbf16, #tpu.memory_space<vmem>>, vector<256x64xbf16>,
      %c0_63 = arith.constant 0 : index
      %c2 = arith.constant 2 : index
      %c0_64 = arith.constant 0 : index
      %70 = vector.load %arg9[%c0_63, %c2, %c0_64] : memref<18x24x64xf32, #tpu.memory_space<vmem>>, vector<16x16x64xf32>
      %71 = vector.shape_cast %70 : vector<16x16x64xf32> to vector<256x64xf32>
      %72 = arith.truncf %71 : vector<256x64xf32> to vector<256x64xbf16>
      %c0_65 = arith.constant 0 : index
      %c128 = arith.constant 128 : index
      %73 = vector.load %arg10[%c0_65, %c128] : memref<256x576xbf16, #tpu.memory_space<vmem>>, vector<256x64xbf16>
      tpu.vector_store %arg10[%c0_65, %c128], %72 {strides = array<i32>} : memref<256x576xbf16, #tpu.memory_space<vmem>>, vector<256x64xbf16>,
      %c1_66 = arith.constant 1 : index
      %c0_67 = arith.constant 0 : index
      %c0_68 = arith.constant 0 : index
      %74 = vector.load %arg9[%c1_66, %c0_67, %c0_68] : memref<18x24x64xf32, #tpu.memory_space<vmem>>, vector<16x16x64xf32>
      %75 = vector.shape_cast %74 : vector<16x16x64xf32> to vector<256x64xf32>
      %76 = arith.truncf %75 : vector<256x64xf32> to vector<256x64xbf16>
      %c0_69 = arith.constant 0 : index
      %c192 = arith.constant 192 : index
      %77 = vector.load %arg10[%c0_69, %c192] : memref<256x576xbf16, #tpu.memory_space<vmem>>, vector<256x64xbf16>
      tpu.vector_store %arg10[%c0_69, %c192], %76 {strides = array<i32>} : memref<256x576xbf16, #tpu.memory_space<vmem>>, vector<256x64xbf16>,
      %c1_70 = arith.constant 1 : index
      %c1_71 = arith.constant 1 : index
      %c0_72 = arith.constant 0 : index
      %78 = vector.load %arg9[%c1_70, %c1_71, %c0_72] : memref<18x24x64xf32, #tpu.memory_space<vmem>>, vector<16x16x64xf32>
      %79 = vector.shape_cast %78 : vector<16x16x64xf32> to vector<256x64xf32>
      %80 = arith.truncf %79 : vector<256x64xf32> to vector<256x64xbf16>
      %c0_73 = arith.constant 0 : index
      %c256 = arith.constant 256 : index
      %81 = vector.load %arg10[%c0_73, %c256] : memref<256x576xbf16, #tpu.memory_space<vmem>>, vector<256x64xbf16>
      tpu.vector_store %arg10[%c0_73, %c256], %80 {strides = array<i32>} : memref<256x576xbf16, #tpu.memory_space<vmem>>, vector<256x64xbf16>,
      %c1_74 = arith.constant 1 : index
      %c2_75 = arith.constant 2 : index
      %c0_76 = arith.constant 0 : index
      %82 = vector.load %arg9[%c1_74, %c2_75, %c0_76] : memref<18x24x64xf32, #tpu.memory_space<vmem>>, vector<16x16x64xf32>
      %83 = vector.shape_cast %82 : vector<16x16x64xf32> to vector<256x64xf32>
      %84 = arith.truncf %83 : vector<256x64xf32> to vector<256x64xbf16>
      %c0_77 = arith.constant 0 : index
      %c320 = arith.constant 320 : index
      %85 = vector.load %arg10[%c0_77, %c320] : memref<256x576xbf16, #tpu.memory_space<vmem>>, vector<256x64xbf16>
      tpu.vector_store %arg10[%c0_77, %c320], %84 {strides = array<i32>} : memref<256x576xbf16, #tpu.memory_space<vmem>>, vector<256x64xbf16>,
      %c2_78 = arith.constant 2 : index
      %c0_79 = arith.constant 0 : index
      %c0_80 = arith.constant 0 : index
      %86 = vector.load %arg9[%c2_78, %c0_79, %c0_80] : memref<18x24x64xf32, #tpu.memory_space<vmem>>, vector<16x16x64xf32>
      %87 = vector.shape_cast %86 : vector<16x16x64xf32> to vector<256x64xf32>
      %88 = arith.truncf %87 : vector<256x64xf32> to vector<256x64xbf16>
      %c0_81 = arith.constant 0 : index
      %c384 = arith.constant 384 : index
      %89 = vector.load %arg10[%c0_81, %c384] : memref<256x576xbf16, #tpu.memory_space<vmem>>, vector<256x64xbf16>
      tpu.vector_store %arg10[%c0_81, %c384], %88 {strides = array<i32>} : memref<256x576xbf16, #tpu.memory_space<vmem>>, vector<256x64xbf16>,
      %c2_82 = arith.constant 2 : index
      %c1_83 = arith.constant 1 : index
      %c0_84 = arith.constant 0 : index
      %90 = vector.load %arg9[%c2_82, %c1_83, %c0_84] : memref<18x24x64xf32, #tpu.memory_space<vmem>>, vector<16x16x64xf32>
      %91 = vector.shape_cast %90 : vector<16x16x64xf32> to vector<256x64xf32>
      %92 = arith.truncf %91 : vector<256x64xf32> to vector<256x64xbf16>
      %c0_85 = arith.constant 0 : index
      %c448 = arith.constant 448 : index
      %93 = vector.load %arg10[%c0_85, %c448] : memref<256x576xbf16, #tpu.memory_space<vmem>>, vector<256x64xbf16>
      tpu.vector_store %arg10[%c0_85, %c448], %92 {strides = array<i32>} : memref<256x576xbf16, #tpu.memory_space<vmem>>, vector<256x64xbf16>,
      %c2_86 = arith.constant 2 : index
      %c2_87 = arith.constant 2 : index
      %c0_88 = arith.constant 0 : index
      %94 = vector.load %arg9[%c2_86, %c2_87, %c0_88] : memref<18x24x64xf32, #tpu.memory_space<vmem>>, vector<16x16x64xf32>
      %95 = vector.shape_cast %94 : vector<16x16x64xf32> to vector<256x64xf32>
      %96 = arith.truncf %95 : vector<256x64xf32> to vector<256x64xbf16>
      %c0_89 = arith.constant 0 : index
      %c512 = arith.constant 512 : index
      %97 = vector.load %arg10[%c0_89, %c512] : memref<256x576xbf16, #tpu.memory_space<vmem>>, vector<256x64xbf16>
      tpu.vector_store %arg10[%c0_89, %c512], %96 {strides = array<i32>} : memref<256x576xbf16, #tpu.memory_space<vmem>>, vector<256x64xbf16>,
      %c0_90 = arith.constant 0 : index
      %c0_91 = arith.constant 0 : index
      %98 = vector.load %arg10[%c0_90, %c0_91] : memref<256x576xbf16, #tpu.memory_space<vmem>>, vector<256x576xbf16>
      %c0_92 = arith.constant 0 : index
      %c0_93 = arith.constant 0 : index
      %99 = vector.load %arg5[%c0_92, %c0_93] : memref<576x64xbf16, #tpu.memory_space<vmem>>, vector<576x64xbf16>
      %cst_94 = arith.constant dense<0.000000e+00> : vector<256x64xf32>
      %100 = tpu.matmul %98, %99, %cst_94 {dimension_numbers = #tpu.dot_dimension_numbers<[1], [0], [0], [1], [0, 0, 1, 1], [], []>} : vector<256x576xbf16>, vector<576x64xbf16>, vector<256x64xf32> -> vector<256x64xf32>
      %101 = arith.index_cast %46 : i32 to index
      %c0_95 = arith.constant 0 : index
      %c0_96 = arith.constant 0 : index
      %102 = vector.load %arg11[%101, %c0_95, %c0_96] : memref<2x256x64xf32, #tpu.memory_space<vmem>>, vector<1x256x64xf32>
      %103 = vector.shape_cast %102 : vector<1x256x64xf32> to vector<256x64xf32>
      %104 = vector.shape_cast %100 : vector<256x64xf32> to vector<1x256x64xf32>
      tpu.vector_store %arg11[%101, %c0_95, %c0_96], %104 {strides = array<i32>} : memref<2x256x64xf32, #tpu.memory_space<vmem>>, vector<1x256x64xf32>,
      %c0_97 = arith.constant 0 : index
      %c0_98 = arith.constant 0 : index
      %105 = vector.load %arg12[%c0_97, %c0_98] : memref<1x64xf32, #tpu.memory_space<vmem>>, vector<1x64xf32>
      %cst_99 = arith.constant dense<0.000000e+00> : vector<64xf32>
      %106 = vector.multi_reduction <add>, %100, %cst_99 [0] : vector<256x64xf32> to vector<64xf32>
      %107 = vector.shape_cast %106 : vector<64xf32> to vector<1x64xf32>
      %108 = arith.addf %105, %107 : vector<1x64xf32>
      %c0_100 = arith.constant 0 : index
      %c0_101 = arith.constant 0 : index
      %109 = vector.load %arg12[%c0_100, %c0_101] : memref<1x64xf32, #tpu.memory_space<vmem>>, vector<1x64xf32>
      tpu.vector_store %arg12[%c0_100, %c0_101], %108 {strides = array<i32>} : memref<1x64xf32, #tpu.memory_space<vmem>>, vector<1x64xf32>,
      %c0_102 = arith.constant 0 : index
      %c0_103 = arith.constant 0 : index
      %110 = vector.load %arg13[%c0_102, %c0_103] : memref<1x64xf32, #tpu.memory_space<vmem>>, vector<1x64xf32>
      %111 = arith.mulf %100, %100 : vector<256x64xf32>
      %cst_104 = arith.constant dense<0.000000e+00> : vector<64xf32>
      %112 = vector.multi_reduction <add>, %111, %cst_104 [0] : vector<256x64xf32> to vector<64xf32>
      %113 = vector.shape_cast %112 : vector<64xf32> to vector<1x64xf32>
      %114 = arith.addf %110, %113 : vector<1x64xf32>
      %c0_105 = arith.constant 0 : index
      %c0_106 = arith.constant 0 : index
      %115 = vector.load %arg13[%c0_105, %c0_106] : memref<1x64xf32, #tpu.memory_space<vmem>>, vector<1x64xf32>
      tpu.vector_store %arg13[%c0_105, %c0_106], %114 {strides = array<i32>} : memref<1x64xf32, #tpu.memory_space<vmem>>, vector<1x64xf32>,
    }
    %c2_i32_29 = arith.constant 2 : i32
    %c0_30 = arith.constant 0 : index
    %c0_31 = arith.constant 0 : index
    %28 = vector.load %arg12[%c0_30, %c0_31] : memref<1x64xf32, #tpu.memory_space<vmem>>, vector<1x64xf32>
    %cst_32 = arith.constant 0.001953125 : f32
    %29 = vector.broadcast %cst_32 : f32 to vector<1x64xf32>
    %30 = arith.mulf %28, %29 : vector<1x64xf32>
    %c0_33 = arith.constant 0 : index
    %c0_34 = arith.constant 0 : index
    %31 = vector.load %arg13[%c0_33, %c0_34] : memref<1x64xf32, #tpu.memory_space<vmem>>, vector<1x64xf32>
    %cst_35 = arith.constant 0.001953125 : f32
    %32 = vector.broadcast %cst_35 : f32 to vector<1x64xf32>
    %33 = arith.mulf %31, %32 : vector<1x64xf32>
    %34 = arith.mulf %30, %30 : vector<1x64xf32>
    %35 = arith.subf %33, %34 : vector<1x64xf32>
    %c0_36 = arith.constant 0 : index
    %c0_37 = arith.constant 0 : index
    %36 = vector.load %arg6[%c0_36, %c0_37] : memref<1x64xf32, #tpu.memory_space<vmem>>, vector<1x64xf32>
    %cst_38 = arith.constant 9.99999974E-6 : f32
    %37 = vector.broadcast %cst_38 : f32 to vector<1x64xf32>
    %38 = arith.addf %35, %37 : vector<1x64xf32>
    %39 = math.rsqrt %38 : vector<1x64xf32>
    %40 = arith.mulf %36, %39 : vector<1x64xf32>
    %c0_39 = arith.constant 0 : index
    %c0_40 = arith.constant 0 : index
    %41 = vector.load %arg7[%c0_39, %c0_40] : memref<1x64xf32, #tpu.memory_space<vmem>>, vector<1x64xf32>
    %42 = arith.mulf %30, %40 : vector<1x64xf32>
    %43 = arith.subf %41, %42 : vector<1x64xf32>
    %c0_i32_41 = arith.constant 0 : i32
    %c2_i32_42 = arith.constant 2 : i32
    %44 = arith.addi %c0_i32_41, %c2_i32_42 : i32
    %c1_i32_43 = arith.constant 1 : i32
    scf.for %arg14 = %c0_i32_41 to %44 step %c1_i32_43  : i32 {
      %c1_i32_45 = arith.constant 1 : i32
      %45 = arith.muli %arg14, %c1_i32_45 : i32
      %c0_i32_46 = arith.constant 0 : i32
      %46 = arith.addi %c0_i32_46, %45 : i32
      %47 = arith.index_cast %46 : i32 to index
      %c0_47 = arith.constant 0 : index
      %c0_48 = arith.constant 0 : index
      %48 = vector.load %arg11[%47, %c0_47, %c0_48] : memref<2x256x64xf32, #tpu.memory_space<vmem>>, vector<1x256x64xf32>
      %49 = vector.shape_cast %48 : vector<1x256x64xf32> to vector<256x64xf32>
      %50 = vector.broadcast %40 : vector<1x64xf32> to vector<256x64xf32>
      %51 = arith.mulf %49, %50 : vector<256x64xf32>
      %52 = vector.broadcast %43 : vector<1x64xf32> to vector<256x64xf32>
      %53 = arith.addf %51, %52 : vector<256x64xf32>
      %54 = arith.index_cast %46 : i32 to index
      %c0_49 = arith.constant 0 : index
      %c0_50 = arith.constant 0 : index
      %c0_51 = arith.constant 0 : index
      %55 = vector.load %arg0[%54, %c0_49, %c0_50, %c0_51] : memref<2x16x16x64xf32, #tpu.memory_space<vmem>>, vector<1x16x16x64xf32>
      %56 = vector.shape_cast %55 : vector<1x16x16x64xf32> to vector<16x16x64xf32>
      %57 = vector.shape_cast %53 : vector<256x64xf32> to vector<16x16x64xf32>
      %58 = arith.addf %56, %57 : vector<16x16x64xf32>
      %59 = arith.index_cast %46 : i32 to index
      %c0_52 = arith.constant 0 : index
      %c0_53 = arith.constant 0 : index
      %c0_54 = arith.constant 0 : index
      %60 = vector.load %arg8[%59, %c0_52, %c0_53, %c0_54] : memref<2x16x16x64xf32, #tpu.memory_space<vmem>>, vector<1x16x16x64xf32>
      %61 = vector.shape_cast %60 : vector<1x16x16x64xf32> to vector<16x16x64xf32>
      %62 = vector.shape_cast %58 : vector<16x16x64xf32> to vector<1x16x16x64xf32>
      tpu.vector_store %arg8[%59, %c0_52, %c0_53, %c0_54], %62 {strides = array<i32>} : memref<2x16x16x64xf32, #tpu.memory_space<vmem>>, vector<1x16x16x64xf32>,
    }
    %c2_i32_44 = arith.constant 2 : i32
    return
  }
}

</mosaic_0001>

<bundles_post_ra>
// kernel: tpu_custom_call.1
= control target key start
LH: loop header
LB: loop body
LE: loop exit
PB: predicated region body
PF: predicated region fallthrough
CT: control target
= control target key end

     0   :  { %s7778_s0 = inlined_call_operand.vmem [shape: f32[2,16,16,64], index: 0, kind: input, shape index: {}]   ;;  %s7779_s1 = inlined_call_operand.vmem [shape: bf16[576,64], index: 1, kind: input, shape index: {}]   ;;  %s7780_s2 = inlined_call_operand.vmem [shape: f32[1,64], index: 2, kind: input, shape index: {}]   ;;  %s7781_s3 = inlined_call_operand.vmem [shape: f32[1,64], index: 3, kind: input, shape index: {}]   ;;  %s7782_s4 = inlined_call_operand.<no memory space> [shape: f32[1,1], index: 4, kind: input, shape index: {}]   ;;  %s7783_s5 = inlined_call_operand.vmem [shape: bf16[576,64], index: 5, kind: input, shape index: {}]   ;;  %s7784_s6 = inlined_call_operand.vmem [shape: f32[1,64], index: 6, kind: input, shape index: {}]   ;;  %s7785_s7 = inlined_call_operand.vmem [shape: f32[1,64], index: 7, kind: input, shape index: {}]   ;;  %s7786_s8 = inlined_call_operand.hbm [shape: f32[2,16,16,64], index: 8, kind: output, shape index: {}]  }
   0x1   :  { %v13_v0 = vstv %s7782_s4 }
   0x2   :  { %14 = vst [vmem:[#allocation7] sm:$0x1] %v13_v0 }
   0x3   :  { %15 = vsyncpa [#allocation9], 0  ;;  %vm33_vm0 = vcmask 523264   ;;  %vm7787_vm1 = vcmask 516096   ;;  %v5451_v1 = vmov 0.0   ;;  %s5618_s4 = smov 0  }
   0x4   :  { %34 = vst.msk [vmem:[#allocation2] sm:$0xff] %vm33_vm0, %v5451_v1  ;;  %35 = vst.msk [vmem:[#allocation2 + $0x8] sm:$0xff] %vm33_vm0, %v5451_v1 }
   0x5   :  { %36 = vst.msk [vmem:[#allocation2 + $0x10] sm:$0xff] %vm33_vm0, %v5451_v1  ;;  %37 = vst.msk [vmem:[#allocation2 + $0x18] sm:$0xff] %vm33_vm0, %v5451_v1 }
   0x6   :  { %38 = vst.msk [vmem:[#allocation2 + $0x20] sm:$0xff] %vm33_vm0, %v5451_v1  ;;  %39 = vst.msk [vmem:[#allocation2 + $0x28] sm:$0xff] %vm33_vm0, %v5451_v1 }
   0x7   :  { %40 = vst.msk [vmem:[#allocation2 + $0x30] sm:$0xff] %vm33_vm0, %v5451_v1  ;;  %41 = vst.msk [vmem:[#allocation2 + $0x38] sm:$0xff] %vm33_vm0, %v5451_v1 }
   0x8   :  { %42 = vst.msk [vmem:[#allocation2 + $0x40] sm:$0xff] %vm33_vm0, %v5451_v1  ;;  %43 = vst.msk [vmem:[#allocation2 + $0x48] sm:$0xff] %vm33_vm0, %v5451_v1 }
   0x9   :  { %44 = vst.msk [vmem:[#allocation2 + $0x50] sm:$0xff] %vm33_vm0, %v5451_v1  ;;  %45 = vst.msk [vmem:[#allocation2 + $0x58] sm:$0xff] %vm33_vm0, %v5451_v1 }
   0xa   :  { %46 = vst.msk [vmem:[#allocation2 + $0x60] sm:$0xff] %vm33_vm0, %v5451_v1  ;;  %47 = vst.msk [vmem:[#allocation2 + $0x68] sm:$0xff] %vm33_vm0, %v5451_v1 }
   0xb   :  { %48 = vst.msk [vmem:[#allocation2 + $0x70] sm:$0xff] %vm33_vm0, %v5451_v1  ;;  %49 = vst.msk [vmem:[#allocation2 + $0x78] sm:$0xff] %vm33_vm0, %v5451_v1 }
   0xc   :  { %50 = vst.msk [vmem:[#allocation2 + $0x80] sm:$0xff] %vm33_vm0, %v5451_v1  ;;  %51 = vst.msk [vmem:[#allocation2 + $0x88] sm:$0xff] %vm33_vm0, %v5451_v1 }
   0xd   :  { %52 = vst.msk [vmem:[#allocation2 + $0x90] sm:$0xff] %vm33_vm0, %v5451_v1  ;;  %53 = vst.msk [vmem:[#allocation2 + $0x98] sm:$0xff] %vm33_vm0, %v5451_v1 }
   0xe   :  { %54 = vst.msk [vmem:[#allocation2 + $0xa0] sm:$0xff] %vm33_vm0, %v5451_v1  ;;  %55 = vst.msk [vmem:[#allocation2 + $0xa8] sm:$0xff] %vm33_vm0, %v5451_v1 }
   0xf   :  { %56 = vst.msk [vmem:[#allocation2 + $0xb0] sm:$0xff] %vm33_vm0, %v5451_v1  ;;  %57 = vst.msk [vmem:[#allocation2 + $0xb8] sm:$0xff] %vm33_vm0, %v5451_v1 }
  0x10   :  { %58 = vst.msk [vmem:[#allocation2 + $0xc0] sm:$0xff] %vm33_vm0, %v5451_v1  ;;  %59 = vst.msk [vmem:[#allocation2 + $0xc8] sm:$0xff] %vm33_vm0, %v5451_v1 }
  0x11   :  { %60 = vst.msk [vmem:[#allocation2 + $0xd0] sm:$0xff] %vm33_vm0, %v5451_v1  ;;  %61 = vst.msk [vmem:[#allocation2 + $0xd8] sm:$0xff] %vm33_vm0, %v5451_v1 }
  0x12   :  { %62 = vst.msk [vmem:[#allocation2 + $0xe0] sm:$0xff] %vm33_vm0, %v5451_v1  ;;  %63 = vst.msk [vmem:[#allocation2 + $0xe8] sm:$0xff] %vm33_vm0, %v5451_v1 }
  0x13   :  { %64 = vst.msk [vmem:[#allocation2 + $0xf0] sm:$0xff] %vm33_vm0, %v5451_v1  ;;  %65 = vst.msk [vmem:[#allocation2 + $0xf8] sm:$0xff] %vm33_vm0, %v5451_v1 }
  0x14   :  { %66 = vst.msk [vmem:[#allocation2 + $0x100] sm:$0xff] %vm33_vm0, %v5451_v1  ;;  %67 = vst.msk [vmem:[#allocation2 + $0x108] sm:$0xff] %vm33_vm0, %v5451_v1 }
  0x15   :  { %68 = vst.msk [vmem:[#allocation2 + $0x110] sm:$0xff] %vm33_vm0, %v5451_v1  ;;  %69 = vst.msk [vmem:[#allocation2 + $0x118] sm:$0xff] %vm33_vm0, %v5451_v1 }
  0x16   :  { %70 = vst.msk [vmem:[#allocation2 + $0x120] sm:$0xff] %vm33_vm0, %v5451_v1  ;;  %71 = vst.msk [vmem:[#allocation2 + $0x128] sm:$0xff] %vm33_vm0, %v5451_v1 }
  0x17   :  { %72 = vst.msk [vmem:[#allocation2 + $0x130] sm:$0xff] %vm33_vm0, %v5451_v1  ;;  %73 = vst.msk [vmem:[#allocation2 + $0x138] sm:$0xff] %vm33_vm0, %v5451_v1 }
  0x18   :  { %74 = vst.msk [vmem:[#allocation2 + $0x140] sm:$0xff] %vm33_vm0, %v5451_v1  ;;  %75 = vst.msk [vmem:[#allocation2 + $0x148] sm:$0xff] %vm33_vm0, %v5451_v1 }
  0x19   :  { %76 = vst.msk [vmem:[#allocation2 + $0x150] sm:$0xff] %vm33_vm0, %v5451_v1  ;;  %77 = vst.msk [vmem:[#allocation2 + $0x158] sm:$0xff] %vm33_vm0, %v5451_v1 }
  0x1a   :  { %78 = vst.msk [vmem:[#allocation2 + $0x160] sm:$0xff] %vm33_vm0, %v5451_v1  ;;  %79 = vst.msk [vmem:[#allocation2 + $0x168] sm:$0xff] %vm33_vm0, %v5451_v1 }
  0x1b   :  { %80 = vst.msk [vmem:[#allocation2 + $0x170] sm:$0xff] %vm33_vm0, %v5451_v1  ;;  %81 = vst.msk [vmem:[#allocation2 + $0x178] sm:$0xff] %vm33_vm0, %v5451_v1 }
  0x1c   :  { %82 = vst.msk [vmem:[#allocation2 + $0x180] sm:$0xff] %vm33_vm0, %v5451_v1  ;;  %83 = vst.msk [vmem:[#allocation2 + $0x188] sm:$0xff] %vm33_vm0, %v5451_v1 }
  0x1d   :  { %84 = vst.msk [vmem:[#allocation2 + $0x190] sm:$0xff] %vm33_vm0, %v5451_v1  ;;  %85 = vst.msk [vmem:[#allocation2 + $0x198] sm:$0xff] %vm33_vm0, %v5451_v1 }
  0x1e   :  { %86 = vst.msk [vmem:[#allocation2 + $0x1a0] sm:$0xff] %vm33_vm0, %v5451_v1  ;;  %87 = vst.msk [vmem:[#allocation2 + $0x1a8] sm:$0xff] %vm33_vm0, %v5451_v1 }
  0x1f   :  { %89 = vst.msk [vmem:[#allocation5] sm:$0x1] %vm7787_vm1, %v5451_v1  ;;  %90 = vst.msk [vmem:[#allocation6] sm:$0x1] %vm7787_vm1, %v5451_v1 }
  0x20 LB: > { %v228_v2 = vld [vmem:[#allocation2 + $0x1] sm:$0xff]  ;;  %v229_v3 = vld [vmem:[#allocation2 + $0x9] sm:$0xff]  ;;  %s4587_s9 = sshll.u32 %s5441_s4, 8  ;;  %s5452_s15 = smov 64   ;;  %vm7788_vm2 = vcmask 1048064   ;;  %s5441_s4 = sphi %s5618_s4, %s96_s4  }
  0x21   : > { %v260_v4 = vpack.c.bf16 %v229_v3, %v228_v2  ;;  %v5326_v5 = vld [vmem:[%s7779_s1 + $0x40] sm:$0xff]   ;;  %s5635_s14 = scalar_lea.vmem %s7778_s0, %s4587_s9  ;;  %v5328_v7 = vld [vmem:[%s7779_s1 + $0x48] sm:$0xff]   ;;  %s6210_s22 = scalar_lea.vmem [#allocation4], %s4587_s9 }
  0x22   : > { %v5327_v6 = vld [vmem:[%s7779_s1] sm:$0xff]   ;;  %4695 = vmatprep.subr.bf16.mxu0 %v5326_v5  ;;  %v100_v9 = vld [vmem:[%s5635_s14 + $0x8] sm:$0xff]  ;;  %5263 = vmatprep.subr.bf16.mxu1 %v5326_v5  ;;  %v121_v12 = vld [vmem:[%s5635_s14 + $0xb0] sm:$0xff]  ;;  %s96_s4 = sadd.s32 1, %s5441_s4  }
  0x23   : > { %292 = vrot.lane.b32.xlu1 %v260_v4, %s5452_s15  ;;  %v99_v8 = vld [vmem:[%s5635_s14] sm:$0xff]  ;;  %4696 = vmatpush3.bf16.msra.mxu0 %v5327_v6  ;;  %133 = vst.msk [vmem:[#allocation2 + $0x21] sm:$0xff] %vm33_vm0, %v100_v9  ;;  %v124_v11 = vld [vmem:[%s5635_s14 + $0xc8] sm:$0xff]  ;;  %v122_v13 = vld [vmem:[%s5635_s14 + $0xb8] sm:$0xff]  ;;  %p93_p0 = scmp.ge.s32.totalorder %s96_s4, 2  }
  0x24   : > { %v123_v10 = vld [vmem:[%s5635_s14 + $0xc0] sm:$0xff]  ;;  %132 = vst.msk [vmem:[#allocation2 + $0x19] sm:$0xff] %vm33_vm0, %v99_v8  ;;  %5271 = vmatpush3.bf16.msra.mxu1 %v5327_v6  ;;  %4697 = vmatprep.subr.bf16.mxu0 %v5328_v7  ;;  %157 = vst.msk [vmem:[#allocation2 + $0x141] sm:$0xff] %vm33_vm0, %v124_v11  ;;  %v101_v14 = vld [vmem:[%s5635_s14 + $0x10] sm:$0xff]  ;;  %s6415_s24 = smov (%p93_p0), 0  }
  0x25   : > { %156 = vst.msk [vmem:[#allocation2 + $0x139] sm:$0xff] %vm33_vm0, %v123_v10  ;;  %154 = vst.msk [vmem:[#allocation2 + $0x121] sm:$0xff] %vm33_vm0, %v121_v12  ;;  %v102_v15 = vld [vmem:[%s5635_s14 + $0x18] sm:$0xff]  ;;  %v125_v16 = vld [vmem:[%s5635_s14 + $0xd0] sm:$0xff]  ;;  %5264 = vmatprep.subr.bf16.mxu1 %v5328_v7 }
  0x26   : > { %155 = vst.msk [vmem:[#allocation2 + $0x129] sm:$0xff] %vm33_vm0, %v122_v13  ;;  %134 = vst.msk [vmem:[#allocation2 + $0x31] sm:$0xff] %vm33_vm0, %v101_v14  ;;  %v126_v17 = vld [vmem:[%s5635_s14 + $0xd8] sm:$0xff]  ;;  %v103_v18 = vld [vmem:[%s5635_s14 + $0x20] sm:$0xff] }
  0x27   : > { %135 = vst.msk [vmem:[#allocation2 + $0x39] sm:$0xff] %vm33_vm0, %v102_v15  ;;  %158 = vst.msk [vmem:[#allocation2 + $0x151] sm:$0xff] %vm33_vm0, %v125_v16  ;;  %v104_v19 = vld [vmem:[%s5635_s14 + $0x28] sm:$0xff]  ;;  %v127_v20 = vld [vmem:[%s5635_s14 + $0xe0] sm:$0xff] }
  0x28   : > { %159 = vst.msk [vmem:[#allocation2 + $0x159] sm:$0xff] %vm33_vm0, %v126_v17  ;;  %136 = vst.msk [vmem:[#allocation2 + $0x49] sm:$0xff] %vm33_vm0, %v103_v18  ;;  %v128_v21 = vld [vmem:[%s5635_s14 + $0xe8] sm:$0xff]  ;;  %v105_v22 = vld [vmem:[%s5635_s14 + $0x30] sm:$0xff] }
  0x29   : > { %137 = vst.msk [vmem:[#allocation2 + $0x51] sm:$0xff] %vm33_vm0, %v104_v19  ;;  %160 = vst.msk [vmem:[#allocation2 + $0x169] sm:$0xff] %vm33_vm0, %v127_v20  ;;  %v106_v23 = vld [vmem:[%s5635_s14 + $0x38] sm:$0xff]  ;;  %v129_v24 = vld [vmem:[%s5635_s14 + $0xf0] sm:$0xff] }
  0x2a   : > { %161 = vst.msk [vmem:[#allocation2 + $0x171] sm:$0xff] %vm33_vm0, %v128_v21  ;;  %138 = vst.msk [vmem:[#allocation2 + $0x61] sm:$0xff] %vm33_vm0, %v105_v22  ;;  %v130_v25 = vld [vmem:[%s5635_s14 + $0xf8] sm:$0xff]  ;;  %v107_v26 = vld [vmem:[%s5635_s14 + $0x40] sm:$0xff] }
  0x2b   : > { %139 = vst.msk [vmem:[#allocation2 + $0x69] sm:$0xff] %vm33_vm0, %v106_v23  ;;  %162 = vst.msk [vmem:[#allocation2 + $0x181] sm:$0xff] %vm33_vm0, %v129_v24  ;;  %v108_v27 = vld [vmem:[%s5635_s14 + $0x48] sm:$0xff]  ;;  %v109_v28 = vld [vmem:[%s5635_s14 + $0x50] sm:$0xff] }
  0x2c   : > { %163 = vst.msk [vmem:[#allocation2 + $0x189] sm:$0xff] %vm33_vm0, %v130_v25  ;;  %140 = vst.msk [vmem:[#allocation2 + $0x79] sm:$0xff] %vm33_vm0, %v107_v26  ;;  %v110_v29 = vld [vmem:[%s5635_s14 + $0x58] sm:$0xff]  ;;  %v111_v30 = vld [vmem:[%s5635_s14 + $0x60] sm:$0xff] }
  0x2d   : > { %141 = vst.msk [vmem:[#allocation2 + $0x81] sm:$0xff] %vm33_vm0, %v108_v27  ;;  %142 = vst.msk [vmem:[#allocation2 + $0x91] sm:$0xff] %vm33_vm0, %v109_v28  ;;  %v112_v31 = vld [vmem:[%s5635_s14 + $0x68] sm:$0xff]  ;;  %v421_v32 = vld [vmem:[#allocation2 + $0x18] sm:$0xff] }
  0x2e   : > { %v422_v33 = vld [vmem:[#allocation2 + $0x20] sm:$0xff]  ;;  %v445_v34 = vld [vmem:[#allocation2 + $0x138] sm:$0xff]  ;;  %143 = vst.msk [vmem:[#allocation2 + $0x99] sm:$0xff] %vm33_vm0, %v110_v29  ;;  %144 = vst.msk [vmem:[#allocation2 + $0xa9] sm:$0xff] %vm33_vm0, %v111_v30 }
  0x2f   : > { %145 = vst.msk [vmem:[#allocation2 + $0xb1] sm:$0xff] %vm33_vm0, %v112_v31  ;;  %v453_v35 = vpack.c.bf16 %v422_v33, %v421_v32  ;;  %v446_v36 = vld [vmem:[#allocation2 + $0x140] sm:$0xff]  ;;  %v253_v38 = vld [vmem:[#allocation2 + $0x129] sm:$0xff]  ;;  %v424_v42 = vld [vmem:[#allocation2 + $0x38] sm:$0xff] }
  0x30   : > { %v252_v37 = vld [vmem:[#allocation2 + $0x121] sm:$0xff]  ;;  %v465_v39 = vpack.c.bf16 %v446_v36, %v445_v34  ;;  %v423_v41 = vld [vmem:[#allocation2 + $0x30] sm:$0xff]  ;;  %v448_v45 = vld [vmem:[#allocation2 + $0x158] sm:$0xff] }
  0x31   : > { %v5689_v40 = vpack.c.bf16 %v253_v38, %v252_v37  ;;  %v447_v43 = vld [vmem:[#allocation2 + $0x150] sm:$0xff]  ;;  %485 = vrot.lane.b32.xlu0 %v453_v35, %s5452_s15  ;;  %v454_v44 = vpack.c.bf16 %v424_v42, %v423_v41  ;;  %213 = vst.msk [vmem:[#allocation3 + $0x28] sm:$0xff] %vm33_vm0, %v453_v35  ;;  %v254_v47 = vld [vmem:[#allocation2 + $0x139] sm:$0xff]  ;;  %v255_v48 = vld [vmem:[#allocation2 + $0x141] sm:$0xff] }
  0x32   : > { %v466_v46 = vpack.c.bf16 %v448_v45, %v447_v43  ;;  %v425_v49 = vld [vmem:[#allocation2 + $0x48] sm:$0xff]  ;;  %225 = vst.msk [vmem:[#allocation3 + $0x208] sm:$0xff] %vm33_vm0, %v465_v39  ;;  %v426_v50 = vld [vmem:[#allocation2 + $0x50] sm:$0xff]  ;;  %v427_v55 = vld [vmem:[#allocation2 + $0x60] sm:$0xff]  ;;  %v5700_v59 = vpack.c.bf16 %v255_v48, %v254_v47 }
  0x33   : > { %316 = vrot.lane.b32.xlu1 %v5689_v40, %s5452_s15  ;;  %v449_v51 = vld [vmem:[#allocation2 + $0x168] sm:$0xff]  ;;  %v450_v52 = vld [vmem:[#allocation2 + $0x170] sm:$0xff]  ;;  %214 = vst.msk [vmem:[#allocation3 + $0x50] sm:$0xff] %vm33_vm0, %v454_v44  ;;  %v455_v53 = vpack.c.bf16 %v426_v50, %v425_v49  ;;  %v230_v57 = vld [vmem:[#allocation2 + $0x19] sm:$0xff] }
  0x34   : > { %v467_v54 = vpack.c.bf16 %v450_v52, %v449_v51  ;;  %226 = vst.msk [vmem:[#allocation3 + $0x230] sm:$0xff] %vm33_vm0, %v466_v46  ;;  %v428_v56 = vld [vmem:[#allocation2 + $0x68] sm:$0xff]  ;;  %v613_v62 = vld [vmem:[#allocation2 + $0x1a] sm:$0xff]  ;;  %v256_v0 = vld [vmem:[#allocation2 + $0x151] sm:$0xff] }
  0x35   : > { %509 = vrot.lane.b32.xlu0 %v465_v39, %s5452_s15  ;;  %v231_v58 = vld [vmem:[#allocation2 + $0x21] sm:$0xff]  ;;  %v5702_v60 = vpack.c.bf16 %v428_v56, %v427_v55  ;;  %215 = vst.msk [vmem:[#allocation3 + $0x78] sm:$0xff] %vm33_vm0, %v455_v53  ;;  %v257_v3 = vld [vmem:[#allocation2 + $0x159] sm:$0xff]  ;;  %v232_v6 = vld [vmem:[#allocation2 + $0x31] sm:$0xff] }
  0x36   : > { %227 = vst.msk [vmem:[#allocation3 + $0x258] sm:$0xff] %vm33_vm0, %v467_v54  ;;  %v261_v61 = vpack.c.bf16 %v231_v58, %v230_v57  ;;  %v614_v63 = vld [vmem:[#allocation2 + $0x22] sm:$0xff]  ;;  %v615_v4 = vld [vmem:[#allocation2 + $0x32] sm:$0xff]  ;;  %v616_v5 = vld [vmem:[#allocation2 + $0x3a] sm:$0xff]  ;;  %v5719_v11 = vpack.c.bf16 %v257_v3, %v256_v0 }
  0x37   : > { %511 = vrot.lane.b32.xlu1 %v466_v46, %s5452_s15  ;;  %216 = vst.msk [vmem:[#allocation3 + $0xa0] sm:$0xff] %vm33_vm0, %v5702_v60  ;;  %v5711_v2 = vpack.c.bf16 %v614_v63, %v613_v62  ;;  %v5713_v7 = vpack.c.bf16 %v616_v5, %v615_v4  ;;  %v233_v8 = vld [vmem:[#allocation2 + $0x39] sm:$0xff]  ;;  %v617_v9 = vld [vmem:[#allocation2 + $0x4a] sm:$0xff]  ;;  %v619_v17 = vld [vmem:[#allocation2 + $0x62] sm:$0xff] }
  0x38   : > { %v618_v10 = vld [vmem:[#allocation2 + $0x52] sm:$0xff]  ;;  %v451_v12 = vld [vmem:[#allocation2 + $0x180] sm:$0xff]  ;;  %v452_v16 = vld [vmem:[#allocation2 + $0x188] sm:$0xff]  ;;  %v262_v23 = vpack.c.bf16 %v233_v8, %v232_v6 }
  0x39   : > { %487 = vrot.lane.b32.xlu0 %v454_v44, %s5452_s15  ;;  %406 = vst.msk [vmem:[#allocation3 + $0x30] sm:$0xff] %vm33_vm0, %v5711_v2  ;;  %v5721_v13 = vpack.c.bf16 %v618_v10, %v617_v9  ;;  %v113_v14 = vld [vmem:[%s5635_s14 + $0x70] sm:$0xff]  ;;  %v114_v15 = vld [vmem:[%s5635_s14 + $0x78] sm:$0xff]  ;;  %407 = vst.msk [vmem:[#allocation3 + $0x58] sm:$0xff] %vm33_vm0, %v5713_v7  ;;  %v468_v29 = vpack.c.bf16 %v452_v16, %v451_v12 }
  0x3a   : > { %146 = vst.msk [vmem:[#allocation2 + $0xc1] sm:$0xff] %vm33_vm0, %v113_v14  ;;  %147 = vst.msk [vmem:[#allocation2 + $0xc9] sm:$0xff] %vm33_vm0, %v114_v15  ;;  %v620_v18 = vld [vmem:[#allocation2 + $0x6a] sm:$0xff]  ;;  %v115_v20 = vld [vmem:[%s5635_s14 + $0x80] sm:$0xff] }
  0x3b   : > { %318 = vrot.lane.b32.xlu1 %v5700_v59, %s5452_s15  ;;  %v5729_v19 = vpack.c.bf16 %v620_v18, %v619_v17  ;;  %v116_v21 = vld [vmem:[%s5635_s14 + $0x88] sm:$0xff]  ;;  %v621_v22 = vld [vmem:[#allocation2 + $0x7a] sm:$0xff]  ;;  %408 = vst.msk [vmem:[#allocation3 + $0x80] sm:$0xff] %vm33_vm0, %v5721_v13  ;;  %v259_v25 = vld [vmem:[#allocation2 + $0x171] sm:$0xff] }
  0x3c   : > { %v258_v24 = vld [vmem:[#allocation2 + $0x169] sm:$0xff]  ;;  %148 = vst.msk [vmem:[#allocation2 + $0xd9] sm:$0xff] %vm33_vm0, %v115_v20  ;;  %149 = vst.msk [vmem:[#allocation2 + $0xe1] sm:$0xff] %vm33_vm0, %v116_v21  ;;  %v118_v28 = vld [vmem:[%s5635_s14 + $0x98] sm:$0xff] }
  0x3d   : > { %294 = vrot.lane.b32.xlu0 %v261_v61, %s5452_s15  ;;  %v622_v26 = vld [vmem:[#allocation2 + $0x82] sm:$0xff]  ;;  %v117_v27 = vld [vmem:[%s5635_s14 + $0x90] sm:$0xff]  ;;  %151 = vst.msk [vmem:[#allocation2 + $0xf9] sm:$0xff] %vm33_vm0, %v118_v28  ;;  %v624_v32 = vld [vmem:[#allocation2 + $0x9a] sm:$0xff]  ;;  %v5767_v46 = vpack.c.bf16 %v259_v25, %v258_v24 }
  0x3e   : > { %v5742_v30 = vpack.c.bf16 %v622_v26, %v621_v22  ;;  %150 = vst.msk [vmem:[#allocation2 + $0xf1] sm:$0xff] %vm33_vm0, %v117_v27  ;;  %v623_v31 = vld [vmem:[#allocation2 + $0x92] sm:$0xff]  ;;  %v119_v33 = vld [vmem:[%s5635_s14 + $0xa0] sm:$0xff]  ;;  %409 = vst.msk [vmem:[#allocation3 + $0xa8] sm:$0xff] %vm33_vm0, %v5729_v19 }
  0x3f   : > { %513 = vrot.lane.b32.xlu1 %v467_v54, %s5452_s15  ;;  %v5749_v34 = vpack.c.bf16 %v624_v32, %v623_v31  ;;  %v120_v35 = vld [vmem:[%s5635_s14 + $0xa8] sm:$0xff]  ;;  %152 = vst.msk [vmem:[#allocation2 + $0x109] sm:$0xff] %vm33_vm0, %v119_v33  ;;  %v626_v37 = vld [vmem:[#allocation2 + $0xb2] sm:$0xff]  ;;  %v443_v39 = vld [vmem:[#allocation2 + $0x120] sm:$0xff] }
  0x40   : > { %v625_v36 = vld [vmem:[#allocation2 + $0xaa] sm:$0xff]  ;;  %153 = vst.msk [vmem:[#allocation2 + $0x111] sm:$0xff] %vm33_vm0, %v120_v35  ;;  %410 = vst.msk [vmem:[#allocation3 + $0xd0] sm:$0xff] %vm33_vm0, %v5742_v30  ;;  %v429_v51 = vld [vmem:[#allocation2 + $0x78] sm:$0xff] }
  0x41   : > { %489 = vrot.lane.b32.xlu0 %v455_v53, %s5452_s15  ;;  %v5754_v38 = vpack.c.bf16 %v626_v37, %v625_v36  ;;  %v444_v41 = vld [vmem:[#allocation2 + $0x128] sm:$0xff]  ;;  %411 = vst.msk [vmem:[#allocation3 + $0xf8] sm:$0xff] %vm33_vm0, %v5749_v34  ;;  %v235_v45 = vld [vmem:[#allocation2 + $0x51] sm:$0xff]  ;;  %v430_v52 = vld [vmem:[#allocation2 + $0x80] sm:$0xff] }
  0x42   : > { %v5759_v42 = vpack.c.bf16 %v444_v41, %v443_v39  ;;  %v5329_v43 = vld [vmem:[%s7779_s1 + $0x8] sm:$0xff]   ;;  %v5330_v55 = vld [vmem:[%s7779_s1 + $0x50] sm:$0xff]   ;;  %v457_v56 = vpack.c.bf16 %v430_v52, %v429_v51  ;;  %v5332_v62 = vld [vmem:[%s7779_s1 + $0x58] sm:$0xff]  }
  0x43   : > { %320 = vrot.lane.b32.xlu1 %v5719_v11, %s5452_s15  ;;  %v234_v44 = vld [vmem:[#allocation2 + $0x49] sm:$0xff]  ;;  %412 = vst.msk [vmem:[#allocation3 + $0x120] sm:$0xff] %vm33_vm0, %v5754_v38  ;;  %4698 = vmatpush3.bf16.msra.mxu0 %v5329_v43  ;;  %v236_v53 = vld [vmem:[#allocation2 + $0x61] sm:$0xff]  ;;  %v5333_v63 = vld [vmem:[%s7779_s1 + $0x18] sm:$0xff]  }
  0x44   : > { %v627_v47 = vld [vmem:[#allocation2 + $0xc2] sm:$0xff]  ;;  %v628_v48 = vld [vmem:[#allocation2 + $0xca] sm:$0xff]  ;;  %5272 = vmatpush3.bf16.msra.mxu1 %v5329_v43  ;;  %224 = vst.msk [vmem:[#allocation3 + $0x1e0] sm:$0xff] %vm33_vm0, %v5759_v42  ;;  %v263_v50 = vpack.c.bf16 %v235_v45, %v234_v44  ;;  %v629_v58 = vld [vmem:[#allocation2 + $0xda] sm:$0xff]  ;;  %4699 = vmatprep.subr.bf16.mxu0 %v5330_v55 }
  0x45   : > { %296 = vrot.lane.b32.xlu0 %v262_v23, %s5452_s15  ;;  %v5773_v49 = vpack.c.bf16 %v628_v48, %v627_v47  ;;  %v237_v54 = vld [vmem:[#allocation2 + $0x69] sm:$0xff]  ;;  %5265 = vmatprep.subr.bf16.mxu1 %v5330_v55  ;;  %v5334_v3 = vld [vmem:[%s7779_s1 + $0x60] sm:$0xff]   ;;  %v432_v5 = vld [vmem:[#allocation2 + $0x98] sm:$0xff] }
  0x46   : > { %v5331_v57 = vld [vmem:[%s7779_s1 + $0x10] sm:$0xff]   ;;  %v264_v4 = vpack.c.bf16 %v237_v54, %v236_v53  ;;  %v632_v8 = vld [vmem:[#allocation2 + $0xfa] sm:$0xff]  ;;  %v5336_v15 = vld [vmem:[%s7779_s1 + $0x68] sm:$0xff]  }
  0x47   : > { %515 = vrot.lane.b32.xlu1 %v468_v29, %s5452_s15  ;;  %413 = vst.msk [vmem:[#allocation3 + $0x148] sm:$0xff] %vm33_vm0, %v5773_v49  ;;  %4700 = vmatpush3.bf16.msra.mxu0 %v5331_v57  ;;  %v431_v0 = vld [vmem:[#allocation2 + $0x90] sm:$0xff]  ;;  %v5335_v9 = vld [vmem:[%s7779_s1 + $0x20] sm:$0xff]   ;;  %v165_v20 = vld [vmem:[#allocation2 + $0x8] sm:$0xff] }
  0x48   : > { %5273 = vmatpush3.bf16.msra.mxu1 %v5331_v57  ;;  %4701 = vmatprep.subr.bf16.mxu0 %v5332_v62  ;;  %v631_v6 = vld [vmem:[#allocation2 + $0xf2] sm:$0xff]  ;;  %v239_v14 = vld [vmem:[#allocation2 + $0x81] sm:$0xff]  ;;  %v358_v17 = vld [vmem:[#allocation2 + $0xa] sm:$0xff] }
  0x49   : > { %491 = vrot.lane.b32.xlu0 %v5702_v60, %s5452_s15  ;;  %v630_v60 = vld [vmem:[#allocation2 + $0xe2] sm:$0xff]  ;;  %5266 = vmatprep.subr.bf16.mxu1 %v5332_v62  ;;  %v5808_v10 = vpack.c.bf16 %v632_v8, %v631_v6  ;;  %v238_v12 = vld [vmem:[#allocation2 + $0x79] sm:$0xff]  ;;  %v5338_v24 = vld [vmem:[%s7779_s1 + $0x70] sm:$0xff]  }
  0x4a   : > { %v5789_v61 = vpack.c.bf16 %v630_v60, %v629_v58  ;;  %v357_v16 = vld [vmem:[#allocation2 + $0x2] sm:$0xff]  ;;  %v633_v26 = vld [vmem:[#allocation2 + $0x10a] sm:$0xff]  ;;  %v634_v27 = vld [vmem:[#allocation2 + $0x112] sm:$0xff]  ;;  %v265_v29 = vpack.c.bf16 %v239_v14, %v238_v12 }
  0x4b   : > { %322 = vrot.lane.b32.xlu1 %v5767_v46, %s5452_s15  ;;  %4702 = vmatpush3.bf16.msra.mxu0 %v5333_v63  ;;  %v164_v18 = vld [vmem:[#allocation2] sm:$0xff]  ;;  %415 = vst.msk [vmem:[#allocation3 + $0x198] sm:$0xff] %vm33_vm0, %v5808_v10  ;;  %v5337_v21 = vld [vmem:[%s7779_s1 + $0x28] sm:$0xff]   ;;  %v389_v22 = vpack.c.bf16 %v358_v17, %v357_v16  ;;  %v5826_v31 = vpack.c.bf16 %v634_v27, %v633_v26  ;;  %v434_v33 = vld [vmem:[#allocation2 + $0xb0] sm:$0xff] }
  0x4c   : > { %414 = vst.msk [vmem:[#allocation3 + $0x170] sm:$0xff] %vm33_vm0, %v5789_v61  ;;  %5274 = vmatpush3.bf16.msra.mxu1 %v5333_v63  ;;  %4703 = vmatprep.subr.bf16.mxu0 %v5334_v3  ;;  %v433_v25 = vld [vmem:[#allocation2 + $0xa8] sm:$0xff]  ;;  %v5339_v36 = vld [vmem:[%s7779_s1 + $0x30] sm:$0xff]   ;;  %v383_v37 = vld [vmem:[#allocation2 + $0x13a] sm:$0xff] }
  0x4d   : > { %298 = vrot.lane.b32.xlu0 %v263_v50, %s5452_s15  ;;  %5267 = vmatprep.subr.bf16.mxu1 %v5334_v3  ;;  %405 = vst.msk [vmem:[#allocation3 + $0x8] sm:$0xff] %vm33_vm0, %v389_v22  ;;  %v381_v28 = vld [vmem:[#allocation2 + $0x122] sm:$0xff]  ;;  %v382_v32 = vld [vmem:[#allocation2 + $0x12a] sm:$0xff]  ;;  %416 = vst.msk [vmem:[#allocation3 + $0x1c0] sm:$0xff] %vm33_vm0, %v5826_v31  ;;  %v459_v44 = vpack.c.bf16 %v434_v33, %v433_v25 }
  0x4e   : > { %v5830_v35 = vpack.c.bf16 %v382_v32, %v381_v28  ;;  %v384_v39 = vld [vmem:[#allocation2 + $0x142] sm:$0xff]  ;;  %v240_v41 = vld [vmem:[#allocation2 + $0x91] sm:$0xff]  ;;  %v241_v45 = vld [vmem:[#allocation2 + $0x99] sm:$0xff] }
  0x4f   : > { %870 = vrot.lane.b32.xlu1 %v262_v23, %s5452_s15  ;;  %v196_v23 = vpack.c.bf16 %v165_v20, %v164_v18  ;;  %4704 = vmatpush3.bf16.msra.mxu0 %v5335_v9  ;;  %v5842_v43 = vpack.c.bf16 %v384_v39, %v383_v37  ;;  %v5341_v47 = vld [vmem:[%s7779_s1 + $0x38] sm:$0xff]   ;;  %v435_v51 = vld [vmem:[#allocation2 + $0xc0] sm:$0xff]  ;;  %v266_v54 = vpack.c.bf16 %v241_v45, %v240_v41  ;;  %v387_v57 = vld [vmem:[#allocation2 + $0x16a] sm:$0xff] }
  0x50   : > { %5275 = vmatpush3.bf16.msra.mxu1 %v5335_v9  ;;  %4705 = vmatprep.subr.bf16.mxu0 %v5336_v15  ;;  %417 = vst.msk [vmem:[#allocation3 + $0x1e8] sm:$0xff] %vm33_vm0, %v5830_v35  ;;  %v385_v48 = vld [vmem:[#allocation2 + $0x152] sm:$0xff]  ;;  %v5854_v52 = vld [vmem:[%s7779_s1 + $0x100] sm:$0xff]   ;;  %v242_v62 = vld [vmem:[#allocation2 + $0xa9] sm:$0xff] }
  0x51   : > { %493 = vrot.lane.b32.xlu0 %v457_v56, %s5452_s15  ;;  %212 = vst.msk [vmem:[#allocation3] sm:$0xff] %vm33_vm0, %v196_v23  ;;  %5268 = vmatprep.subr.bf16.mxu1 %v5336_v15  ;;  %418 = vst.msk [vmem:[#allocation3 + $0x210] sm:$0xff] %vm33_vm0, %v5842_v43  ;;  %v5342_v55 = vld [vmem:[%s7779_s1 + $0xc0] sm:$0xff]   ;;  %v436_v56 = vld [vmem:[#allocation2 + $0xc8] sm:$0xff] }
  0x52   : > { %v388_v58 = vld [vmem:[#allocation2 + $0x172] sm:$0xff]  ;;  %v460_v60 = vpack.c.bf16 %v436_v56, %v435_v51  ;;  %v438_v8 = vld [vmem:[#allocation2 + $0xe0] sm:$0xff]  ;;  %v835_v12 = vld [vmem:[#allocation2 + $0x189] sm:$0xff] }
  0x53   : > { %677 = vrot.lane.b32.xlu1 %v5711_v2, %s5452_s15  ;;  %v458_v2 = vpack.c.bf16 %v432_v5, %v431_v0  ;;  %4706 = vmatpush3.bf16.msra.mxu0 %v5337_v21  ;;  %v5868_v63 = vpack.c.bf16 %v388_v58, %v387_v57  ;;  %v742_v0 = vld [vmem:[#allocation2 + $0x30] sm:$0xff]  ;;  %v743_v3 = vld [vmem:[#allocation2 + $0x38] sm:$0xff]  ;;  %v834_v9 = vld [vmem:[#allocation2 + $0x181] sm:$0xff] }
  0x54   : > { %5276 = vmatpush3.bf16.msra.mxu1 %v5337_v21  ;;  %4707 = vmatprep.subr.bf16.mxu0 %v5338_v24  ;;  %v437_v5 = vld [vmem:[#allocation2 + $0xd8] sm:$0xff]  ;;  %v774_v6 = vpack.c.bf16 %v743_v3, %v742_v0  ;;  %v550_v14 = vld [vmem:[#allocation2 + $0x21] sm:$0xff]  ;;  %v5877_v15 = vpack.c.bf16 %v835_v12, %v834_v9  ;;  %v245_v20 = vld [vmem:[#allocation2 + $0xc9] sm:$0xff] }
  0x55   : > { %300 = vrot.lane.b32.xlu0 %v264_v4, %s5452_s15  ;;  %5269 = vmatprep.subr.bf16.mxu1 %v5338_v24  ;;  %420 = vst.msk [vmem:[#allocation3 + $0x260] sm:$0xff] %vm33_vm0, %v5868_v63  ;;  %v549_v16 = vld [vmem:[#allocation2 + $0x19] sm:$0xff]  ;;  %v244_v17 = vld [vmem:[#allocation2 + $0xc1] sm:$0xff]  ;;  %v745_v21 = vld [vmem:[#allocation2 + $0x50] sm:$0xff] }
  0x56   : > { %790 = vst.msk [vmem:[#allocation3 + $0x18] sm:$0xff] %vm33_vm0, %v774_v6  ;;  %v581_v18 = vpack.c.bf16 %v550_v14, %v549_v16  ;;  %612 = vst.msk [vmem:[#allocation3 + $0x268] sm:$0xff] %vm33_vm0, %v5877_v15  ;;  %v5885_v23 = vpack.c.bf16 %v245_v20, %v244_v17  ;;  %v439_v24 = vld [vmem:[#allocation2 + $0xf0] sm:$0xff]  ;;  %v440_v25 = vld [vmem:[#allocation2 + $0xf8] sm:$0xff] }
  0x57   : > { %872 = vrot.lane.b32.xlu1 %v263_v50, %s5452_s15  ;;  %4708 = vmatpush3.bf16.msra.mxu0 %v5339_v36  ;;  %v386_v50 = vld [vmem:[#allocation2 + $0x15a] sm:$0xff]  ;;  %v643_v26 = vld [vmem:[#allocation2 + $0x182] sm:$0xff]  ;;  %v644_v27 = vld [vmem:[#allocation2 + $0x18a] sm:$0xff] }
  0x58   : > { %5277 = vmatpush3.bf16.msra.mxu1 %v5339_v36  ;;  %v5856_v53 = vpack.c.bf16 %v386_v50, %v385_v48  ;;  %597 = vst.msk [vmem:[#allocation3 + $0x10] sm:$0xff] %vm33_vm0, %v581_v18  ;;  %v174_v28 = vld [vmem:[#allocation2 + $0x78] sm:$0xff]  ;;  %v247_v33 = vld [vmem:[#allocation2 + $0xe1] sm:$0xff]  ;;  %v5890_v36 = vpack.c.bf16 %v644_v27, %v643_v26  ;;  %v179_v58 = vld [vmem:[#allocation2 + $0xb0] sm:$0xff] }
  0x59   : > { %495 = vrot.lane.b32.xlu0 %v458_v2, %s5452_s15  ;;  %v461_v2 = vpack.c.bf16 %v438_v8, %v437_v5  ;;  %v246_v32 = vld [vmem:[#allocation2 + $0xd9] sm:$0xff]  ;;  %v551_v39 = vld [vmem:[#allocation2 + $0x31] sm:$0xff]  ;;  %v747_v45 = vld [vmem:[#allocation2 + $0x68] sm:$0xff] }
  0x5a   : > { %419 = vst.msk [vmem:[#allocation3 + $0x238] sm:$0xff] %vm33_vm0, %v5856_v53  ;;  %v552_v41 = vld [vmem:[#allocation2 + $0x39] sm:$0xff]  ;;  %v178_v56 = vld [vmem:[#allocation2 + $0xa8] sm:$0xff]  ;;  %996 = vst.msk [vmem:[#allocation3 + $0x250] sm:$0xff] %vm33_vm0, %v5890_v36  ;;  %v269_v5 = vpack.c.bf16 %v247_v33, %v246_v32 }
  0x5b   : > { %679 = vrot.lane.b32.xlu1 %v5713_v7, %s5452_s15  ;;  %v5340_v7 = vld [vmem:[%s7779_s1 + $0x78] sm:$0xff]   ;;  %v442_v0 = vld [vmem:[#allocation2 + $0x110] sm:$0xff]  ;;  %v203_v3 = vpack.c.bf16 %v179_v58, %v178_v56  ;;  %v180_v6 = vld [vmem:[#allocation2 + $0xc0] sm:$0xff] }
  0x5c   : > { %4709 = vmatprep.subr.bf16.mxu0 %v5340_v7  ;;  %5270 = vmatprep.subr.bf16.mxu1 %v5340_v7  ;;  %v746_v7 = vld [vmem:[#allocation2 + $0x60] sm:$0xff]  ;;  %v177_v48 = vld [vmem:[#allocation2 + $0x98] sm:$0xff]  ;;  %v181_v8 = vld [vmem:[#allocation2 + $0xc8] sm:$0xff] }
  0x5d   : > { %302 = vrot.lane.b32.xlu0 %v265_v29, %s5452_s15  ;;  %4710 = vmatpush3.bf16.msra.mxu0 %v5341_v47  ;;  %v776_v50 = vpack.c.bf16 %v747_v45, %v746_v7  ;;  %v557_v9 = vld [vmem:[#allocation2 + $0x79] sm:$0xff]  ;;  %219 = vst.msk [vmem:[#allocation3 + $0x118] sm:$0xff] %vm33_vm0, %v203_v3  ;;  %v204_v12 = vpack.c.bf16 %v181_v8, %v180_v6  ;;  %v558_v14 = vld [vmem:[#allocation2 + $0x81] sm:$0xff]  ;;  %795 = vst.msk [vmem:[#allocation3 + $0xe0] sm:$0xff] %vm33_vm0, %v203_v3 }
  0x5e   : > { %5278 = vmatpush3.bf16.msra.mxu1 %v5341_v47  ;;  %5183 = vmatprep.subr.bf16.mxu0 %v5854_v52  ;;  %v176_v47 = vld [vmem:[#allocation2 + $0x90] sm:$0xff]  ;;  %v182_v16 = vld [vmem:[#allocation2 + $0xd8] sm:$0xff]  ;;  %v585_v17 = vpack.c.bf16 %v558_v14, %v557_v9  ;;  %v186_v33 = vld [vmem:[#allocation2 + $0x108] sm:$0xff] }
  0x5f   : > { %874 = vrot.lane.b32.xlu1 %v264_v4, %s5452_s15  ;;  %4807 = vmatprep.subr.bf16.mxu1 %v5342_v55  ;;  %v202_v51 = vpack.c.bf16 %v177_v48, %v176_v47  ;;  %v554_v55 = vld [vmem:[#allocation2 + $0x51] sm:$0xff]  ;;  %792 = vst.msk [vmem:[#allocation3 + $0x68] sm:$0xff] %vm33_vm0, %v776_v50  ;;  %220 = vst.msk [vmem:[#allocation3 + $0x140] sm:$0xff] %vm33_vm0, %v204_v12  ;;  %v564_v7 = vld [vmem:[#allocation2 + $0xc9] sm:$0xff] }
  0x60   : > { %v559_v20 = vld [vmem:[#allocation2 + $0x91] sm:$0xff]  ;;  %796 = vst.msk [vmem:[#allocation3 + $0x108] sm:$0xff] %vm33_vm0, %v204_v12  ;;  %601 = vst.msk [vmem:[#allocation3 + $0xb0] sm:$0xff] %vm33_vm0, %v585_v17  ;;  %v566_v45 = vld [vmem:[#allocation2 + $0xe1] sm:$0xff] }
  0x61   : > { %497 = vrot.lane.b32.xlu0 %v459_v44, %s5452_s15  ;;  %v582_v44 = vpack.c.bf16 %v552_v41, %v551_v39  ;;  %218 = vst.msk [vmem:[#allocation3 + $0xf0] sm:$0xff] %vm33_vm0, %v202_v51  ;;  %794 = vst.msk [vmem:[#allocation3 + $0xb8] sm:$0xff] %vm33_vm0, %v202_v51  ;;  %v562_v26 = vld [vmem:[#allocation2 + $0xb1] sm:$0xff]  ;;  %v563_v39 = vld [vmem:[#allocation2 + $0xc1] sm:$0xff] }
  0x62   : > { %v934_v47 = vld [vmem:[#allocation2 + $0x32] sm:$0xff]  ;;  %v935_v50 = vld [vmem:[#allocation2 + $0x3a] sm:$0xff]  ;;  %v936_v51 = vld [vmem:[#allocation2 + $0x4a] sm:$0xff] }
  0x63   : > { %681 = vrot.lane.b32.xlu1 %v5721_v13, %s5452_s15  ;;  %v243_v13 = vld [vmem:[#allocation2 + $0xb1] sm:$0xff]  ;;  %598 = vst.msk [vmem:[#allocation3 + $0x38] sm:$0xff] %vm33_vm0, %v582_v44  ;;  %v941_v6 = vld [vmem:[#allocation2 + $0x82] sm:$0xff] }
  0x64   : > { %v267_v4 = vpack.c.bf16 %v243_v13, %v242_v62  ;;  %v556_v62 = vld [vmem:[#allocation2 + $0x69] sm:$0xff]  ;;  %v251_v56 = vld [vmem:[#allocation2 + $0x111] sm:$0xff] }
  0x65   : > { %304 = vrot.lane.b32.xlu0 %v266_v54, %s5452_s15  ;;  %v441_v13 = vld [vmem:[#allocation2 + $0x108] sm:$0xff]  ;;  %v570_v14 = vld [vmem:[#allocation2 + $0x111] sm:$0xff] }
  0x66   : > { %v463_v27 = vpack.c.bf16 %v442_v0, %v441_v13  ;;  %v938_v0 = vld [vmem:[#allocation2 + $0x62] sm:$0xff]  ;;  %v939_v3 = vld [vmem:[#allocation2 + $0x6a] sm:$0xff] }
  0x67   : > { %876 = vrot.lane.b32.xlu1 %v265_v29, %s5452_s15  ;;  %v175_v29 = vld [vmem:[#allocation2 + $0x80] sm:$0xff]  ;;  %v763_v8 = vld [vmem:[#allocation2 + $0x128] sm:$0xff] }
  0x68   : > { %v201_v37 = vpack.c.bf16 %v175_v29, %v174_v28  ;;  %v249_v28 = vld [vmem:[#allocation2 + $0xf9] sm:$0xff]  ;;  %v569_v9 = vld [vmem:[#allocation2 + $0x109] sm:$0xff] }
  0x69   : > { %499 = vrot.lane.b32.xlu0 %v460_v60, %s5452_s15  ;;  %v555_v60 = vld [vmem:[#allocation2 + $0x61] sm:$0xff] }
  0x6a   : > { %217 = vst.msk [vmem:[#allocation3 + $0xc8] sm:$0xff] %vm33_vm0, %v201_v37  ;;  %793 = vst.msk [vmem:[#allocation3 + $0x90] sm:$0xff] %vm33_vm0, %v201_v37  ;;  %v187_v37 = vld [vmem:[#allocation2 + $0x110] sm:$0xff] }
  0x6b   : > { %683 = vrot.lane.b32.xlu1 %v5729_v19, %s5452_s15  ;;  %v744_v19 = vld [vmem:[#allocation2 + $0x48] sm:$0xff]  ;;  %v207_v41 = vpack.c.bf16 %v187_v37, %v186_v33  ;;  %v767_v33 = vld [vmem:[#allocation2 + $0x158] sm:$0xff] }
  0x6c   : > { %v775_v22 = vpack.c.bf16 %v745_v21, %v744_v19  ;;  %v560_v19 = vld [vmem:[#allocation2 + $0x99] sm:$0xff]  ;;  %v184_v21 = vld [vmem:[#allocation2 + $0xf0] sm:$0xff] }
  0x6d   : > { %306 = vrot.lane.b32.xlu0 %v267_v4, %s5452_s15  ;;  %223 = vst.msk [vmem:[#allocation3 + $0x1b8] sm:$0xff] %vm33_vm0, %v207_v41  ;;  %799 = vst.msk [vmem:[#allocation3 + $0x180] sm:$0xff] %vm33_vm0, %v207_v41  ;;  %v573_v37 = vld [vmem:[#allocation2 + $0x139] sm:$0xff] }
  0x6e   : > { %791 = vst.msk [vmem:[#allocation3 + $0x40] sm:$0xff] %vm33_vm0, %v775_v22  ;;  %v248_v22 = vld [vmem:[#allocation2 + $0xf1] sm:$0xff] }
  0x6f   : > { %878 = vrot.lane.b32.xlu1 %v266_v54, %s5452_s15  ;;  %v553_v54 = vld [vmem:[#allocation2 + $0x49] sm:$0xff]  ;;  %v270_v44 = vpack.c.bf16 %v249_v28, %v248_v22  ;;  %v765_v22 = vld [vmem:[#allocation2 + $0x140] sm:$0xff] }
  0x70   : > { %v583_v57 = vpack.c.bf16 %v554_v55, %v553_v54  ;;  %v937_v54 = vld [vmem:[#allocation2 + $0x52] sm:$0xff]  ;;  %v250_v55 = vld [vmem:[#allocation2 + $0x109] sm:$0xff] }
  0x71   : > { %501 = vrot.lane.b32.xlu0 %v461_v2, %s5452_s15  ;;  %v183_v2 = vld [vmem:[#allocation2 + $0xe0] sm:$0xff]  ;;  %v967_v58 = vpack.c.bf16 %v937_v54, %v936_v51  ;;  %v768_v54 = vld [vmem:[#allocation2 + $0x168] sm:$0xff] }
  0x72   : > { %599 = vst.msk [vmem:[#allocation3 + $0x60] sm:$0xff] %vm33_vm0, %v583_v57  ;;  %v205_v18 = vpack.c.bf16 %v183_v2, %v182_v16  ;;  %v966_v57 = vpack.c.bf16 %v935_v50, %v934_v47  ;;  %v591_v16 = vpack.c.bf16 %v570_v14, %v569_v9  ;;  %v942_v2 = vld [vmem:[#allocation2 + $0x92] sm:$0xff]  ;;  %v837_v47 = vld [vmem:[#allocation2 + $0x1a1] sm:$0xff] }
  0x73   : > { %685 = vrot.lane.b32.xlu1 %v5742_v30, %s5452_s15  ;;  %v462_v30 = vpack.c.bf16 %v440_v25, %v439_v24  ;;  %v586_v24 = vpack.c.bf16 %v560_v19, %v559_v20  ;;  %v561_v25 = vld [vmem:[#allocation2 + $0xa9] sm:$0xff]  ;;  %983 = vst.msk [vmem:[#allocation3 + $0x48] sm:$0xff] %vm33_vm0, %v967_v58  ;;  %v945_v20 = vld [vmem:[#allocation2 + $0xb2] sm:$0xff] }
  0x74   : > { %221 = vst.msk [vmem:[#allocation3 + $0x168] sm:$0xff] %vm33_vm0, %v205_v18  ;;  %v587_v32 = vpack.c.bf16 %v562_v26, %v561_v25  ;;  %797 = vst.msk [vmem:[#allocation3 + $0x130] sm:$0xff] %vm33_vm0, %v205_v18  ;;  %v944_v18 = vld [vmem:[#allocation2 + $0xaa] sm:$0xff]  ;;  %v946_v26 = vld [vmem:[#allocation2 + $0xc2] sm:$0xff] }
  0x75   : > { %308 = vrot.lane.b32.xlu0 %v5885_v23, %s5452_s15  ;;  %602 = vst.msk [vmem:[#allocation3 + $0xd8] sm:$0xff] %vm33_vm0, %v586_v24  ;;  %982 = vst.msk [vmem:[#allocation3 + $0x20] sm:$0xff] %vm33_vm0, %v966_v57  ;;  %v971_v19 = vpack.c.bf16 %v945_v20, %v944_v18  ;;  %v571_v24 = vld [vmem:[#allocation2 + $0x121] sm:$0xff]  ;;  %v572_v25 = vld [vmem:[#allocation2 + $0x129] sm:$0xff] }
  0x76   : > { %603 = vst.msk [vmem:[#allocation3 + $0x100] sm:$0xff] %vm33_vm0, %v587_v32  ;;  %607 = vst.msk [vmem:[#allocation3 + $0x1a0] sm:$0xff] %vm33_vm0, %v591_v16  ;;  %v576_v58 = vld [vmem:[#allocation2 + $0x159] sm:$0xff]  ;;  %v5346_v18 = vld [vmem:[%s7779_s1 + $0x88] sm:$0xff]  }
  0x77   : > { %880 = vrot.lane.b32.xlu1 %v267_v4, %s5452_s15  ;;  %v584_v4 = vpack.c.bf16 %v556_v62, %v555_v60  ;;  %v567_v60 = vld [vmem:[#allocation2 + $0xf1] sm:$0xff]  ;;  %v568_v62 = vld [vmem:[#allocation2 + $0xf9] sm:$0xff]  ;;  %987 = vst.msk [vmem:[#allocation3 + $0xe8] sm:$0xff] %vm33_vm0, %v971_v19 }
  0x78   : > { %v590_v13 = vpack.c.bf16 %v568_v62, %v567_v60  ;;  %v5356_v62 = vld [vmem:[%s7779_s1 + $0x108] sm:$0xff]   ;;  %v578_v19 = vld [vmem:[#allocation2 + $0x171] sm:$0xff] }
  0x79   : > { %503 = vrot.lane.b32.xlu0 %v462_v30, %s5452_s15  ;;  %600 = vst.msk [vmem:[#allocation3 + $0x88] sm:$0xff] %vm33_vm0, %v584_v4  ;;  %v588_v30 = vpack.c.bf16 %v564_v7, %v563_v39  ;;  %v968_v4 = vpack.c.bf16 %v939_v3, %v938_v0  ;;  %v574_v39 = vld [vmem:[#allocation2 + $0x141] sm:$0xff]  ;;  %v955_v3 = vld [vmem:[#allocation2 + $0x12a] sm:$0xff] }
  0x7a   : > { %606 = vst.msk [vmem:[#allocation3 + $0x178] sm:$0xff] %vm33_vm0, %v590_v13  ;;  %v593_v7 = vpack.c.bf16 %v574_v39, %v573_v37  ;;  %v954_v0 = vld [vmem:[#allocation2 + $0x122] sm:$0xff] }
  0x7b   : > { %687 = vrot.lane.b32.xlu1 %v5749_v34, %s5452_s15  ;;  %v185_v34 = vld [vmem:[#allocation2 + $0xf8] sm:$0xff]  ;;  %604 = vst.msk [vmem:[#allocation3 + $0x128] sm:$0xff] %vm33_vm0, %v588_v30  ;;  %984 = vst.msk [vmem:[#allocation3 + $0x70] sm:$0xff] %vm33_vm0, %v968_v4 }
  0x7c   : > { %v206_v29 = vpack.c.bf16 %v185_v34, %v184_v21  ;;  %v764_v21 = vld [vmem:[#allocation2 + $0x138] sm:$0xff]  ;;  %609 = vst.msk [vmem:[#allocation3 + $0x1f0] sm:$0xff] %vm33_vm0, %v593_v7 }
  0x7d   : > { %310 = vrot.lane.b32.xlu0 %v269_v5, %s5452_s15  ;;  %v785_v34 = vpack.c.bf16 %v765_v22, %v764_v21  ;;  %v950_v30 = vld [vmem:[#allocation2 + $0xf2] sm:$0xff]  ;;  %v956_v4 = vld [vmem:[#allocation2 + $0x13a] sm:$0xff] }
  0x7e   : > { %222 = vst.msk [vmem:[#allocation3 + $0x190] sm:$0xff] %vm33_vm0, %v206_v29  ;;  %798 = vst.msk [vmem:[#allocation3 + $0x158] sm:$0xff] %vm33_vm0, %v206_v29  ;;  %v949_v29 = vld [vmem:[#allocation2 + $0xe2] sm:$0xff]  ;;  %v5347_v22 = vld [vmem:[%s7779_s1 + $0xd0] sm:$0xff]  }
  0x7f   : > { %882 = vrot.lane.b32.xlu1 %v5885_v23, %s5452_s15  ;;  %v565_v23 = vld [vmem:[#allocation2 + $0xd9] sm:$0xff]  ;;  %801 = vst.msk [vmem:[#allocation3 + $0x1d0] sm:$0xff] %vm33_vm0, %v785_v34 }
  0x80   : > { %v589_v48 = vpack.c.bf16 %v566_v45, %v565_v23  ;;  %v953_v23 = vld [vmem:[#allocation2 + $0x112] sm:$0xff] }
  0x81   : > { %505 = vrot.lane.b32.xlu0 %v463_v27, %s5452_s15  ;;  %v947_v27 = vld [vmem:[#allocation2 + $0xca] sm:$0xff]  ;;  %v836_v45 = vld [vmem:[#allocation2 + $0x199] sm:$0xff] }
  0x82   : > { %605 = vst.msk [vmem:[#allocation3 + $0x150] sm:$0xff] %vm33_vm0, %v589_v48  ;;  %v972_v28 = vpack.c.bf16 %v947_v27, %v946_v26  ;;  %v959_v26 = vld [vmem:[#allocation2 + $0x15a] sm:$0xff] }
  0x83   : > { %689 = vrot.lane.b32.xlu1 %v5754_v38, %s5452_s15  ;;  %v271_v38 = vpack.c.bf16 %v251_v56, %v250_v55  ;;  %v769_v55 = vld [vmem:[#allocation2 + $0x170] sm:$0xff]  ;;  %v772_v7 = vld [vmem:[#allocation2 + $0x198] sm:$0xff] }
  0x84   : > { %988 = vst.msk [vmem:[#allocation3 + $0x110] sm:$0xff] %vm33_vm0, %v972_v28  ;;  %v787_v57 = vpack.c.bf16 %v769_v55, %v768_v54  ;;  %v960_v28 = vld [vmem:[#allocation2 + $0x16a] sm:$0xff] }
  0x85   : > { %312 = vrot.lane.b32.xlu0 %v270_v44, %s5452_s15 }
  0x86   : > { %803 = vst.msk [vmem:[#allocation3 + $0x220] sm:$0xff] %vm33_vm0, %v787_v57 }
  0x87   : > { %884 = vrot.lane.b32.xlu1 %v269_v5, %s5452_s15  ;;  %v940_v5 = vld [vmem:[#allocation2 + $0x7a] sm:$0xff] }
  0x89   : > { %507 = vrot.lane.b32.xlu0 %v5759_v42, %s5452_s15  ;;  %v969_v42 = vpack.c.bf16 %v941_v6, %v940_v5  ;;  %v957_v5 = vld [vmem:[#allocation2 + $0x142] sm:$0xff] }
  0x8b   : > { %691 = vrot.lane.b32.xlu1 %v5773_v49, %s5452_s15  ;;  %985 = vst.msk [vmem:[#allocation3 + $0x98] sm:$0xff] %vm33_vm0, %v969_v42  ;;  %v762_v49 = vld [vmem:[#allocation2 + $0x120] sm:$0xff] }
  0x8c   : > { %v784_v12 = vpack.c.bf16 %v763_v8, %v762_v49  ;;  %v5344_v42 = vld [vmem:[%s7779_s1 + $0x80] sm:$0xff]   ;;  %v977_v49 = vpack.c.bf16 %v957_v5, %v956_v4  ;;  %v5358_v4 = vld [vmem:[%s7779_s1 + $0xf8] sm:$0xff]  }
  0x8d   : > { %314 = vrot.lane.b32.xlu0 %v271_v38, %s5452_s15 }
  0x8e   : > { %800 = vst.msk [vmem:[#allocation3 + $0x1a8] sm:$0xff] %vm33_vm0, %v784_v12  ;;  %v5345_v12 = vld [vmem:[%s7779_s1 + $0xc8] sm:$0xff]   ;;  %993 = vst.msk [vmem:[#allocation3 + $0x1d8] sm:$0xff] %vm33_vm0, %v977_v49 }
  0x8f   : > { %693 = vrot.lane.b32.xlu1 %v5789_v61, %s5452_s15  ;;  %v943_v61 = vld [vmem:[#allocation2 + $0x9a] sm:$0xff] }
  0x90   : > { %v970_v17 = vpack.c.bf16 %v943_v61, %v942_v2  ;;  %v5360_v2 = vld [vmem:[%s7779_s1 + $0x110] sm:$0xff]   ;;  %v771_v61 = vld [vmem:[#allocation2 + $0x188] sm:$0xff] }
  0x91   : > { %886 = vrot.lane.b32.xlu0 %v270_v44, %s5452_s15  ;;  %v951_v44 = vld [vmem:[#allocation2 + $0xfa] sm:$0xff] }
  0x92   : > { %986 = vst.msk [vmem:[#allocation3 + $0xc0] sm:$0xff] %vm33_vm0, %v970_v17  ;;  %v577_v17 = vld [vmem:[#allocation2 + $0x169] sm:$0xff] }
  0x93   : > { %695 = vrot.lane.b32.xlu1 %v5808_v10, %s5452_s15 }
  0x95   : > { %888 = vrot.lane.b32.xlu0 %v271_v38, %s5452_s15  ;;  %v293_v10 = vpop.permute.xlu1 %292 }
  0x96   : > { %341 = vst.msk [vmem:[#allocation3] sm:$0xff] %vm7788_vm2, %v293_v10 }
  0x97   : > { %697 = vrot.lane.b32.xlu1 %v5826_v31, %s5452_s15  ;;  %v592_v31 = vpack.c.bf16 %v572_v25, %v571_v24  ;;  %v595_v24 = vpack.c.bf16 %v578_v19, %v577_v17  ;;  %v5361_v25 = vld [vmem:[%s7779_s1 + $0x118] sm:$0xff]  }
  0x99   : > { %890 = vrot.lane.b32.xlu0 %v5689_v40, %s5452_s15  ;;  %608 = vst.msk [vmem:[#allocation3 + $0x1c8] sm:$0xff] %vm33_vm0, %v592_v31  ;;  %v948_v40 = vld [vmem:[#allocation2 + $0xda] sm:$0xff]  ;;  %v958_v31 = vld [vmem:[#allocation2 + $0x152] sm:$0xff]  ;;  %611 = vst.msk [vmem:[#allocation3 + $0x240] sm:$0xff] %vm33_vm0, %v595_v24 }
  0x9a   : > { %v973_v32 = vpack.c.bf16 %v949_v29, %v948_v40  ;;  %v978_v27 = vpack.c.bf16 %v959_v26, %v958_v31  ;;  %v961_v40 = vld [vmem:[#allocation2 + $0x172] sm:$0xff] }
  0x9b   : > { %699 = vrot.lane.b32.xlu1 %v5830_v35, %s5452_s15  ;;  %v766_v35 = vld [vmem:[#allocation2 + $0x150] sm:$0xff] }
  0x9c   : > { %989 = vst.msk [vmem:[#allocation3 + $0x138] sm:$0xff] %vm33_vm0, %v973_v32  ;;  %v5348_v32 = vld [vmem:[%s7779_s1 + $0x90] sm:$0xff]   ;;  %994 = vst.msk [vmem:[#allocation3 + $0x200] sm:$0xff] %vm33_vm0, %v978_v27 }
  0x9d   : > { %892 = vrot.lane.b32.xlu0 %v5700_v59, %s5452_s15  ;;  %v786_v59 = vpack.c.bf16 %v767_v33, %v766_v35  ;;  %v998_v56 = vld [vmem:[#allocation3] sm:$0xff]  ;;  %v979_v35 = vpack.c.bf16 %v961_v40, %v960_v28 }
  0x9f   : > { %701 = vrot.lane.b32.xlu1 %v5842_v43, %s5452_s15  ;;  %802 = vst.msk [vmem:[#allocation3 + $0x1f8] sm:$0xff] %vm33_vm0, %v786_v59  ;;  %v5349_v59 = vld [vmem:[%s7779_s1 + $0xd8] sm:$0xff]   ;;  %995 = vst.msk [vmem:[#allocation3 + $0x228] sm:$0xff] %vm33_vm0, %v979_v35 }
  0xa1   : > { %894 = vrot.lane.b32.xlu0 %v5719_v11, %s5452_s15  ;;  %v974_v11 = vpack.c.bf16 %v951_v44, %v950_v30  ;;  %v5350_v30 = vld [vmem:[%s7779_s1 + $0x98] sm:$0xff]  }
  0xa3   : > { %703 = vrot.lane.b32.xlu1 %v5856_v53, %s5452_s15  ;;  %v486_v41 = vpop.permute.xlu0 %485  ;;  %v952_v53 = vld [vmem:[#allocation2 + $0x10a] sm:$0xff]  ;;  %990 = vst.msk [vmem:[#allocation3 + $0x160] sm:$0xff] %vm33_vm0, %v974_v11 }
  0xa4   : > { %533 = vst.msk [vmem:[#allocation3 + $0x8] sm:$0xff] %vm7788_vm2, %v486_v41  ;;  %v975_v48 = vpack.c.bf16 %v953_v23, %v952_v53  ;;  %v5351_v23 = vld [vmem:[%s7779_s1 + $0xe0] sm:$0xff]  }
  0xa5   : > { %v317_v43 = vpop.permute.xlu1 %316  ;;  %896 = vrot.lane.b32.xlu0 %v5767_v46, %s5452_s15  ;;  %v853_v46 = vpack.c.bf16 %v837_v47, %v836_v45  ;;  %v964_v47 = vld [vmem:[#allocation2 + $0x19a] sm:$0xff] }
  0xa6   : > { %353 = vst.msk [vmem:[#allocation3 + $0x1e0] sm:$0xff] %vm7788_vm2, %v317_v43  ;;  %v773_v43 = vld [vmem:[#allocation2 + $0x1a0] sm:$0xff] }
  0xa7   : > { %705 = vrot.lane.b32.xlu1 %v5868_v63, %s5452_s15  ;;  %v510_v50 = vpop.permute.xlu0 %509  ;;  %991 = vst.msk [vmem:[#allocation3 + $0x188] sm:$0xff] %vm33_vm0, %v975_v48  ;;  %v575_v63 = vld [vmem:[#allocation2 + $0x151] sm:$0xff]  ;;  %v789_v44 = vpack.c.bf16 %v773_v43, %v772_v7  ;;  %v965_v48 = vld [vmem:[#allocation2 + $0x1a2] sm:$0xff] }
  0xa8   : > { %545 = vst.msk [vmem:[#allocation3 + $0x1e8] sm:$0xff] %vm7788_vm2, %v510_v50  ;;  %v594_v13 = vpack.c.bf16 %v576_v58, %v575_v63  ;;  %v5353_v63 = vld [vmem:[%s7779_s1 + $0xe8] sm:$0xff]  }
  0xa9   : > { %v512_v51 = vpop.permute.xlu1 %511  ;;  %898 = vrot.lane.b32.xlu0 %v5877_v15, %s5452_s15  ;;  %805 = vst.msk [vmem:[#allocation3 + $0x270] sm:$0xff] %vm33_vm0, %v789_v44  ;;  %v5354_v58 = vld [vmem:[%s7779_s1 + $0xa8] sm:$0xff]  }
  0xaa   : > { %546 = vst.msk [vmem:[#allocation3 + $0x210] sm:$0xff] %vm7788_vm2, %v512_v51  ;;  %v5352_v51 = vld [vmem:[%s7779_s1 + $0xa0] sm:$0xff]  }
  0xab   : > { %707 = vrot.lane.b32.xlu1 %v5890_v36, %s5452_s15  ;;  %v488_v38 = vpop.permute.xlu0 %487  ;;  %v999_v60 = vld [vmem:[#allocation3 + $0x8] sm:$0xff]  ;;  %610 = vst.msk [vmem:[#allocation3 + $0x218] sm:$0xff] %vm33_vm0, %v594_v13  ;;  %v976_v36 = vpack.c.bf16 %v955_v3, %v954_v0  ;;  %v5357_v0 = vld [vmem:[%s7779_s1 + $0xb0] sm:$0xff]  }
  0xac   : > { %534 = vst.msk [vmem:[#allocation3 + $0x30] sm:$0xff] %vm7788_vm2, %v488_v38  ;;  %1446 = vmatprep.mubr.bf16.mxu0 %v999_v60 }
  0xad   : > { %v319_v15 = vpop.permute.xlu1 %318  ;;  %1447 = vmatmul.mubr.bf16.vlgmr.msra.gmra.mrb[0].mxu0 %v998_v56  ;;  %900 = vrot.lane.b32.xlu0 %v853_v46, %s5452_s15  ;;  %v1058_v6 = vld [vmem:[#allocation3 + $0x1e0] sm:$0xff]  ;;  %992 = vst.msk [vmem:[#allocation3 + $0x1b0] sm:$0xff] %vm33_vm0, %v976_v36  ;;  %v981_v46 = vpack.c.bf16 %v965_v48, %v964_v47 }
  0xae   : > { %354 = vst.msk [vmem:[#allocation3 + $0x208] sm:$0xff] %vm7788_vm2, %v319_v15  ;;  %5184 = vmatpush3.bf16.msra.mxu0 %v5854_v52  ;;  %v770_v52 = vld [vmem:[#allocation2 + $0x180] sm:$0xff] }
  0xaf   : > { %v295_v8 = vpop.permute.xlu0 %294  ;;  %v1059_v9 = vld [vmem:[#allocation3 + $0x1e8] sm:$0xff]  ;;  %5185 = vmatprep.subr.bf16.mxu0 %v5356_v62  ;;  %v788_v20 = vpack.c.bf16 %v771_v61, %v770_v52  ;;  %997 = vst.msk [vmem:[#allocation3 + $0x278] sm:$0xff] %vm33_vm0, %v981_v46 }
  0xb0   : > { %342 = vst.msk [vmem:[#allocation3 + $0x28] sm:$0xff] %vm7788_vm2, %v295_v8  ;;  %1542 = vmatprep.mubr.bf16.mxu1 %v1059_v9 }
  0xb1   : > { %v514_v14 = vpop.permute.xlu1 %513  ;;  %v1064_v16 = vld [vmem:[#allocation3 + $0x210] sm:$0xff]  ;;  %1543 = vmatmul.mubr.bf16.vlgmr.msra.gmra.mrb[0].mxu1 %v1058_v6  ;;  %804 = vst.msk [vmem:[#allocation3 + $0x248] sm:$0xff] %vm33_vm0, %v788_v20 }
  0xb2   : > { %547 = vst.msk [vmem:[#allocation3 + $0x238] sm:$0xff] %vm7788_vm2, %v514_v14  ;;  %4808 = vmatpush3.bf16.msra.mxu1 %v5344_v42  ;;  %1550 = vmatprep.mubr.bf16.mxu1 %v1064_v16  ;;  %v5359_v42 = vld [vmem:[%s7779_s1 + $0xb8] sm:$0xff]  }
  0xb3   : > { %v490_v10 = vpop.permute.xlu0 %489  ;;  %4809 = vmatprep.subr.bf16.mxu1 %v5345_v12  ;;  %v1004_v21 = vld [vmem:[#allocation3 + $0x30] sm:$0xff]  ;;  %5186 = vmatpush3.bf16.msra.mxu0 %v5356_v62  ;;  %v5355_v62 = vld [vmem:[%s7779_s1 + $0xf0] sm:$0xff]  }
  0xb4   : > { %535 = vst.msk [vmem:[#allocation3 + $0x58] sm:$0xff] %vm7788_vm2, %v490_v10  ;;  %1454 = vmatprep.mubr.bf16.mxu0 %v1004_v21  ;;  %5187 = vmatprep.subr.bf16.mxu0 %v5360_v2 }
  0xb5   : > { %v321_v34 = vpop.permute.xlu1 %320  ;;  %v1063_v29 = vld [vmem:[#allocation3 + $0x208] sm:$0xff] }
  0xb6   : > { %355 = vst.msk [vmem:[#allocation3 + $0x230] sm:$0xff] %vm7788_vm2, %v321_v34  ;;  %4810 = vmatpush3.bf16.msra.mxu1 %v5346_v18 }
  0xb7   : > { %v297_v33 = vpop.permute.xlu0 %296  ;;  %v1003_v37 = vld [vmem:[#allocation3 + $0x28] sm:$0xff]  ;;  %4811 = vmatprep.subr.bf16.mxu1 %v5347_v22  ;;  %5188 = vmatpush3.bf16.msra.mxu0 %v5360_v2 }
  0xb8   : > { %343 = vst.msk [vmem:[#allocation3 + $0x50] sm:$0xff] %vm7788_vm2, %v297_v33  ;;  %1455 = vmatmul.mubr.bf16.gmra.mrb[4].mxu0 %v1003_v37  ;;  %5189 = vmatprep.subr.bf16.mxu0 %v5361_v25 }
  0xb9   : > { %v516_v39 = vpop.permute.xlu1 %515  ;;  %v1069_v41 = vld [vmem:[#allocation3 + $0x238] sm:$0xff]  ;;  %1551 = vmatmul.mubr.bf16.gmra.mrb[4].mxu1 %v1063_v29 }
  0xba   : > { %548 = vst.msk [vmem:[#allocation3 + $0x260] sm:$0xff] %vm7788_vm2, %v516_v39  ;;  %4812 = vmatpush3.bf16.msra.mxu1 %v5348_v32  ;;  %1558 = vmatprep.mubr.bf16.mxu1 %v1069_v41 }
  0xbb   : > { %v492_v11 = vpop.permute.xlu0 %491  ;;  %4813 = vmatprep.subr.bf16.mxu1 %v5349_v59  ;;  %v1009_v53 = vld [vmem:[#allocation3 + $0x58] sm:$0xff]  ;;  %5190 = vmatpush3.bf16.msra.mxu0 %v5361_v25 }
  0xbc   : > { %536 = vst.msk [vmem:[#allocation3 + $0x80] sm:$0xff] %vm7788_vm2, %v492_v11  ;;  %1462 = vmatprep.mubr.bf16.mxu0 %v1009_v53 }
  0xbd   : > { %v323_v45 = vpop.permute.xlu1 %322  ;;  %v1068_v50 = vld [vmem:[#allocation3 + $0x230] sm:$0xff] }
  0xbe   : > { %356 = vst.msk [vmem:[#allocation3 + $0x258] sm:$0xff] %vm7788_vm2, %v323_v45  ;;  %4814 = vmatpush3.bf16.msra.mxu1 %v5350_v30 }
  0xbf   : > { %v299_v54 = vpop.permute.xlu0 %298  ;;  %v1008_v55 = vld [vmem:[#allocation3 + $0x50] sm:$0xff]  ;;  %4815 = vmatprep.subr.bf16.mxu1 %v5351_v23 }
  0xc0   : > { %344 = vst.msk [vmem:[#allocation3 + $0x78] sm:$0xff] %vm7788_vm2, %v299_v54  ;;  %1463 = vmatmul.mubr.bf16.gmra.mrb[8].mxu0 %v1008_v55 }
  0xc1   : > { %v871_v56 = vpop.permute.xlu1 %870  ;;  %v1074_v57 = vld [vmem:[#allocation3 + $0x260] sm:$0xff]  ;;  %1559 = vmatmul.mubr.bf16.gmra.mrb[8].mxu1 %v1068_v50 }
  0xc2   : > { %918 = vst.msk [vmem:[#allocation3 + $0x18] sm:$0xff] %vm7788_vm2, %v871_v56  ;;  %4816 = vmatpush3.bf16.msra.mxu1 %v5352_v51  ;;  %1566 = vmatprep.mubr.bf16.mxu1 %v1074_v57 }
  0xc3   : > { %v494_v38 = vpop.permute.xlu0 %493  ;;  %4817 = vmatprep.subr.bf16.mxu1 %v5353_v63  ;;  %v1014_v60 = vld [vmem:[#allocation3 + $0x80] sm:$0xff] }
  0xc4   : > { %537 = vst.msk [vmem:[#allocation3 + $0xa8] sm:$0xff] %vm7788_vm2, %v494_v38  ;;  %1470 = vmatprep.mubr.bf16.mxu0 %v1014_v60 }
  0xc5   : > { %v678_v13 = vpop.permute.xlu1 %677  ;;  %v1073_v15 = vld [vmem:[#allocation3 + $0x258] sm:$0xff] }
  0xc6   : > { %725 = vst.msk [vmem:[#allocation3 + $0x10] sm:$0xff] %vm7788_vm2, %v678_v13  ;;  %4818 = vmatpush3.bf16.msra.mxu1 %v5354_v58 }
  0xc7   : > { %v301_v3 = vpop.permute.xlu0 %300  ;;  %v1013_v36 = vld [vmem:[#allocation3 + $0x78] sm:$0xff]  ;;  %4819 = vmatprep.subr.bf16.mxu1 %v5355_v62 }
  0xc8   : > { %345 = vst.msk [vmem:[#allocation3 + $0xa0] sm:$0xff] %vm7788_vm2, %v301_v3  ;;  %1471 = vmatmul.mubr.bf16.gmra.mrb[12].mxu0 %v1013_v36 }
  0xc9   : > { %v873_v5 = vpop.permute.xlu1 %872  ;;  %v1001_v6 = vld [vmem:[#allocation3 + $0x18] sm:$0xff]  ;;  %1567 = vmatmul.mubr.bf16.gmra.mrb[12].mxu1 %v1073_v15 }
  0xca   : > { %919 = vst.msk [vmem:[#allocation3 + $0x40] sm:$0xff] %vm7788_vm2, %v873_v5  ;;  %4820 = vmatpush3.bf16.msra.mxu1 %v5357_v0  ;;  %1607 = vmatprep.mubr.bf16.mxu1 %v1001_v6  ;;  %v1002_v5 = vld [vmem:[#allocation3 + $0x20] sm:$0xff] }
  0xcb   : > { %v496_v49 = vpop.permute.xlu0 %495  ;;  %4821 = vmatprep.subr.bf16.mxu1 %v5358_v4  ;;  %v1019_v8 = vld [vmem:[#allocation3 + $0xa8] sm:$0xff] }
  0xcc   : > { %538 = vst.msk [vmem:[#allocation3 + $0xd0] sm:$0xff] %vm7788_vm2, %v496_v49  ;;  %1478 = vmatprep.mubr.bf16.mxu0 %v1019_v8 }
  0xcd   : > { %v680_v9 = vpop.permute.xlu1 %679  ;;  %v1000_v12 = vld [vmem:[#allocation3 + $0x10] sm:$0xff] }
  0xce   : > { %726 = vst.msk [vmem:[#allocation3 + $0x38] sm:$0xff] %vm7788_vm2, %v680_v9  ;;  %4822 = vmatpush3.bf16.msra.mxu1 %v5359_v42 }
  0xcf   : > { %v303_v14 = vpop.permute.xlu0 %302  ;;  %v1018_v16 = vld [vmem:[#allocation3 + $0xa0] sm:$0xff] }
  0xd0   : > { %346 = vst.msk [vmem:[#allocation3 + $0xc8] sm:$0xff] %vm7788_vm2, %v303_v14  ;;  %1479 = vmatmul.mubr.bf16.gmra.mrb[16].mxu0 %v1018_v16  ;;  %v1007_v14 = vld [vmem:[#allocation3 + $0x48] sm:$0xff] }
  0xd1   : > { %v875_v2 = vpop.permute.xlu1 %874  ;;  %v1006_v52 = vld [vmem:[#allocation3 + $0x40] sm:$0xff]  ;;  %1608 = vmatmul.mubr.bf16.vlgmr.msra.gmra.mrb[16].mxu1 %v1000_v12 }
  0xd2   : > { %920 = vst.msk [vmem:[#allocation3 + $0x68] sm:$0xff] %vm7788_vm2, %v875_v2  ;;  %1615 = vmatprep.mubr.bf16.mxu1 %v1006_v52  ;;  %v1012_v2 = vld [vmem:[#allocation3 + $0x70] sm:$0xff] }
  0xd3   : > { %v498_v61 = vpop.permute.xlu0 %497  ;;  %v1024_v17 = vld [vmem:[#allocation3 + $0xd0] sm:$0xff] }
  0xd4   : > { %539 = vst.msk [vmem:[#allocation3 + $0xf8] sm:$0xff] %vm7788_vm2, %v498_v61  ;;  %1486 = vmatprep.mubr.bf16.mxu0 %v1024_v17 }
  0xd5   : > { %v682_v18 = vpop.permute.xlu1 %681  ;;  %v1005_v20 = vld [vmem:[#allocation3 + $0x38] sm:$0xff] }
  0xd6   : > { %727 = vst.msk [vmem:[#allocation3 + $0x60] sm:$0xff] %vm7788_vm2, %v682_v18 }
  0xd7   : > { %v305_v19 = vpop.permute.xlu0 %304  ;;  %v1023_v10 = vld [vmem:[#allocation3 + $0xc8] sm:$0xff] }
  0xd8   : > { %347 = vst.msk [vmem:[#allocation3 + $0xf0] sm:$0xff] %vm7788_vm2, %v305_v19  ;;  %1487 = vmatmul.mubr.bf16.gmra.mrb[20].mxu0 %v1023_v10  ;;  %v1017_v19 = vld [vmem:[#allocation3 + $0x98] sm:$0xff] }
  0xd9   : > { %v877_v21 = vpop.permute.xlu1 %876  ;;  %v1011_v22 = vld [vmem:[#allocation3 + $0x68] sm:$0xff]  ;;  %1616 = vmatmul.mubr.bf16.gmra.mrb[20].mxu1 %v1005_v20 }
  0xda   : > { %921 = vst.msk [vmem:[#allocation3 + $0x90] sm:$0xff] %vm7788_vm2, %v877_v21  ;;  %1623 = vmatprep.mubr.bf16.mxu1 %v1011_v22  ;;  %v1022_v21 = vld [vmem:[#allocation3 + $0xc0] sm:$0xff] }
  0xdb   : > { %v500_v24 = vpop.permute.xlu0 %499  ;;  %v1029_v34 = vld [vmem:[#allocation3 + $0xf8] sm:$0xff] }
  0xdc   : > { %540 = vst.msk [vmem:[#allocation3 + $0x120] sm:$0xff] %vm7788_vm2, %v500_v24  ;;  %1494 = vmatprep.mubr.bf16.mxu0 %v1029_v34 }
  0xdd   : > { %v684_v25 = vpop.permute.xlu1 %683  ;;  %v1010_v31 = vld [vmem:[#allocation3 + $0x60] sm:$0xff] }
  0xde   : > { %728 = vst.msk [vmem:[#allocation3 + $0x88] sm:$0xff] %vm7788_vm2, %v684_v25 }
  0xdf   : > { %v307_v26 = vpop.permute.xlu0 %306  ;;  %v1028_v27 = vld [vmem:[#allocation3 + $0xf0] sm:$0xff] }
  0xe0   : > { %348 = vst.msk [vmem:[#allocation3 + $0x118] sm:$0xff] %vm7788_vm2, %v307_v26  ;;  %1495 = vmatmul.mubr.bf16.gmra.mrb[24].mxu0 %v1028_v27  ;;  %v1027_v26 = vld [vmem:[#allocation3 + $0xe8] sm:$0xff] }
  0xe1   : > { %v879_v28 = vpop.permute.xlu1 %878  ;;  %v1016_v40 = vld [vmem:[#allocation3 + $0x90] sm:$0xff]  ;;  %1624 = vmatmul.mubr.bf16.gmra.mrb[24].mxu1 %v1010_v31 }
  0xe2   : > { %922 = vst.msk [vmem:[#allocation3 + $0xb8] sm:$0xff] %vm7788_vm2, %v879_v28  ;;  %1631 = vmatprep.mubr.bf16.mxu1 %v1016_v40  ;;  %v1032_v28 = vld [vmem:[#allocation3 + $0x110] sm:$0xff] }
  0xe3   : > { %v502_v29 = vpop.permute.xlu0 %501  ;;  %v1034_v32 = vld [vmem:[#allocation3 + $0x120] sm:$0xff] }
  0xe4   : > { %541 = vst.msk [vmem:[#allocation3 + $0x148] sm:$0xff] %vm7788_vm2, %v502_v29  ;;  %1502 = vmatprep.mubr.bf16.mxu0 %v1034_v32  ;;  %v1037_v32 = vld [vmem:[#allocation3 + $0x138] sm:$0xff] }
  0xe5   : > { %v686_v35 = vpop.permute.xlu1 %685  ;;  %v1015_v33 = vld [vmem:[#allocation3 + $0x88] sm:$0xff] }
  0xe6   : > { %729 = vst.msk [vmem:[#allocation3 + $0xb0] sm:$0xff] %vm7788_vm2, %v686_v35 }
  0xe7   : > { %v309_v37 = vpop.permute.xlu0 %308  ;;  %v1033_v59 = vld [vmem:[#allocation3 + $0x118] sm:$0xff] }
  0xe8   : > { %349 = vst.msk [vmem:[#allocation3 + $0x140] sm:$0xff] %vm7788_vm2, %v309_v37  ;;  %1503 = vmatmul.mubr.bf16.gmra.mrb[28].mxu0 %v1033_v59  ;;  %v1047_v59 = vld [vmem:[#allocation3 + $0x188] sm:$0xff] }
  0xe9   : > { %v881_v39 = vpop.permute.xlu1 %880  ;;  %v1021_v41 = vld [vmem:[#allocation3 + $0xb8] sm:$0xff]  ;;  %1632 = vmatmul.mubr.bf16.gmra.mrb[28].mxu1 %v1015_v33  ;;  %v1042_v33 = vld [vmem:[#allocation3 + $0x160] sm:$0xff] }
  0xea   : > { %923 = vst.msk [vmem:[#allocation3 + $0xe0] sm:$0xff] %vm7788_vm2, %v881_v39  ;;  %1639 = vmatprep.mubr.bf16.mxu1 %v1021_v41  ;;  %v1052_v41 = vld [vmem:[#allocation3 + $0x1b0] sm:$0xff] }
  0xeb   : > { %v504_v7 = vpop.permute.xlu0 %503  ;;  %v1039_v43 = vld [vmem:[#allocation3 + $0x148] sm:$0xff] }
  0xec   : > { %542 = vst.msk [vmem:[#allocation3 + $0x170] sm:$0xff] %vm7788_vm2, %v504_v7  ;;  %1510 = vmatprep.mubr.bf16.mxu0 %v1039_v43  ;;  %v1057_v43 = vld [vmem:[#allocation3 + $0x1d8] sm:$0xff] }
  0xed   : > { %v688_v30 = vpop.permute.xlu1 %687  ;;  %v1020_v44 = vld [vmem:[#allocation3 + $0xb0] sm:$0xff] }
  0xee   : > { %730 = vst.msk [vmem:[#allocation3 + $0xd8] sm:$0xff] %vm7788_vm2, %v688_v30 }
  0xef   : > { %v311_v11 = vpop.permute.xlu0 %310  ;;  %v1038_v53 = vld [vmem:[#allocation3 + $0x140] sm:$0xff] }
  0xf0   : > { %350 = vst.msk [vmem:[#allocation3 + $0x168] sm:$0xff] %vm7788_vm2, %v311_v11  ;;  %1511 = vmatmul.mubr.bf16.gmra.mrb[32].mxu0 %v1038_v53  ;;  %v1067_v53 = vld [vmem:[#allocation3 + $0x228] sm:$0xff] }
  0xf1   : > { %v883_v23 = vpop.permute.xlu1 %882  ;;  %v1026_v45 = vld [vmem:[#allocation3 + $0xe0] sm:$0xff]  ;;  %1640 = vmatmul.mubr.bf16.gmra.mrb[32].mxu1 %v1020_v44 }
  0xf2   : > { %924 = vst.msk [vmem:[#allocation3 + $0x108] sm:$0xff] %vm7788_vm2, %v883_v23  ;;  %1647 = vmatprep.mubr.bf16.mxu1 %v1026_v45  ;;  %v1062_v44 = vld [vmem:[#allocation3 + $0x200] sm:$0xff]  ;;  %v1072_v45 = vld [vmem:[#allocation3 + $0x250] sm:$0xff] }
  0xf3   : > { %v506_v47 = vpop.permute.xlu0 %505  ;;  %v1044_v48 = vld [vmem:[#allocation3 + $0x170] sm:$0xff] }
  0xf4   : > { %543 = vst.msk [vmem:[#allocation3 + $0x198] sm:$0xff] %vm7788_vm2, %v506_v47  ;;  %1518 = vmatprep.mubr.bf16.mxu0 %v1044_v48  ;;  %v1077_v48 = vld [vmem:[#allocation3 + $0x278] sm:$0xff] }
  0xf5   : > { %v690_v50 = vpop.permute.xlu1 %689  ;;  %v1025_v51 = vld [vmem:[#allocation3 + $0xd8] sm:$0xff] }
  0xf6   : > { %731 = vst.msk [vmem:[#allocation3 + $0x100] sm:$0xff] %vm7788_vm2, %v690_v50 }
  0xf7   : > { %v313_v46 = vpop.permute.xlu0 %312  ;;  %v1043_v54 = vld [vmem:[#allocation3 + $0x168] sm:$0xff] }
  0xf8   : > { %351 = vst.msk [vmem:[#allocation3 + $0x190] sm:$0xff] %vm7788_vm2, %v313_v46  ;;  %1519 = vmatmul.mubr.bf16.gmra.mrb[36].mxu0 %v1043_v54 }
  0xf9   : > { %v885_v55 = vpop.permute.xlu1 %884  ;;  %v1031_v63 = vld [vmem:[#allocation3 + $0x108] sm:$0xff]  ;;  %1648 = vmatmul.mubr.bf16.gmra.mrb[36].mxu1 %v1025_v51 }
  0xfa   : > { %925 = vst.msk [vmem:[#allocation3 + $0x130] sm:$0xff] %vm7788_vm2, %v885_v55  ;;  %1655 = vmatprep.mubr.bf16.mxu1 %v1031_v63 }
  0xfb   : > { %v508_v56 = vpop.permute.xlu0 %507  ;;  %v1049_v57 = vld [vmem:[#allocation3 + $0x198] sm:$0xff] }
  0xfc   : > { %544 = vst.msk [vmem:[#allocation3 + $0x1c0] sm:$0xff] %vm7788_vm2, %v508_v56  ;;  %1526 = vmatprep.mubr.bf16.mxu0 %v1049_v57 }
  0xfd   : > { %v692_v58 = vpop.permute.xlu1 %691  ;;  %v1030_v38 = vld [vmem:[#allocation3 + $0x100] sm:$0xff] }
  0xfe   : > { %732 = vst.msk [vmem:[#allocation3 + $0x128] sm:$0xff] %vm7788_vm2, %v692_v58 }
  0xff   : > { %v315_v60 = vpop.permute.xlu0 %314  ;;  %v1048_v62 = vld [vmem:[#allocation3 + $0x190] sm:$0xff] }
 0x100   : > { %352 = vst.msk [vmem:[#allocation3 + $0x1b8] sm:$0xff] %vm7788_vm2, %v315_v60  ;;  %1527 = vmatmul.mubr.bf16.gmra.mrb[40].mxu0 %v1048_v62 }
 0x101   : > { %v1036_v13 = vld [vmem:[#allocation3 + $0x130] sm:$0xff]  ;;  %v694_v15 = vpop.permute.xlu1 %693  ;;  %1656 = vmatmul.mubr.bf16.gmra.mrb[40].mxu1 %v1030_v38 }
 0x102   : > { %733 = vst.msk [vmem:[#allocation3 + $0x150] sm:$0xff] %vm7788_vm2, %v694_v15  ;;  %1663 = vmatprep.mubr.bf16.mxu1 %v1036_v13 }
 0x103   : > { %v1054_v0 = vld [vmem:[#allocation3 + $0x1c0] sm:$0xff]  ;;  %v887_v3 = vpop.permute.xlu0 %886 }
 0x104   : > { %1534 = vmatprep.mubr.bf16.mxu0 %v1054_v0  ;;  %926 = vst.msk [vmem:[#allocation3 + $0x158] sm:$0xff] %vm7788_vm2, %v887_v3 }
 0x105   : > { %v696_v36 = vpop.permute.xlu1 %695  ;;  %v1035_v4 = vld [vmem:[#allocation3 + $0x128] sm:$0xff] }
 0x106   : > { %734 = vst.msk [vmem:[#allocation3 + $0x178] sm:$0xff] %vm7788_vm2, %v696_v36 }
 0x107   : > { %v1053_v6 = vld [vmem:[#allocation3 + $0x1b8] sm:$0xff]  ;;  %v889_v42 = vpop.permute.xlu0 %888 }
 0x108   : > { %1535 = vmatmul.mubr.bf16.gmra.mrb[44].mxu0 %v1053_v6  ;;  %927 = vst.msk [vmem:[#allocation3 + $0x180] sm:$0xff] %vm7788_vm2, %v889_v42 }
 0x109   : > { %v698_v49 = vpop.permute.xlu1 %697  ;;  %1664 = vmatmul.mubr.bf16.gmra.mrb[44].mxu1 %v1035_v4  ;;  %5191 = vmatprep.mubr.msk.bf16.mxu0 %vm33_vm0, %v1002_v5  ;;  %v1040_v16 = vld [vmem:[#allocation3 + $0x150] sm:$0xff] }
 0x10a   : > { %735 = vst.msk [vmem:[#allocation3 + $0x1a0] sm:$0xff] %vm7788_vm2, %v698_v49 }
 0x10b   : > { %v1041_v8 = vld [vmem:[#allocation3 + $0x158] sm:$0xff]  ;;  %v891_v9 = vpop.permute.xlu0 %890 }
 0x10c   : > { %1671 = vmatprep.mubr.bf16.mxu1 %v1041_v8  ;;  %928 = vst.msk [vmem:[#allocation3 + $0x1a8] sm:$0xff] %vm7788_vm2, %v891_v9 }
 0x10d   : > { %v700_v12 = vpop.permute.xlu1 %699  ;;  %v1045_v10 = vld [vmem:[#allocation3 + $0x178] sm:$0xff] }
 0x10e   : > { %736 = vst.msk [vmem:[#allocation3 + $0x1c8] sm:$0xff] %vm7788_vm2, %v700_v12 }
 0x10f   : > { %v1046_v52 = vld [vmem:[#allocation3 + $0x180] sm:$0xff]  ;;  %v893_v61 = vpop.permute.xlu0 %892 }
 0x110   : > { %5192 = vmatmul.mubr.msk.bf16.vlgmr.msra.gmra.mrb[48].mxu0 %vm33_vm0, %v1007_v14  ;;  %929 = vst.msk [vmem:[#allocation3 + $0x1d0] sm:$0xff] %vm7788_vm2, %v893_v61 }
 0x111   : > { %v702_v17 = vpop.permute.xlu1 %701  ;;  %1672 = vmatmul.mubr.bf16.gmra.mrb[48].mxu1 %v1040_v16  ;;  %5195 = vmatprep.mubr.msk.bf16.mxu0 %vm33_vm0, %v1012_v2  ;;  %v1050_v27 = vld [vmem:[#allocation3 + $0x1a0] sm:$0xff] }
 0x112   : > { %737 = vst.msk [vmem:[#allocation3 + $0x1f0] sm:$0xff] %vm7788_vm2, %v702_v17  ;;  %1679 = vmatprep.mubr.bf16.mxu1 %v1046_v52 }
 0x113   : > { %v895_v18 = vpop.permute.xlu0 %894  ;;  %v1051_v22 = vld [vmem:[#allocation3 + $0x1a8] sm:$0xff] }
 0x114   : > { %930 = vst.msk [vmem:[#allocation3 + $0x1f8] sm:$0xff] %vm7788_vm2, %v895_v18 }
 0x115   : > { %v704_v20 = vpop.permute.xlu1 %703  ;;  %v1055_v35 = vld [vmem:[#allocation3 + $0x1c8] sm:$0xff] }
 0x116   : > { %738 = vst.msk [vmem:[#allocation3 + $0x218] sm:$0xff] %vm7788_vm2, %v704_v20 }
 0x117   : > { %v897_v24 = vpop.permute.xlu0 %896  ;;  %v1056_v40 = vld [vmem:[#allocation3 + $0x1d0] sm:$0xff] }
 0x118   : > { %5196 = vmatmul.mubr.msk.bf16.gmra.mrb[52].mxu0 %vm33_vm0, %v1017_v19  ;;  %931 = vst.msk [vmem:[#allocation3 + $0x220] sm:$0xff] %vm7788_vm2, %v897_v24 }
 0x119   : > { %v706_v34 = vpop.permute.xlu1 %705  ;;  %1680 = vmatmul.mubr.bf16.gmra.mrb[52].mxu1 %v1045_v10  ;;  %5199 = vmatprep.mubr.msk.bf16.mxu0 %vm33_vm0, %v1022_v21  ;;  %v1060_v39 = vld [vmem:[#allocation3 + $0x1f0] sm:$0xff] }
 0x11a   : > { %739 = vst.msk [vmem:[#allocation3 + $0x240] sm:$0xff] %vm7788_vm2, %v706_v34  ;;  %1687 = vmatprep.mubr.bf16.mxu1 %v1051_v22 }
 0x11b   : > { %v899_v25 = vpop.permute.xlu0 %898  ;;  %v1061_v37 = vld [vmem:[#allocation3 + $0x1f8] sm:$0xff] }
 0x11c   : > { %932 = vst.msk [vmem:[#allocation3 + $0x248] sm:$0xff] %vm7788_vm2, %v899_v25 }
 0x11d   : > { %v708_v31 = vpop.permute.xlu1 %707  ;;  %v1065_v30 = vld [vmem:[#allocation3 + $0x218] sm:$0xff] }
 0x11e   : > { %740 = vst.msk [vmem:[#allocation3 + $0x268] sm:$0xff] %vm7788_vm2, %v708_v31 }
 0x11f   : > { %v901_v29 = vpop.permute.xlu0 %900  ;;  %v1066_v7 = vld [vmem:[#allocation3 + $0x220] sm:$0xff] }
 0x120   : > { %5200 = vmatmul.mubr.msk.bf16.gmra.mrb[56].mxu0 %vm33_vm0, %v1027_v26  ;;  %933 = vst.msk [vmem:[#allocation3 + $0x270] sm:$0xff] %vm7788_vm2, %v901_v29 }
 0x121   : > { %1688 = vmatmul.mubr.bf16.gmra.mrb[56].mxu1 %v1050_v27  ;;  %5203 = vmatprep.mubr.msk.bf16.mxu0 %vm33_vm0, %v1032_v28  ;;  %v1070_v23 = vld [vmem:[#allocation3 + $0x240] sm:$0xff] }
 0x122   : > { %1695 = vmatprep.mubr.bf16.mxu1 %v1056_v40 }
 0x123   : > { %v1071_v11 = vld [vmem:[#allocation3 + $0x248] sm:$0xff] }
 0x125   : > { %v1075_v50 = vld [vmem:[#allocation3 + $0x268] sm:$0xff] }
 0x127   : > { %v1076_v47 = vld [vmem:[#allocation3 + $0x270] sm:$0xff] }
 0x128   : > { %5204 = vmatmul.mubr.msk.bf16.gmra.mrb[60].mxu0 %vm33_vm0, %v1037_v32 }
 0x129   : > { %1696 = vmatmul.mubr.bf16.gmra.mrb[60].mxu1 %v1055_v35  ;;  %5207 = vmatprep.mubr.msk.bf16.mxu0 %vm33_vm0, %v1042_v33 }
 0x12a   : > { %1703 = vmatprep.mubr.bf16.mxu1 %v1061_v37 }
 0x130   : > { %5208 = vmatmul.mubr.msk.bf16.gmra.mrb[64].mxu0 %vm33_vm0, %v1047_v59 }
 0x131   : > { %1704 = vmatmul.mubr.bf16.gmra.mrb[64].mxu1 %v1060_v39  ;;  %5211 = vmatprep.mubr.msk.bf16.mxu0 %vm33_vm0, %v1052_v41 }
 0x132   : > { %1711 = vmatprep.mubr.bf16.mxu1 %v1066_v7 }
 0x138   : > { %5212 = vmatmul.mubr.msk.bf16.gmra.mrb[68].mxu0 %vm33_vm0, %v1057_v43 }
 0x139   : > { %1712 = vmatmul.mubr.bf16.gmra.mrb[68].mxu1 %v1065_v30  ;;  %5215 = vmatprep.mubr.msk.bf16.mxu0 %vm33_vm0, %v1062_v44 }
 0x13a   : > { %1719 = vmatprep.mubr.bf16.mxu1 %v1071_v11 }
 0x140   : > { %5216 = vmatmul.mubr.msk.bf16.gmra.mrb[72].mxu0 %vm33_vm0, %v1067_v53 }
 0x141   : > { %1720 = vmatmul.mubr.bf16.gmra.mrb[72].mxu1 %v1070_v23  ;;  %5219 = vmatprep.mubr.msk.bf16.mxu0 %vm33_vm0, %v1072_v45 }
 0x142   : > { %1727 = vmatprep.mubr.bf16.mxu1 %v1076_v47 }
 0x148   : > { %5220 = vmatmul.mubr.msk.bf16.gmra.mrb[76].mxu0 %vm33_vm0, %v1077_v48 }
 0x149   : > { %1728 = vmatmul.mubr.bf16.gmra.mrb[76].mxu1 %v1075_v50 }
 0x180   : > { %v4711_v51 = vpop.f32.mrb[0].mxu0 }
 0x181   : > { %v4712_v46 = vpop.f32.mrb[1].mxu0 }
 0x182   : > { %v4713_v54 = vadd.f32 %v4712_v46, %v4711_v51  ;;  %v4714_v55 = vpop.f32.mrb[2].mxu0 }
 0x183   : > { %v4715_v63 = vpop.f32.mrb[3].mxu0 }
 0x184   : > { %v4716_v56 = vadd.f32 %v4715_v63, %v4714_v55  ;;  %v4783_v57 = vpop.f32.mrb[0].mxu1 }
 0x185   : > { %v4784_v58 = vpop.f32.mrb[1].mxu1 }
 0x186   : > { %v6127_v38 = vadd.f32 %v4784_v58, %v4783_v57  ;;  %v4786_v60 = vpop.f32.mrb[2].mxu1 }
 0x187   : > { %v4787_v62 = vpop.f32.mrb[3].mxu1 }
 0x188   : > { %v6129_v13 = vadd.f32 %v4787_v62, %v4786_v60 }
 0x18b   : > { %v4717_v15 = vpop.f32.mrb[4].mxu0 }
 0x18c   : > { %v4718_v0 = vpop.f32.mrb[5].mxu0  ;;  %v4789_v3 = vpop.f32.mrb[4].mxu1 }
 0x18d   : > { %v4719_v36 = vadd.f32 %v4718_v0, %v4717_v15  ;;  %v4720_v4 = vpop.f32.mrb[6].mxu0  ;;  %v4790_v5 = vpop.f32.mrb[5].mxu1 }
 0x18e   : > { %v6131_v6 = vadd.f32 %v4790_v5, %v4789_v3  ;;  %v4721_v42 = vpop.f32.mrb[7].mxu0  ;;  %v4792_v49 = vpop.f32.mrb[6].mxu1 }
 0x18f   : > { %v4722_v8 = vadd.f32 %v4721_v42, %v4720_v4  ;;  %v4793_v9 = vpop.f32.mrb[7].mxu1 }
 0x190   : > { %v6133_v12 = vadd.f32 %v4793_v9, %v4792_v49 }
 0x193   : > { %v4723_v14 = vpop.f32.mrb[8].mxu0 }
 0x194   : > { %v4724_v16 = vpop.f32.mrb[9].mxu0  ;;  %v4795_v2 = vpop.f32.mrb[8].mxu1 }
 0x195   : > { %v4725_v52 = vadd.f32 %v4724_v16, %v4723_v14  ;;  %v4726_v61 = vpop.f32.mrb[10].mxu0  ;;  %v4796_v17 = vpop.f32.mrb[9].mxu1 }
 0x196   : > { %v6135_v18 = vadd.f32 %v4796_v17, %v4795_v2  ;;  %v4727_v20 = vpop.f32.mrb[11].mxu0  ;;  %v4798_v19 = vpop.f32.mrb[10].mxu1 }
 0x197   : > { %v4728_v10 = vadd.f32 %v4727_v20, %v4726_v61  ;;  %v4799_v21 = vpop.f32.mrb[11].mxu1 }
 0x198   : > { %v6137_v22 = vadd.f32 %v4799_v21, %v4798_v19 }
 0x19b   : > { %v4729_v24 = vpop.f32.mrb[12].mxu0 }
 0x19c   : > { %v4730_v34 = vpop.f32.mrb[13].mxu0  ;;  %v4801_v25 = vpop.f32.mrb[12].mxu1 }
 0x19d   : > { %v6139_v31 = vadd.f32 %v4730_v34, %v4729_v24  ;;  %v4732_v26 = vpop.f32.mrb[14].mxu0  ;;  %v4802_v27 = vpop.f32.mrb[13].mxu1 }
 0x19e   : > { %v6141_v28 = vadd.f32 %v4802_v27, %v4801_v25  ;;  %v4733_v40 = vpop.f32.mrb[15].mxu0  ;;  %v4804_v29 = vpop.f32.mrb[14].mxu1 }
 0x19f   : > { %v4734_v32 = vadd.f32 %v4733_v40, %v4732_v26  ;;  %v4805_v35 = vpop.f32.mrb[15].mxu1 }
 0x1a0   : > { %v6143_v33 = vadd.f32 %v4805_v35, %v4804_v29 }
 0x1a3   : > { %v4735_v37 = vpop.f32.mrb[16].mxu0 }
 0x1a4   : > { %v4736_v59 = vpop.f32.mrb[17].mxu0  ;;  %v4823_v39 = vpop.f32.mrb[16].mxu1 }
 0x1a5   : > { %v6145_v41 = vadd.f32 %v4736_v59, %v4735_v37  ;;  %v4738_v7 = vpop.f32.mrb[18].mxu0  ;;  %v4824_v43 = vpop.f32.mrb[17].mxu1 }
 0x1a6   : > { %v4825_v30 = vadd.f32 %v4824_v43, %v4823_v39  ;;  %v4739_v44 = vpop.f32.mrb[19].mxu0  ;;  %v4826_v11 = vpop.f32.mrb[18].mxu1 }
 0x1a7   : > { %v4740_v53 = vadd.f32 %v4739_v44, %v4738_v7  ;;  %v4827_v23 = vpop.f32.mrb[19].mxu1 }
 0x1a8   : > { %v4828_v45 = vadd.f32 %v4827_v23, %v4826_v11  ;;  %v6147_v47 = vadd.f32 %v4825_v30, %v4713_v54 }
 0x1aa   : > { %v6149_v48 = vadd.f32 %v4828_v45, %v4716_v56 }
 0x1ab   : > { %v4741_v50 = vpop.f32.mrb[20].mxu0 }
 0x1ac   : > { %v4742_v51 = vpop.f32.mrb[21].mxu0  ;;  %v4829_v46 = vpop.f32.mrb[20].mxu1 }
 0x1ad   : > { %v6151_v55 = vadd.f32 %v4742_v51, %v4741_v50  ;;  %v4744_v63 = vpop.f32.mrb[22].mxu0  ;;  %v4830_v57 = vpop.f32.mrb[21].mxu1 }
 0x1ae   : > { %v4831_v58 = vadd.f32 %v4830_v57, %v4829_v46  ;;  %v4745_v60 = vpop.f32.mrb[23].mxu0  ;;  %v4832_v62 = vpop.f32.mrb[22].mxu1 }
 0x1af   : > { %v4746_v15 = vadd.f32 %v4745_v60, %v4744_v63  ;;  %v4833_v0 = vpop.f32.mrb[23].mxu1 }
 0x1b0   : > { %v4834_v3 = vadd.f32 %v4833_v0, %v4832_v62  ;;  %v6153_v4 = vadd.f32 %v4831_v58, %v4719_v36 }
 0x1b2   : > { %v6155_v5 = vadd.f32 %v4834_v3, %v4722_v8 }
 0x1b3   : > { %v4747_v54 = vpop.f32.mrb[24].mxu0 }
 0x1b4   : > { %v4748_v56 = vpop.f32.mrb[25].mxu0  ;;  %v4835_v42 = vpop.f32.mrb[24].mxu1 }
 0x1b5   : > { %v6157_v49 = vadd.f32 %v4748_v56, %v4747_v54  ;;  %v4750_v9 = vpop.f32.mrb[26].mxu0  ;;  %v4836_v14 = vpop.f32.mrb[25].mxu1 }
 0x1b6   : > { %v4837_v16 = vadd.f32 %v4836_v14, %v4835_v42  ;;  %v4751_v2 = vpop.f32.mrb[27].mxu0  ;;  %v4838_v61 = vpop.f32.mrb[26].mxu1 }
 0x1b7   : > { %v4752_v17 = vadd.f32 %v4751_v2, %v4750_v9  ;;  %v4839_v20 = vpop.f32.mrb[27].mxu1 }
 0x1b8   : > { %v4840_v19 = vadd.f32 %v4839_v20, %v4838_v61  ;;  %v6159_v21 = vadd.f32 %v4837_v16, %v4725_v52 }
 0x1ba   : > { %v6161_v24 = vadd.f32 %v4840_v19, %v4728_v10 }
 0x1bb   : > { %v4753_v36 = vpop.f32.mrb[28].mxu0 }
 0x1bc   : > { %v4754_v8 = vpop.f32.mrb[29].mxu0  ;;  %v4841_v34 = vpop.f32.mrb[28].mxu1 }
 0x1bd   : > { %v6163_v25 = vadd.f32 %v4754_v8, %v4753_v36  ;;  %v4756_v26 = vpop.f32.mrb[30].mxu0  ;;  %v4842_v27 = vpop.f32.mrb[29].mxu1 }
 0x1be   : > { %v4843_v40 = vadd.f32 %v4842_v27, %v4841_v34  ;;  %v4757_v29 = vpop.f32.mrb[31].mxu0  ;;  %v4844_v35 = vpop.f32.mrb[30].mxu1 }
 0x1bf   : > { %v4758_v37 = vadd.f32 %v4757_v29, %v4756_v26  ;;  %v4845_v59 = vpop.f32.mrb[31].mxu1 }
 0x1c0   : > { %v4846_v39 = vadd.f32 %v4845_v59, %v4844_v35  ;;  %v6166_v7 = vadd.f32 %v4843_v40, %v6139_v31 }
 0x1c2   : > { %v6168_v52 = vadd.f32 %v4846_v39, %v4734_v32 }
 0x1c3   : > { %v4759_v10 = vpop.f32.mrb[32].mxu0 }
 0x1c4   : > { %v4760_v43 = vpop.f32.mrb[33].mxu0  ;;  %v4847_v30 = vpop.f32.mrb[32].mxu1 }
 0x1c5   : > { %v6170_v44 = vadd.f32 %v4760_v43, %v4759_v10  ;;  %v4762_v11 = vpop.f32.mrb[34].mxu0  ;;  %v4848_v23 = vpop.f32.mrb[33].mxu1 }
 0x1c6   : > { %v4849_v45 = vadd.f32 %v4848_v23, %v4847_v30  ;;  %v4763_v50 = vpop.f32.mrb[35].mxu0  ;;  %v4850_v51 = vpop.f32.mrb[34].mxu1 }
 0x1c7   : > { %v6172_v46 = vadd.f32 %v4763_v50, %v4762_v11  ;;  %v4851_v63 = vpop.f32.mrb[35].mxu1 }
 0x1c8   : > { %v4852_v57 = vadd.f32 %v4851_v63, %v4850_v51  ;;  %v6175_v58 = vadd.f32 %v4849_v45, %v6145_v41 }
 0x1ca   : > { %v6177_v31 = vadd.f32 %v4852_v57, %v4740_v53 }
 0x1cb   : > { %v4765_v32 = vpop.f32.mrb[36].mxu0 }
 0x1cc   : > { %v4766_v60 = vpop.f32.mrb[37].mxu0  ;;  %v4853_v62 = vpop.f32.mrb[36].mxu1 }
 0x1cd   : > { %v6179_v0 = vadd.f32 %v4766_v60, %v4765_v32  ;;  %v4768_v3 = vpop.f32.mrb[38].mxu0  ;;  %v4854_v54 = vpop.f32.mrb[37].mxu1 }
 0x1ce   : > { %v4855_v56 = vadd.f32 %v4854_v54, %v4853_v62  ;;  %v4769_v42 = vpop.f32.mrb[39].mxu0  ;;  %v4856_v9 = vpop.f32.mrb[38].mxu1 }
 0x1cf   : > { %v6181_v14 = vadd.f32 %v4769_v42, %v4768_v3  ;;  %v4857_v16 = vpop.f32.mrb[39].mxu1 }
 0x1d0   : > { %v4858_v2 = vadd.f32 %v4857_v16, %v4856_v9  ;;  %v6184_v61 = vadd.f32 %v4855_v56, %v6151_v55 }
 0x1d2   : > { %v6186_v41 = vadd.f32 %v4858_v2, %v4746_v15 }
 0x1d3   : > { %v4771_v53 = vpop.f32.mrb[40].mxu0 }
 0x1d4   : > { %v4772_v20 = vpop.f32.mrb[41].mxu0  ;;  %v4859_v19 = vpop.f32.mrb[40].mxu1 }
 0x1d5   : > { %v6188_v36 = vadd.f32 %v4772_v20, %v4771_v53  ;;  %v4774_v8 = vpop.f32.mrb[42].mxu0  ;;  %v4860_v34 = vpop.f32.mrb[41].mxu1 }
 0x1d6   : > { %v4861_v26 = vadd.f32 %v4860_v34, %v4859_v19  ;;  %v4775_v27 = vpop.f32.mrb[43].mxu0  ;;  %v4862_v40 = vpop.f32.mrb[42].mxu1 }
 0x1d7   : > { %v6190_v29 = vadd.f32 %v4775_v27, %v4774_v8  ;;  %v4863_v35 = vpop.f32.mrb[43].mxu1 }
 0x1d8   : > { %v4864_v59 = vadd.f32 %v4863_v35, %v4862_v40  ;;  %v6193_v39 = vadd.f32 %v4861_v26, %v6157_v49 }
 0x1da   : > { %v6195_v55 = vadd.f32 %v4864_v59, %v4752_v17 }
 0x1db   : > { %v4777_v15 = vpop.f32.mrb[44].mxu0 }
 0x1dc   : > { %v4778_v10 = vpop.f32.mrb[45].mxu0  ;;  %v4865_v43 = vpop.f32.mrb[44].mxu1 }
 0x1dd   : > { %v6197_v30 = vadd.f32 %v4778_v10, %v4777_v15  ;;  %v4780_v11 = vpop.f32.mrb[46].mxu0  ;;  %v4866_v23 = vpop.f32.mrb[45].mxu1 }
 0x1de   : > { %v4867_v45 = vadd.f32 %v4866_v23, %v4865_v43  ;;  %v4781_v50 = vpop.f32.mrb[47].mxu0  ;;  %v4868_v51 = vpop.f32.mrb[46].mxu1 }
 0x1df   : > { %v6199_v63 = vadd.f32 %v4781_v50, %v4780_v11  ;;  %v4869_v57 = vpop.f32.mrb[47].mxu1 }
 0x1e0   : > { %v4870_v32 = vadd.f32 %v4869_v57, %v4868_v51  ;;  %v6202_v49 = vadd.f32 %v4867_v45, %v6163_v25 }
 0x1e2   : > { %v6204_v17 = vadd.f32 %v4870_v32, %v4758_v37 }
 0x1e3   : > { %v5193_v60 = vpop.f32.mrb[48].mxu0 }
 0x1e4   : > { %v1779_v62 = vadd.f32 %v5193_v60, %v6153_v4  ;;  %v4871_v3 = vpop.f32.mrb[48].mxu1  ;;  %v1770_v54 = vpop.f32.mrb[49].mxu0 }
 0x1e5   : > { %v1771_v56 = vadd.f32 %v1770_v54, %v6147_v47  ;;  %v4872_v42 = vpop.f32.mrb[49].mxu1  ;;  %v5194_v9 = vpop.f32.mrb[50].mxu0 }
 0x1e6   : > { %1900 = vst.msk [vmem:[%s6210_s22 + $0x10] sm:$0xff] %vm33_vm0, %v1779_v62  ;;  %v4873_v25 = vadd.f32 %v4872_v42, %v4871_v3  ;;  %v1782_v37 = vadd.f32 %v5194_v9, %v6155_v5  ;;  %v4874_v16 = vpop.f32.mrb[50].mxu1  ;;  %v1773_v4 = vpop.f32.mrb[51].mxu0  ;;  %v2005_v20 = vmul.f32 %v1779_v62, %v1779_v62 }
 0x1e7   : > { %1898 = vst.msk [vmem:[%s6210_s22] sm:$0xff] %vm33_vm0, %v1771_v56  ;;  %v2003_v2 = vmul.f32 %v1771_v56, %v1771_v56  ;;  %v1774_v47 = vadd.f32 %v1773_v4, %v6149_v48  ;;  %v4875_v53 = vpop.f32.mrb[51].mxu1  ;;  %v1931_v8 = vsel %vm33_vm0, %v1771_v56, 0.0  ;;  %v1934_v48 = vsel %vm33_vm0, %v1779_v62, 0.0 }
 0x1e8   : > { %1901 = vst.msk [vmem:[%s6210_s22 + $0x18] sm:$0xff] %vm33_vm0, %v1782_v37  ;;  %v4876_v19 = vadd.f32 %v4875_v53, %v4874_v16  ;;  %v6225_v5 = vadd.f32 %v4873_v25, %v6170_v44  ;;  %v2006_v27 = vmul.f32 %v1782_v37, %v1782_v37  ;;  %v2038_v50 = vsel %vm33_vm0, %v2005_v20, 0.0 }
 0x1e9   : > { %1899 = vst.msk [vmem:[%s6210_s22 + $0x8] sm:$0xff] %vm33_vm0, %v1774_v47  ;;  %v1932_v34 = vsel %vm33_vm0, %v1774_v47, 0.0  ;;  %v2004_v26 = vmul.f32 %v1774_v47, %v1774_v47  ;;  %v2035_v59 = vsel %vm33_vm0, %v2003_v2, 0.0 }
 0x1ea   : > { %v1933_v40 = vadd.f32 %v1932_v34, %v1931_v8  ;;  %v6228_v35 = vadd.f32 %v4876_v19, %v6172_v46  ;;  %v1936_v46 = vsel %vm33_vm0, %v1782_v37, 0.0  ;;  %v2040_v60 = vsel %vm33_vm0, %v2006_v27, 0.0 }
 0x1eb   : > { %v2036_v15 = vsel %vm33_vm0, %v2004_v26, 0.0  ;;  %v5197_v10 = vpop.f32.mrb[52].mxu0 }
 0x1ec   : > { %v1935_v43 = vadd.f32 %v1934_v48, %v1933_v40  ;;  %v2037_v11 = vadd.f32 %v2036_v15, %v2035_v59  ;;  %v1795_v23 = vadd.f32 %v5197_v10, %v6166_v7  ;;  %v4877_v44 = vpop.f32.mrb[52].mxu1  ;;  %v1786_v45 = vpop.f32.mrb[53].mxu0 }
 0x1ed   : > { %v1787_v51 = vadd.f32 %v1786_v45, %v6159_v21  ;;  %v4878_v57 = vpop.f32.mrb[53].mxu1  ;;  %v5198_v32 = vpop.f32.mrb[54].mxu0 }
 0x1ee   : > { %v2039_v62 = vadd.f32 %v2038_v50, %v2037_v11  ;;  %1904 = vst.msk [vmem:[%s6210_s22 + $0x30] sm:$0xff] %vm33_vm0, %v1795_v23  ;;  %v1937_v3 = vadd.f32 %v1936_v46, %v1935_v43  ;;  %v4880_v54 = vpop.f32.mrb[54].mxu1  ;;  %v1789_v7 = vpop.f32.mrb[55].mxu0  ;;  %v4879_v9 = vadd.f32 %v4878_v57, %v4877_v44  ;;  %v1798_v21 = vadd.f32 %v5198_v32, %v6168_v52 }
 0x1ef   : > { %1902 = vst.msk [vmem:[%s6210_s22 + $0x20] sm:$0xff] %vm33_vm0, %v1787_v51  ;;  %v1938_v56 = vsel %vm33_vm0, %v1787_v51, 0.0  ;;  %v2007_v42 = vmul.f32 %v1787_v51, %v1787_v51  ;;  %v4881_v25 = vpop.f32.mrb[55].mxu1  ;;  %v1790_v4 = vadd.f32 %v1789_v7, %v6161_v24  ;;  %v2009_v2 = vmul.f32 %v1795_v23, %v1795_v23 }
 0x1f0   : > { %v1939_v37 = vadd.f32 %v1938_v56, %v1937_v3  ;;  %v2041_v16 = vadd.f32 %v2040_v60, %v2039_v62  ;;  %1905 = vst.msk [vmem:[%s6210_s22 + $0x38] sm:$0xff] %vm33_vm0, %v1798_v21  ;;  %v4882_v53 = vadd.f32 %v4881_v25, %v4880_v54  ;;  %v6252_v34 = vadd.f32 %v4879_v9, %v6179_v0 }
 0x1f1   : > { %v2042_v47 = vsel %vm33_vm0, %v2007_v42, 0.0  ;;  %1903 = vst.msk [vmem:[%s6210_s22 + $0x28] sm:$0xff] %vm33_vm0, %v1790_v4  ;;  %v1940_v19 = vsel %vm33_vm0, %v1790_v4, 0.0  ;;  %v2008_v8 = vmul.f32 %v1790_v4, %v1790_v4  ;;  %v1942_v27 = vsel %vm33_vm0, %v1795_v23, 0.0 }
 0x1f2   : > { %v2043_v20 = vadd.f32 %v2042_v47, %v2041_v16  ;;  %v1941_v52 = vadd.f32 %v1940_v19, %v1939_v37  ;;  %v6255_v24 = vadd.f32 %v4882_v53, %v6181_v14  ;;  %v2010_v40 = vmul.f32 %v1798_v21, %v1798_v21 }
 0x1f3   : > { %v5201_v26 = vpop.f32.mrb[56].mxu0  ;;  %v2044_v48 = vsel %vm33_vm0, %v2008_v8, 0.0  ;;  %v2046_v14 = vsel %vm33_vm0, %v2009_v2, 0.0  ;;  %v1944_v50 = vsel %vm33_vm0, %v1798_v21, 0.0 }
 0x1f4   : > { %v1811_v59 = vadd.f32 %v5201_v26, %v6184_v61  ;;  %v4883_v15 = vpop.f32.mrb[56].mxu1  ;;  %v1802_v10 = vpop.f32.mrb[57].mxu0  ;;  %v1943_v43 = vadd.f32 %v1942_v27, %v1941_v52  ;;  %v2045_v11 = vadd.f32 %v2044_v48, %v2043_v20  ;;  %v2048_v3 = vsel %vm33_vm0, %v2010_v40, 0.0 }
 0x1f5   : > { %v1803_v0 = vadd.f32 %v1802_v10, %v6175_v58  ;;  %v4884_v44 = vpop.f32.mrb[57].mxu1  ;;  %v5202_v45 = vpop.f32.mrb[58].mxu0 }
 0x1f6   : > { %1908 = vst.msk [vmem:[%s6210_s22 + $0x50] sm:$0xff] %vm33_vm0, %v1811_v59  ;;  %v4885_v23 = vadd.f32 %v4884_v44, %v4883_v15  ;;  %v1814_v46 = vadd.f32 %v5202_v45, %v6186_v41  ;;  %v4886_v61 = vpop.f32.mrb[58].mxu1  ;;  %v1805_v51 = vpop.f32.mrb[59].mxu0  ;;  %v2047_v57 = vadd.f32 %v2046_v14, %v2045_v11  ;;  %v1945_v32 = vadd.f32 %v1944_v50, %v1943_v43 }
 0x1f7   : > { %1906 = vst.msk [vmem:[%s6210_s22 + $0x40] sm:$0xff] %vm33_vm0, %v1803_v0  ;;  %v1946_v58 = vsel %vm33_vm0, %v1803_v0, 0.0  ;;  %v2011_v60 = vmul.f32 %v1803_v0, %v1803_v0  ;;  %v4887_v62 = vpop.f32.mrb[59].mxu1  ;;  %v1806_v54 = vadd.f32 %v1805_v51, %v6177_v31  ;;  %v2013_v9 = vmul.f32 %v1811_v59, %v1811_v59 }
 0x1f8   : > { %1909 = vst.msk [vmem:[%s6210_s22 + $0x58] sm:$0xff] %vm33_vm0, %v1814_v46  ;;  %v1947_v7 = vadd.f32 %v1946_v58, %v1945_v32  ;;  %v2049_v56 = vadd.f32 %v2048_v3, %v2047_v57  ;;  %v4888_v42 = vadd.f32 %v4887_v62, %v4886_v61  ;;  %v6278_v37 = vadd.f32 %v4885_v23, %v6188_v36 }
 0x1f9   : > { %v2050_v41 = vsel %vm33_vm0, %v2011_v60, 0.0  ;;  %1907 = vst.msk [vmem:[%s6210_s22 + $0x48] sm:$0xff] %vm33_vm0, %v1806_v54  ;;  %v1948_v21 = vsel %vm33_vm0, %v1806_v54, 0.0  ;;  %v2012_v25 = vmul.f32 %v1806_v54, %v1806_v54  ;;  %v1950_v47 = vsel %vm33_vm0, %v1811_v59, 0.0 }
 0x1fa   : > { %v2051_v16 = vadd.f32 %v2050_v41, %v2049_v56  ;;  %v1949_v4 = vadd.f32 %v1948_v21, %v1947_v7  ;;  %v6281_v31 = vadd.f32 %v4888_v42, %v6190_v29  ;;  %v2014_v53 = vmul.f32 %v1814_v46, %v1814_v46 }
 0x1fb   : > { %v5205_v2 = vpop.f32.mrb[60].mxu0  ;;  %v2052_v20 = vsel %vm33_vm0, %v2012_v25, 0.0  ;;  %v2054_v29 = vsel %vm33_vm0, %v2013_v9, 0.0  ;;  %v1952_v15 = vsel %vm33_vm0, %v1814_v46, 0.0 }
 0x1fc   : > { %v1827_v19 = vadd.f32 %v5205_v2, %v6202_v49  ;;  %v4889_v8 = vpop.f32.mrb[60].mxu1  ;;  %v1818_v52 = vpop.f32.mrb[61].mxu0  ;;  %v1951_v26 = vadd.f32 %v1950_v47, %v1949_v4  ;;  %v2053_v36 = vadd.f32 %v2052_v20, %v2051_v16  ;;  %v2056_v14 = vsel %vm33_vm0, %v2014_v53, 0.0 }
 0x1fd   : > { %v1819_v27 = vadd.f32 %v1818_v52, %v6193_v39  ;;  %v4890_v40 = vpop.f32.mrb[61].mxu1  ;;  %v5206_v48 = vpop.f32.mrb[62].mxu0 }
 0x1fe   : > { %1912 = vst.msk [vmem:[%s6210_s22 + $0x70] sm:$0xff] %vm33_vm0, %v1827_v19  ;;  %v4891_v59 = vadd.f32 %v4890_v40, %v4889_v8  ;;  %v1830_v10 = vadd.f32 %v5206_v48, %v6204_v17  ;;  %v4892_v49 = vpop.f32.mrb[62].mxu1  ;;  %v1821_v43 = vpop.f32.mrb[63].mxu0  ;;  %v2055_v11 = vadd.f32 %v2054_v29, %v2053_v36  ;;  %v1953_v0 = vadd.f32 %v1952_v15, %v1951_v26 }
 0x1ff   : > { %1910 = vst.msk [vmem:[%s6210_s22 + $0x60] sm:$0xff] %vm33_vm0, %v1819_v27  ;;  %v1954_v39 = vsel %vm33_vm0, %v1819_v27, 0.0  ;;  %v2015_v44 = vmul.f32 %v1819_v27, %v1819_v27  ;;  %v4893_v45 = vpop.f32.mrb[63].mxu1  ;;  %v1822_v50 = vadd.f32 %v1821_v43, %v6195_v55  ;;  %v2017_v51 = vmul.f32 %v1827_v19, %v1827_v19 }
 0x200   : > { %1913 = vst.msk [vmem:[%s6210_s22 + $0x78] sm:$0xff] %vm33_vm0, %v1830_v10  ;;  %v1955_v23 = vadd.f32 %v1954_v39, %v1953_v0  ;;  %v2057_v46 = vadd.f32 %v2056_v14, %v2055_v11  ;;  %v4894_v61 = vadd.f32 %v4893_v45, %v4892_v49  ;;  %v1698_v58 = vadd.f32 %v4891_v59, %v6197_v30 }
 0x201   : > { %v2058_v17 = vsel %vm33_vm0, %v2015_v44, 0.0  ;;  %1911 = vst.msk [vmem:[%s6210_s22 + $0x68] sm:$0xff] %vm33_vm0, %v1822_v50  ;;  %v1956_v57 = vsel %vm33_vm0, %v1822_v50, 0.0  ;;  %v2016_v32 = vmul.f32 %v1822_v50, %v1822_v50  ;;  %v1958_v55 = vsel %vm33_vm0, %v1827_v19, 0.0 }
 0x202   : > { %v2059_v60 = vadd.f32 %v2058_v17, %v2057_v46  ;;  %v1957_v62 = vadd.f32 %v1956_v57, %v1955_v23  ;;  %v1701_v54 = vadd.f32 %v4894_v61, %v6199_v63  ;;  %v2018_v7 = vmul.f32 %v1830_v10, %v1830_v10 }
 0x203   : > { %v5209_v3 = vpop.f32.mrb[64].mxu0  ;;  %v2060_v56 = vsel %vm33_vm0, %v2016_v32, 0.0  ;;  %v2062_v2 = vsel %vm33_vm0, %v2017_v51, 0.0  ;;  %v1960_v63 = vsel %vm33_vm0, %v1830_v10, 0.0 }
 0x204   : > { %v1843_v41 = vadd.f32 %v5209_v3, %v6252_v34  ;;  %v4895_v42 = vpop.f32.mrb[64].mxu1  ;;  %v1834_v9 = vpop.f32.mrb[65].mxu0  ;;  %v1959_v21 = vadd.f32 %v1958_v55, %v1957_v62  ;;  %v2061_v25 = vadd.f32 %v2060_v56, %v2059_v60  ;;  %v2064_v36 = vsel %vm33_vm0, %v2018_v7, 0.0 }
 0x205   : > { %v1835_v30 = vadd.f32 %v1834_v9, %v6225_v5  ;;  %v4896_v16 = vpop.f32.mrb[65].mxu1  ;;  %v5210_v4 = vpop.f32.mrb[66].mxu0 }
 0x206   : > { %1916 = vst.msk [vmem:[%s6210_s22 + $0x90] sm:$0xff] %vm33_vm0, %v1843_v41  ;;  %v4897_v47 = vadd.f32 %v4896_v16, %v4895_v42  ;;  %v1846_v53 = vadd.f32 %v5210_v4, %v6255_v24  ;;  %v4898_v34 = vpop.f32.mrb[66].mxu1  ;;  %v1837_v20 = vpop.f32.mrb[67].mxu0  ;;  %v2063_v19 = vadd.f32 %v2062_v2, %v2061_v25  ;;  %v1961_v8 = vadd.f32 %v1960_v63, %v1959_v21 }
 0x207   : > { %1914 = vst.msk [vmem:[%s6210_s22 + $0x80] sm:$0xff] %vm33_vm0, %v1835_v30  ;;  %v1962_v5 = vsel %vm33_vm0, %v1835_v30, 0.0  ;;  %v2019_v52 = vmul.f32 %v1835_v30, %v1835_v30  ;;  %v4899_v26 = vpop.f32.mrb[67].mxu1  ;;  %v1838_v27 = vadd.f32 %v1837_v20, %v6228_v35  ;;  %v2021_v15 = vmul.f32 %v1843_v41, %v1843_v41 }
 0x208   : > { %1917 = vst.msk [vmem:[%s6210_s22 + $0x98] sm:$0xff] %vm33_vm0, %v1846_v53  ;;  %v1963_v40 = vadd.f32 %v1962_v5, %v1961_v8  ;;  %v2065_v48 = vadd.f32 %v2064_v36, %v2063_v19  ;;  %v4900_v29 = vadd.f32 %v4899_v26, %v4898_v34  ;;  %v1706_v49 = vadd.f32 %v4897_v47, %v6127_v38 }
 0x209   : > { %v2066_v24 = vsel %vm33_vm0, %v2019_v52, 0.0  ;;  %1915 = vst.msk [vmem:[%s6210_s22 + $0x88] sm:$0xff] %vm33_vm0, %v1838_v27  ;;  %v1964_v59 = vsel %vm33_vm0, %v1838_v27, 0.0  ;;  %v2020_v10 = vmul.f32 %v1838_v27, %v1838_v27  ;;  %v1966_v35 = vsel %vm33_vm0, %v1843_v41, 0.0 }
 0x20a   : > { %v2067_v43 = vadd.f32 %v2066_v24, %v2065_v48  ;;  %v1965_v11 = vadd.f32 %v1964_v59, %v1963_v40  ;;  %v6327_v39 = vadd.f32 %v4900_v29, %v6129_v13  ;;  %v2022_v44 = vmul.f32 %v1846_v53, %v1846_v53 }
 0x20b   : > { %v5213_v0 = vpop.f32.mrb[68].mxu0  ;;  %v2068_v45 = vsel %vm33_vm0, %v2020_v10, 0.0  ;;  %v2070_v57 = vsel %vm33_vm0, %v2021_v15, 0.0  ;;  %v1968_v13 = vsel %vm33_vm0, %v1846_v53, 0.0 }
 0x20c   : > { %v1859_v14 = vadd.f32 %v5213_v0, %v1698_v58  ;;  %v4901_v50 = vpop.f32.mrb[68].mxu1  ;;  %v1850_v23 = vpop.f32.mrb[69].mxu0  ;;  %v1967_v46 = vadd.f32 %v1966_v35, %v1965_v11  ;;  %v2069_v17 = vadd.f32 %v2068_v45, %v2067_v43  ;;  %v2072_v41 = vsel %vm33_vm0, %v2022_v44, 0.0 }
 0x20d   : > { %v1851_v38 = vadd.f32 %v1850_v23, %v6278_v37  ;;  %v4902_v61 = vpop.f32.mrb[69].mxu1  ;;  %v5214_v51 = vpop.f32.mrb[70].mxu0 }
 0x20e   : > { %1920 = vst.msk [vmem:[%s6210_s22 + $0xb0] sm:$0xff] %vm33_vm0, %v1859_v14  ;;  %v4903_v32 = vadd.f32 %v4902_v61, %v4901_v50  ;;  %v1862_v60 = vadd.f32 %v5214_v51, %v1701_v54  ;;  %v4904_v62 = vpop.f32.mrb[70].mxu1  ;;  %v1853_v58 = vpop.f32.mrb[71].mxu0  ;;  %v2071_v3 = vadd.f32 %v2070_v57, %v2069_v17  ;;  %v1969_v55 = vadd.f32 %v1968_v13, %v1967_v46 }
 0x20f   : > { %1918 = vst.msk [vmem:[%s6210_s22 + $0xa0] sm:$0xff] %vm33_vm0, %v1851_v38  ;;  %v1970_v37 = vsel %vm33_vm0, %v1851_v38, 0.0  ;;  %v2023_v7 = vmul.f32 %v1851_v38, %v1851_v38  ;;  %v4905_v56 = vpop.f32.mrb[71].mxu1  ;;  %v1854_v42 = vadd.f32 %v1853_v58, %v6281_v31  ;;  %v2025_v30 = vmul.f32 %v1859_v14, %v1859_v14 }
 0x210   : > { %1921 = vst.msk [vmem:[%s6210_s22 + $0xb8] sm:$0xff] %vm33_vm0, %v1862_v60  ;;  %v1971_v9 = vadd.f32 %v1970_v37, %v1969_v55  ;;  %v2073_v21 = vadd.f32 %v2072_v41, %v2071_v3  ;;  %v4906_v25 = vadd.f32 %v4905_v56, %v4904_v62  ;;  %v1714_v2 = vadd.f32 %v4903_v32, %v6131_v6 }
 0x211   : > { %v2074_v54 = vsel %vm33_vm0, %v2023_v7, 0.0  ;;  %1919 = vst.msk [vmem:[%s6210_s22 + $0xa8] sm:$0xff] %vm33_vm0, %v1854_v42  ;;  %v1972_v16 = vsel %vm33_vm0, %v1854_v42, 0.0  ;;  %v2024_v4 = vmul.f32 %v1854_v42, %v1854_v42  ;;  %v1974_v31 = vsel %vm33_vm0, %v1859_v14, 0.0 }
 0x212   : > { %v2075_v63 = vadd.f32 %v2074_v54, %v2073_v21  ;;  %v1973_v47 = vadd.f32 %v1972_v16, %v1971_v9  ;;  %v1717_v34 = vadd.f32 %v4906_v25, %v6133_v12  ;;  %v2026_v20 = vmul.f32 %v1862_v60, %v1862_v60 }
 0x213   : > { %v5217_v53 = vpop.f32.mrb[72].mxu0  ;;  %v2076_v19 = vsel %vm33_vm0, %v2024_v4, 0.0  ;;  %v2078_v48 = vsel %vm33_vm0, %v2025_v30, 0.0  ;;  %v1976_v24 = vsel %vm33_vm0, %v1862_v60, 0.0 }
 0x214   : > { %v1875_v8 = vadd.f32 %v5217_v53, %v1714_v2  ;;  %v4907_v5 = vpop.f32.mrb[72].mxu1  ;;  %v1866_v52 = vpop.f32.mrb[73].mxu0  ;;  %v1975_v26 = vadd.f32 %v1974_v31, %v1973_v47  ;;  %v2077_v36 = vadd.f32 %v2076_v19, %v2075_v63  ;;  %v2080_v35 = vsel %vm33_vm0, %v2026_v20, 0.0 }
 0x215   : > { %v1867_v27 = vadd.f32 %v1866_v52, %v1706_v49  ;;  %v4908_v40 = vpop.f32.mrb[73].mxu1  ;;  %v5218_v6 = vpop.f32.mrb[74].mxu0 }
 0x216   : > { %1924 = vst.msk [vmem:[%s6210_s22 + $0xd0] sm:$0xff] %vm33_vm0, %v1875_v8  ;;  %v4909_v12 = vadd.f32 %v4908_v40, %v4907_v5  ;;  %v1878_v29 = vadd.f32 %v5218_v6, %v1717_v34  ;;  %v4910_v15 = vpop.f32.mrb[74].mxu1  ;;  %v1869_v59 = vpop.f32.mrb[75].mxu0  ;;  %v2079_v10 = vadd.f32 %v2078_v48, %v2077_v36  ;;  %v1977_v43 = vadd.f32 %v1976_v24, %v1975_v26 }
 0x217   : > { %1922 = vst.msk [vmem:[%s6210_s22 + $0xc0] sm:$0xff] %vm33_vm0, %v1867_v27  ;;  %v1978_v49 = vsel %vm33_vm0, %v1867_v27, 0.0  ;;  %v2027_v11 = vmul.f32 %v1867_v27, %v1867_v27  ;;  %v4911_v0 = vpop.f32.mrb[75].mxu1  ;;  %v1870_v44 = vadd.f32 %v1869_v59, %v6327_v39  ;;  %v2029_v46 = vmul.f32 %v1875_v8, %v1875_v8 }
 0x218   : > { %1925 = vst.msk [vmem:[%s6210_s22 + $0xd8] sm:$0xff] %vm33_vm0, %v1878_v29  ;;  %v1979_v45 = vadd.f32 %v1978_v49, %v1977_v43  ;;  %v2081_v14 = vadd.f32 %v2080_v35, %v2079_v10  ;;  %v4912_v23 = vadd.f32 %v4911_v0, %v4910_v15  ;;  %v1722_v61 = vadd.f32 %v4909_v12, %v6135_v18 }
 0x219   : > { %v2082_v50 = vsel %vm33_vm0, %v2027_v11, 0.0  ;;  %1923 = vst.msk [vmem:[%s6210_s22 + $0xc8] sm:$0xff] %vm33_vm0, %v1870_v44  ;;  %v1980_v17 = vsel %vm33_vm0, %v1870_v44, 0.0  ;;  %v2028_v38 = vmul.f32 %v1870_v44, %v1870_v44  ;;  %v1982_v39 = vsel %vm33_vm0, %v1875_v8, 0.0 }
 0x21a   : > { %v2083_v51 = vadd.f32 %v2082_v50, %v2081_v14  ;;  %v1981_v57 = vadd.f32 %v1980_v17, %v1979_v45  ;;  %v1725_v32 = vadd.f32 %v4912_v23, %v6137_v22  ;;  %v2030_v60 = vmul.f32 %v1878_v29, %v1878_v29 }
 0x21b   : > { %v5221_v13 = vpop.f32.mrb[76].mxu0  ;;  %v2084_v62 = vsel %vm33_vm0, %v2028_v38, 0.0  ;;  %v2086_v18 = vsel %vm33_vm0, %v2029_v46, 0.0  ;;  %v1984_v42 = vsel %vm33_vm0, %v1878_v29, 0.0  ;;  %v1930_v46 = vld [vmem:[#allocation5] sm:$0x1] }
 0x21c   : > { %v4913_v58 = vpop.f32.mrb[76].mxu1  ;;  %v1882_v3 = vpop.f32.mrb[77].mxu0  ;;  %v1983_v55 = vadd.f32 %v1982_v39, %v1981_v57  ;;  %v2085_v37 = vadd.f32 %v2084_v62, %v2083_v51  ;;  %v2088_v2 = vsel %vm33_vm0, %v2030_v60, 0.0 }
 0x21d   : > { %v1883_v7 = vadd.f32 %v1882_v3, %v1722_v61  ;;  %v4914_v56 = vpop.f32.mrb[77].mxu1  ;;  %v5222_v41 = vpop.f32.mrb[78].mxu0  ;;  %v2002_v61 = vld [vmem:[#allocation6] sm:$0x1] }
 0x21e   : > { %v4915_v9 = vadd.f32 %v4914_v56, %v4913_v58  ;;  %v4916_v21 = vpop.f32.mrb[78].mxu1  ;;  %v1885_v22 = vpop.f32.mrb[79].mxu0  ;;  %v2087_v54 = vadd.f32 %v2086_v18, %v2085_v37  ;;  %v1985_v25 = vadd.f32 %v1984_v42, %v1983_v55  ;;  %v2112_v37 = vld [vmem:[%s7780_s2] sm:$0x1] (%p93_p0) }
 0x21f   : > { %1926 = vst.msk [vmem:[%s6210_s22 + $0xe0] sm:$0xff] %vm33_vm0, %v1883_v7  ;;  %v1986_v30 = vsel %vm33_vm0, %v1883_v7, 0.0  ;;  %v2031_v16 = vmul.f32 %v1883_v7, %v1883_v7  ;;  %v4917_v4 = vpop.f32.mrb[79].mxu1  ;;  %v1886_v47 = vadd.f32 %v1885_v22, %v1725_v32 }
 0x220   : > { %v1730_v63 = vadd.f32 %v4915_v9, %v6141_v28  ;;  %v4918_v53 = vadd.f32 %v4917_v4, %v4916_v21  ;;  %v1987_v34 = vadd.f32 %v1986_v30, %v1985_v25  ;;  %v2089_v31 = vadd.f32 %v2088_v2, %v2087_v54 }
 0x221   : > { %v2090_v20 = vsel %vm33_vm0, %v2031_v16, 0.0  ;;  %1927 = vst.msk [vmem:[%s6210_s22 + $0xe8] sm:$0xff] %vm33_vm0, %v1886_v47  ;;  %v1988_v8 = vsel %vm33_vm0, %v1886_v47, 0.0  ;;  %v2032_v5 = vmul.f32 %v1886_v47, %v1886_v47 }
 0x222   : > { %v1891_v19 = vadd.f32 %v5221_v13, %v1730_v63  ;;  %v1733_v52 = vadd.f32 %v4918_v53, %v6143_v33  ;;  %v2091_v26 = vadd.f32 %v2090_v20, %v2089_v31  ;;  %v1989_v36 = vadd.f32 %v1988_v8, %v1987_v34 }
 0x223   : > { %v2092_v40 = vsel %vm33_vm0, %v2032_v5, 0.0 }
 0x224   : > { %1928 = vst.msk [vmem:[%s6210_s22 + $0xf0] sm:$0xff] %vm33_vm0, %v1891_v19  ;;  %v2033_v28 = vmul.f32 %v1891_v19, %v1891_v19  ;;  %v1990_v27 = vsel %vm33_vm0, %v1891_v19, 0.0  ;;  %v1894_v6 = vadd.f32 %v5222_v41, %v1733_v52  ;;  %v2093_v24 = vadd.f32 %v2092_v40, %v2091_v26  ;;  %v6408_v41 = vld [vmem:[%s7781_s3] sm:$0x1] (%p93_p0) }
 0x225   : > { %v1991_v48 = vadd.f32 %v1990_v27, %v1989_v36 }
 0x226   : > { %v2094_v12 = vsel %vm33_vm0, %v2033_v28, 0.0  ;;  %1929 = vst.msk [vmem:[%s6210_s22 + $0xf8] sm:$0xff] %vm33_vm0, %v1894_v6  ;;  %v1992_v29 = vsel %vm33_vm0, %v1894_v6, 0.0  ;;  %v2034_v15 = vmul.f32 %v1894_v6, %v1894_v6 }
 0x227   : > { %v2095_v33 = vadd.f32 %v2094_v12, %v2093_v24  ;;  %v1993_v59 = vadd.f32 %v1992_v29, %v1991_v48 }
 0x228   : > { %v2096_v10 = vsel %vm33_vm0, %v2034_v15, 0.0 }
 0x229   : > { %v1994_v43 = vrot.slane %v1993_v59, 4  ;;  %v2097_v49 = vadd.f32 %v2096_v10, %v2095_v33 }
 0x22b   : > { %v1995_v11 = vadd.f32 %v1994_v43, %v1993_v59  ;;  %v2098_v0 = vrot.slane %v2097_v49, 4 }
 0x22d   : > { %v1996_v35 = vrot.slane %v1995_v11, 2  ;;  %v2099_v44 = vadd.f32 %v2098_v0, %v2097_v49 }
 0x22f   : > { %v1997_v45 = vadd.f32 %v1996_v35, %v1995_v11  ;;  %v2100_v14 = vrot.slane %v2099_v44, 2 }
 0x231   : > { %v1998_v50 = vrot.slane %v1997_v45, 1  ;;  %v2101_v23 = vadd.f32 %v2100_v14, %v2099_v44 }
 0x233   : > { %v1999_v17 = vadd.f32 %v1998_v50, %v1997_v45  ;;  %v2102_v38 = vrot.slane %v2101_v23, 1  ;;  %95 = sbr.rel (!%p93_p0) target bundleno = 32 (0x20), region = 83 }
 0x235   : > { %v2000_v51 = vadd.f32 %v1999_v17, %v1930_v46  ;;  %v2103_v57 = vadd.f32 %v2102_v38, %v2101_v23 }
 0x237   : > { %2001 = vst.msk [vmem:[#allocation5] sm:$0x1] %vm7787_vm1, %v2000_v51  ;;  %v2104_v13 = vadd.f32 %v2103_v57, %v2002_v61 }
 0x239   : > { %2105 = vst.msk [vmem:[#allocation6] sm:$0x1] %vm7787_vm1, %v2104_v13 }
 0x23e   :  { %v2106_v32 = vld [vmem:[#allocation5] sm:$0x1] }
 0x23f   :  { %v2107_v60 = vmul.f32 0.001953125, %v2106_v32  ;;  %2119 = vst.msk [vmem:[#allocation5] sm:$0x1] %vm7787_vm1, %v5451_v1 }
 0x240   :  { %v2108_v39 = vld [vmem:[#allocation6] sm:$0x1] }
 0x241   :  { %v2109_v62 = vmul.f32 0.001953125, %v2108_v39  ;;  %2120 = vst.msk [vmem:[#allocation6] sm:$0x1] %vm7787_vm1, %v5451_v1  ;;  %v2110_v58 = vmul.f32 %v2107_v60, %v2107_v60 }
 0x243   :  { %v2111_v3 = vsub.f32 %v2109_v62, %v2110_v58 }
 0x245   :  { %v2113_v55 = vadd.f32 1e-05, %v2111_v3 }
 0x247   :  { %5362 = vrsqrt.f32 %v2113_v55 }
 0x251   :  { %v5363_v7 = vpop.eup %5362 }
 0x252   :  { %v6403_v56 = vmul.f32 %v5363_v7, %v2112_v37 }
 0x254   :  { %v6411_v18 = vmul.f32 %v6403_v56, %v2107_v60 }
 0x256   :  { %v2118_v1 = vsub.f32 %v6408_v41, %v6411_v18 }
 0x257 LB: > { %v4641_v42 = vld [vmem:[#allocation7] ss:$0 sm:$0xff]  ;;  %v5453_v9 = vmov 0   ;;  %v2162_v21 = vlaneseq  ;;  %s4640_s2 = sshll.u32 %s5445_s24, 8  ;;  %v5365_v47 = vld [vmem:[%s7783_s5 + $0x40] sm:$0xff]   ;;  %v5367_v48 = vld [vmem:[%s7783_s5 + $0x48] sm:$0xff]   ;;  %s5445_s24 = sphi %s6415_s24, %s2126_s24  }
 0x258   : > { %5364 = vset.pattern.permute.xlu0 %v5453_v9  ;;  %s6427_s3 = scalar_lea.vmem [#allocation4], %s4640_s2  ;;  %v5366_v53 = vld [vmem:[%s7783_s5] sm:$0xff]   ;;  %4939 = vmatprep.subr.bf16.mxu0 %v5365_v47  ;;  %v5368_v24 = vld [vmem:[%s7783_s5 + $0x8] sm:$0xff]   ;;  %v5369_v13 = vld [vmem:[%s7783_s5 + $0x50] sm:$0xff]   ;;  %s5454_s12 = smov 64  }
 0x259   : > { %2276 = vperm.xlu0 %5364, %v4641_v42   ;;  %v2163_v22 = vshrl.u32 %v2162_v21, 7  ;;  %v2153_v30 = vld [vmem:[%s6427_s3 + $0xc0] sm:$0xff]  ;;  %v2154_v16 = vld [vmem:[%s6427_s3 + $0xc8] sm:$0xff]  ;;  %v2151_v63 = vld [vmem:[%s6427_s3 + $0xb0] sm:$0xff]  ;;  %5279 = vmatprep.subr.bf16.mxu1 %v5365_v47  ;;  %s2126_s24 = sadd.s32 1, %s5445_s24  }
 0x25a   : > { %v2129_v4 = vld [vmem:[%s6427_s3] sm:$0xff]  ;;  %v2130_v2 = vld [vmem:[%s6427_s3 + $0x8] sm:$0xff]  ;;  %v2152_v19 = vld [vmem:[%s6427_s3 + $0xb8] sm:$0xff]  ;;  %4940 = vmatpush3.bf16.msra.mxu0 %v5366_v53  ;;  %5287 = vmatpush3.bf16.msra.mxu1 %v5366_v53  ;;  %p2123_p1 = scmp.ge.s32.totalorder %s2126_s24, 2  }
 0x25b   : > { %v6421_v54 = vsub.s32 0, %v2163_v22  ;;  %v2131_v5 = vld [vmem:[%s6427_s3 + $0x10] sm:$0xff]  ;;  %v2132_v52 = vld [vmem:[%s6427_s3 + $0x18] sm:$0xff]  ;;  %v2157_v6 = vld [vmem:[%s6427_s3 + $0xe0] sm:$0xff]  ;;  %4941 = vmatprep.subr.bf16.mxu0 %v5367_v48  ;;  %5280 = vmatprep.subr.bf16.mxu1 %v5367_v48 }
 0x25c   : > { %v2155_v28 = vld [vmem:[%s6427_s3 + $0xd0] sm:$0xff]  ;;  %v2156_v27 = vld [vmem:[%s6427_s3 + $0xd8] sm:$0xff]  ;;  %v2158_v59 = vld [vmem:[%s6427_s3 + $0xe8] sm:$0xff] }
 0x25d   : > { %v6425_v25 = vrot.slane %v6403_v56, %v6421_v54  ;;  %v6446_v20 = vrot.slane %v2118_v1, %v6421_v54  ;;  %v2133_v10 = vld [vmem:[%s6427_s3 + $0x20] sm:$0xff]  ;;  %v2134_v43 = vld [vmem:[%s6427_s3 + $0x28] sm:$0xff]  ;;  %v2159_v35 = vld [vmem:[%s6427_s3 + $0xf0] sm:$0xff] }
 0x25e   : > { %v2160_v44 = vld [vmem:[%s6427_s3 + $0xf8] sm:$0xff]  ;;  %v2135_v23 = vld [vmem:[%s6427_s3 + $0x30] sm:$0xff]  ;;  %4942 = vmatpush3.bf16.msra.mxu0 %v5368_v24  ;;  %5288 = vmatpush3.bf16.msra.mxu1 %v5368_v24  ;;  %v2137_v57 = vld [vmem:[%s6427_s3 + $0x40] sm:$0xff] }
 0x25f   : > { %v2191_v34 = vmul.f32 %v6425_v25, %v2153_v30  ;;  %v2192_v31 = vmul.f32 %v6425_v25, %v2154_v16  ;;  %v2167_v8 = vmul.f32 %v6425_v25, %v2129_v4  ;;  %v2168_v26 = vmul.f32 %v6425_v25, %v2130_v2  ;;  %v2136_v46 = vld [vmem:[%s6427_s3 + $0x38] sm:$0xff]  ;;  %v5370_v32 = vld [vmem:[%s7783_s5 + $0x10] sm:$0xff]   ;;  %v6504_v39 = vld [vmem:[#allocation2 + $0x1] sm:$0xff]  ;;  %4943 = vmatprep.subr.bf16.mxu0 %v5369_v13 }
 0x260   : > { %v2189_v36 = vmul.f32 %v6425_v25, %v2151_v63  ;;  %v2190_v40 = vmul.f32 %v6425_v25, %v2152_v19  ;;  %v2169_v15 = vmul.f32 %v6425_v25, %v2131_v5  ;;  %v2170_v33 = vmul.f32 %v6425_v25, %v2132_v52  ;;  %v6506_v60 = vld [vmem:[#allocation2 + $0x9] sm:$0xff]  ;;  %5281 = vmatprep.subr.bf16.mxu1 %v5369_v13  ;;  %v2140_v4 = vld [vmem:[%s6427_s3 + $0x58] sm:$0xff]  ;;  %v2141_v2 = vld [vmem:[%s6427_s3 + $0x60] sm:$0xff] }
 0x261   : > { %v6465_v12 = vadd.f32 %v6446_v20, %v2191_v34  ;;  %v6468_v29 = vadd.f32 %v6446_v20, %v2192_v31  ;;  %v6476_v49 = vadd.f32 %v6446_v20, %v2167_v8  ;;  %v2193_v11 = vmul.f32 %v6425_v25, %v2155_v28  ;;  %v2138_v9 = vld [vmem:[%s6427_s3 + $0x48] sm:$0xff]  ;;  %v2139_v21 = vld [vmem:[%s6427_s3 + $0x50] sm:$0xff]  ;;  %v5371_v8 = vld [vmem:[%s7783_s5 + $0x58] sm:$0xff]  }
 0x262   : > { %v2194_v0 = vmul.f32 %v6425_v25, %v2156_v27  ;;  %v6483_v45 = vadd.f32 %v6446_v20, %v2168_v26  ;;  %v6486_v14 = vadd.f32 %v6446_v20, %v2189_v36  ;;  %v2195_v50 = vmul.f32 %v6425_v25, %v2157_v6  ;;  %v2142_v63 = vld [vmem:[%s6427_s3 + $0x68] sm:$0xff]  ;;  %4944 = vmatpush3.bf16.msra.mxu0 %v5370_v32  ;;  %v2143_v19 = vld [vmem:[%s6427_s3 + $0x70] sm:$0xff]  ;;  %v5372_v5 = vld [vmem:[%s7783_s5 + $0x18] sm:$0xff]  }
 0x263   : > { %v6492_v17 = vadd.f32 %v6446_v20, %v2190_v40  ;;  %v2196_v38 = vmul.f32 %v6425_v25, %v2158_v59  ;;  %v2171_v61 = vmul.f32 %v6425_v25, %v2133_v10  ;;  %v2172_v51 = vmul.f32 %v6425_v25, %v2134_v43  ;;  %5289 = vmatpush3.bf16.msra.mxu1 %v5370_v32  ;;  %v2144_v27 = vld [vmem:[%s6427_s3 + $0x78] sm:$0xff]  ;;  %v2145_v40 = vld [vmem:[%s6427_s3 + $0x80] sm:$0xff]  ;;  %v2146_v6 = vld [vmem:[%s6427_s3 + $0x88] sm:$0xff] }
 0x264   : > { %v6509_v62 = vadd.f32 %v6446_v20, %v2169_v15  ;;  %v6512_v58 = vadd.f32 %v6446_v20, %v2170_v33  ;;  %v2197_v3 = vmul.f32 %v6425_v25, %v2159_v35  ;;  %v2198_v55 = vmul.f32 %v6425_v25, %v2160_v44  ;;  %v2147_v33 = vld [vmem:[%s6427_s3 + $0x90] sm:$0xff]  ;;  %v2148_v59 = vld [vmem:[%s6427_s3 + $0x98] sm:$0xff]  ;;  %v2149_v10 = vld [vmem:[%s6427_s3 + $0xa0] sm:$0xff]  ;;  %4945 = vmatprep.subr.bf16.mxu0 %v5371_v8 }
 0x265   : > { %v6517_v37 = vadd.f32 %v6446_v20, %v2193_v11  ;;  %v6520_v7 = vadd.f32 %v6446_v20, %v2194_v0  ;;  %v2173_v42 = vmul.f32 %v6425_v25, %v2135_v23  ;;  %v6526_v22 = vadd.f32 %v6446_v20, %v2195_v50  ;;  %5282 = vmatprep.subr.bf16.mxu1 %v5371_v8 }
 0x266   : > { %v2174_v30 = vmul.f32 %v6425_v25, %v2136_v46  ;;  %v2175_v16 = vmul.f32 %v6425_v25, %v2137_v57  ;;  %v2472_v47 = vpack.c.bf16 %v6506_v60, %v6504_v39  ;;  %v6536_v53 = vadd.f32 %v6446_v20, %v2196_v38  ;;  %4946 = vmatpush3.bf16.msra.mxu0 %v5372_v5  ;;  %v5373_v46 = vld [vmem:[%s7783_s5 + $0x60] sm:$0xff]  }
 0x267   : > { %v6539_v34 = vadd.f32 %v6446_v20, %v2171_v61  ;;  %v6542_v31 = vadd.f32 %v6446_v20, %v2172_v51  ;;  %vm2261_vm3 = vcmp.gt.f32.partialorder %v6465_v12, 0.0  ;;  %vm2262_vm4 = vcmp.gt.f32.partialorder %v6468_v29, 0.0  ;;  %5290 = vmatpush3.bf16.msra.mxu1 %v5372_v5  ;;  %v5374_v38 = vld [vmem:[%s7783_s5 + $0x20] sm:$0xff]   ;;  %4947 = vmatprep.subr.bf16.mxu0 %v5373_v46 }
 0x268   : > { %vm2237_vm5 = vcmp.gt.f32.partialorder %v6476_v49, 0.0  ;;  %vm2238_vm6 = vcmp.gt.f32.partialorder %v6483_v45, 0.0  ;;  %v6556_v52 = vadd.f32 %v6446_v20, %v2197_v3  ;;  %v6559_v26 = vadd.f32 %v6446_v20, %v2198_v55  ;;  %5283 = vmatprep.subr.bf16.mxu1 %v5373_v46 }
 0x269   : > { %v2176_v36 = vmul.f32 %v6425_v25, %v2138_v9  ;;  %v2177_v28 = vmul.f32 %v6425_v25, %v2139_v21  ;;  %vm2259_vm7 = vcmp.gt.f32.partialorder %v6486_v14, 0.0  ;;  %vm2260_vm8 = vcmp.gt.f32.partialorder %v6492_v17, 0.0 }
 0x26a   : > { %vm2239_vm9 = vcmp.gt.f32.partialorder %v6509_v62, 0.0  ;;  %v6570_v48 = vadd.f32 %v6446_v20, %v2173_v42  ;;  %v2178_v24 = vmul.f32 %v6425_v25, %v2140_v4  ;;  %v2179_v15 = vmul.f32 %v6425_v25, %v2141_v2  ;;  %v2150_v42 = vld [vmem:[%s6427_s3 + $0xa8] sm:$0xff]  ;;  %4948 = vmatpush3.bf16.msra.mxu0 %v5374_v38 }
 0x26b   : > { %vm2240_vm10 = vcmp.gt.f32.partialorder %v6512_v58, 0.0  ;;  %v6579_v43 = vadd.f32 %v6446_v20, %v2174_v30  ;;  %v6582_v11 = vadd.f32 %v6446_v20, %v2175_v16  ;;  %v2180_v0 = vmul.f32 %v6425_v25, %v2142_v63  ;;  %5291 = vmatpush3.bf16.msra.mxu1 %v5374_v38  ;;  %v5375_v2 = vld [vmem:[%s7783_s5 + $0x68] sm:$0xff]  }
 0x26c   : > { %v2181_v35 = vmul.f32 %v6425_v25, %v2143_v19  ;;  %v2182_v44 = vmul.f32 %v6425_v25, %v2144_v27  ;;  %v2183_v50 = vmul.f32 %v6425_v25, %v2145_v40  ;;  %v2184_v23 = vmul.f32 %v6425_v25, %v2146_v6  ;;  %4949 = vmatprep.subr.bf16.mxu0 %v5375_v2 }
 0x26d   : > { %vm2263_vm11 = vcmp.gt.f32.partialorder %v6517_v37, 0.0  ;;  %vm2264_vm12 = vcmp.gt.f32.partialorder %v6520_v7, 0.0  ;;  %vm2265_vm13 = vcmp.gt.f32.partialorder %v6526_v22, 0.0  ;;  %v6600_v61 = vadd.f32 %v6446_v20, %v2176_v36  ;;  %5284 = vmatprep.subr.bf16.mxu1 %v5375_v2 }
 0x26e   : > { %v2185_v51 = vmul.f32 %v6425_v25, %v2147_v33  ;;  %v2186_v57 = vmul.f32 %v6425_v25, %v2148_v59  ;;  %v2187_v13 = vmul.f32 %v6425_v25, %v2149_v10  ;;  %v6607_v32 = vadd.f32 %v6446_v20, %v2177_v28  ;;  %v5376_v59 = vld [vmem:[%s7783_s5 + $0x28] sm:$0xff]  }
 0x26f   : > { %v6610_v3 = vadd.f32 %v6446_v20, %v2178_v24  ;;  %v6613_v55 = vadd.f32 %v6446_v20, %v2179_v15  ;;  %v6620_v9 = vadd.f32 %v6446_v20, %v2180_v0  ;;  %v6623_v21 = vadd.f32 %v6446_v20, %v2181_v35  ;;  %4950 = vmatpush3.bf16.msra.mxu0 %v5376_v59 }
 0x270   : > { %v6626_v30 = vadd.f32 %v6446_v20, %v2182_v44  ;;  %v6629_v16 = vadd.f32 %v6446_v20, %v2183_v50  ;;  %v6632_v4 = vadd.f32 %v6446_v20, %v2184_v23  ;;  %v6644_v19 = vadd.f32 %v6446_v20, %v2185_v51  ;;  %v5377_v50 = vld [vmem:[%s7783_s5 + $0x70] sm:$0xff]   ;;  %5292 = vmatpush3.bf16.msra.mxu1 %v5376_v59 }
 0x271   : > { %v6647_v8 = vadd.f32 %v6446_v20, %v2186_v57  ;;  %v6650_v5 = vmul.f32 %v6425_v25, %v2150_v42  ;;  %v6653_v36 = vadd.f32 %v6446_v20, %v2187_v13  ;;  %vm2247_vm15 = vcmp.gt.f32.partialorder %v6607_v32, 0.0  ;;  %4951 = vmatprep.subr.bf16.mxu0 %v5377_v50  ;;  %v5378_v57 = vld [vmem:[%s7783_s5 + $0x30] sm:$0xff]   ;;  %5285 = vmatprep.subr.bf16.mxu1 %v5377_v50 }
 0x272   : > { %vm2248_vm1 = vcmp.gt.f32.partialorder %v6610_v3, 0.0  ;;  %vm2249_vm2 = vcmp.gt.f32.partialorder %v6613_v55, 0.0  ;;  %vm2250_vm14 = vcmp.gt.f32.partialorder %v6620_v9, 0.0 }
 0x273   : > { %4952 = vmatpush3.bf16.msra.mxu0 %v5378_v57 }
 0x274   : > { %5293 = vmatpush3.bf16.msra.mxu1 %v5378_v57 }
 0x2d8   : > { %v6637_v63 = vpop.permute.xlu0 %2276 }
 0x2d9   : > { %v2303_v28 = vmul.f32 %v6637_v63, %v6465_v12  ;;  %v2304_v27 = vmul.f32 %v6637_v63, %v6468_v29  ;;  %v2279_v40 = vmul.f32 %v6637_v63, %v6476_v49  ;;  %v2280_v6 = vmul.f32 %v6637_v63, %v6483_v45 }
 0x2da   : > { %v2301_v25 = vmul.f32 %v6637_v63, %v6486_v14  ;;  %v2302_v24 = vmul.f32 %v6637_v63, %v6492_v17  ;;  %v2281_v15 = vmul.f32 %v6637_v63, %v6509_v62  ;;  %v2282_v33 = vmul.f32 %v6637_v63, %v6512_v58 }
 0x2db   : > { %v2335_v10 = vsel %vm2261_vm3, %v6465_v12, %v2303_v28  ;;  %v2336_v0 = vsel %vm2262_vm4, %v6468_v29, %v2304_v27  ;;  %v2311_v35 = vsel %vm2237_vm5, %v6476_v49, %v2279_v40  ;;  %v2312_v44 = vsel %vm2238_vm6, %v6483_v45, %v2280_v6  ;;  %v5379_v27 = vld [vmem:[%s7783_s5 + $0x78] sm:$0xff]  }
 0x2dc   : > { %2368 = vst.msk [vmem:[#allocation2 + $0x139] sm:$0xff] %vm33_vm0, %v2335_v10  ;;  %2369 = vst.msk [vmem:[#allocation2 + $0x141] sm:$0xff] %vm33_vm0, %v2336_v0  ;;  %v2333_v12 = vsel %vm2259_vm7, %v6486_v14, %v2301_v25  ;;  %v2334_v29 = vsel %vm2260_vm8, %v6492_v17, %v2302_v24  ;;  %v2313_v49 = vsel %vm2239_vm9, %v6509_v62, %v2281_v15  ;;  %vm2251_vm3 = vcmp.gt.f32.partialorder %v6623_v21, 0.0  ;;  %v5380_v15 = vld [vmem:[%s7783_s5 + $0x38] sm:$0xff]  }
 0x2dd   : > { %2344 = vst.msk [vmem:[#allocation2 + $0x19] sm:$0xff] %vm33_vm0, %v2311_v35  ;;  %2345 = vst.msk [vmem:[#allocation2 + $0x21] sm:$0xff] %vm33_vm0, %v2312_v44  ;;  %v2314_v45 = vsel %vm2240_vm10, %v6512_v58, %v2282_v33  ;;  %v2305_v14 = vmul.f32 %v6637_v63, %v6517_v37  ;;  %v2306_v17 = vmul.f32 %v6637_v63, %v6520_v7  ;;  %vm2252_vm4 = vcmp.gt.f32.partialorder %v6626_v30, 0.0 }
 0x2de   : > { %2366 = vst.msk [vmem:[#allocation2 + $0x121] sm:$0xff] %vm33_vm0, %v2333_v12  ;;  %2367 = vst.msk [vmem:[#allocation2 + $0x129] sm:$0xff] %vm33_vm0, %v2334_v29  ;;  %v2307_v62 = vmul.f32 %v6637_v63, %v6526_v22  ;;  %v2308_v58 = vmul.f32 %v6637_v63, %v6536_v53  ;;  %vm2253_vm5 = vcmp.gt.f32.partialorder %v6629_v16, 0.0  ;;  %vm2254_vm6 = vcmp.gt.f32.partialorder %v6632_v4, 0.0  ;;  %4953 = vmatprep.subr.bf16.mxu0 %v5379_v27 }
 0x2df   : > { %2346 = vst.msk [vmem:[#allocation2 + $0x31] sm:$0xff] %vm33_vm0, %v2313_v49  ;;  %2347 = vst.msk [vmem:[#allocation2 + $0x39] sm:$0xff] %vm33_vm0, %v2314_v45  ;;  %v2283_v23 = vmul.f32 %v6637_v63, %v6539_v34  ;;  %v2284_v46 = vmul.f32 %v6637_v63, %v6542_v31  ;;  %v2309_v38 = vmul.f32 %v6637_v63, %v6556_v52  ;;  %vm7789_vm7 = vcmp.gt.f32.partialorder %v6536_v53, 0.0 }
 0x2e0   : > { %v2310_v51 = vmul.f32 %v6637_v63, %v6559_v26  ;;  %v2337_v13 = vsel %vm2263_vm11, %v6517_v37, %v2305_v14  ;;  %v2338_v42 = vsel %vm2264_vm12, %v6520_v7, %v2306_v17  ;;  %v2339_v2 = vsel %vm2265_vm13, %v6526_v22, %v2307_v62  ;;  %5286 = vmatprep.subr.bf16.mxu1 %v5379_v27  ;;  %v2569_v62 = vld [vmem:[#allocation2 + $0x2] sm:$0xff] }
 0x2e1   : > { %v2340_v28 = vsel %vm7789_vm7, %v6536_v53, %v2308_v58  ;;  %2370 = vst.msk [vmem:[#allocation2 + $0x151] sm:$0xff] %vm33_vm0, %v2337_v13  ;;  %2371 = vst.msk [vmem:[#allocation2 + $0x159] sm:$0xff] %vm33_vm0, %v2338_v42  ;;  %vm7790_vm8 = vcmp.gt.f32.partialorder %v6539_v34, 0.0  ;;  %vm7791_vm9 = vcmp.gt.f32.partialorder %v6542_v31, 0.0  ;;  %vm7792_vm10 = vcmp.gt.f32.partialorder %v6556_v52, 0.0  ;;  %4954 = vmatpush3.bf16.msra.mxu0 %v5380_v15  ;;  %5294 = vmatpush3.bf16.msra.mxu1 %v5380_v15  ;;  %v2570_v58 = vld [vmem:[#allocation2 + $0xa] sm:$0xff] }
 0x2e2   : > { %2372 = vst.msk [vmem:[#allocation2 + $0x169] sm:$0xff] %vm33_vm0, %v2339_v2  ;;  %2373 = vst.msk [vmem:[#allocation2 + $0x171] sm:$0xff] %vm33_vm0, %v2340_v28  ;;  %v2315_v37 = vsel %vm7790_vm8, %v6539_v34, %v2283_v23  ;;  %v2316_v7 = vsel %vm7791_vm9, %v6542_v31, %v2284_v46  ;;  %v2341_v22 = vsel %vm7792_vm10, %v6556_v52, %v2309_v38  ;;  %vm7793_vm11 = vcmp.gt.f32.partialorder %v6559_v26, 0.0  ;;  %v2376_v38 = vld [vmem:[#allocation2] sm:$0xff] }
 0x2e3   : > { %v2342_v53 = vsel %vm7793_vm11, %v6559_v26, %v2310_v51  ;;  %2348 = vst.msk [vmem:[#allocation2 + $0x49] sm:$0xff] %vm33_vm0, %v2315_v37  ;;  %2349 = vst.msk [vmem:[#allocation2 + $0x51] sm:$0xff] %vm33_vm0, %v2316_v7  ;;  %v2285_v34 = vmul.f32 %v6637_v63, %v6570_v48  ;;  %v2286_v31 = vmul.f32 %v6637_v63, %v6579_v43  ;;  %v2657_v33 = vld [vmem:[#allocation2 + $0x138] sm:$0xff]  ;;  %v2658_v59 = vld [vmem:[#allocation2 + $0x140] sm:$0xff]  ;;  %vm7794_vm12 = vcmp.gt.f32.partialorder %v6570_v48, 0.0 }
 0x2e4   : > { %2374 = vst.msk [vmem:[#allocation2 + $0x181] sm:$0xff] %vm33_vm0, %v2341_v22  ;;  %2375 = vst.msk [vmem:[#allocation2 + $0x189] sm:$0xff] %vm33_vm0, %v2342_v53  ;;  %v2287_v52 = vmul.f32 %v6637_v63, %v6582_v11  ;;  %v2288_v26 = vmul.f32 %v6637_v63, %v6600_v61  ;;  %v2289_v40 = vmul.f32 %v6637_v63, %v6607_v32  ;;  %v2633_v10 = vld [vmem:[#allocation2 + $0x18] sm:$0xff]  ;;  %vm7795_vm13 = vcmp.gt.f32.partialorder %v6579_v43, 0.0  ;;  %v2634_v29 = vld [vmem:[#allocation2 + $0x20] sm:$0xff] }
 0x2e5   : > { %v2290_v6 = vmul.f32 %v6637_v63, %v6610_v3  ;;  %v2291_v25 = vmul.f32 %v6637_v63, %v6613_v55  ;;  %v2292_v24 = vmul.f32 %v6637_v63, %v6620_v9  ;;  %v2317_v0 = vsel %vm7794_vm12, %v6570_v48, %v2285_v34  ;;  %v2465_v45 = vld [vmem:[#allocation2 + $0x129] sm:$0xff]  ;;  %v2442_v22 = vld [vmem:[#allocation2 + $0x19] sm:$0xff]  ;;  %v2443_v53 = vld [vmem:[#allocation2 + $0x21] sm:$0xff] }
 0x2e6   : > { %v2318_v35 = vsel %vm7795_vm13, %v6579_v43, %v2286_v31  ;;  %vm7796_vm7 = vcmp.gt.f32.partialorder %v6582_v11, 0.0  ;;  %vm7797_vm8 = vcmp.gt.f32.partialorder %v6600_v61, 0.0  ;;  %v2677_v12 = vpack.c.bf16 %v2658_v59, %v2657_v33  ;;  %2350 = vst.msk [vmem:[#allocation2 + $0x61] sm:$0xff] %vm33_vm0, %v2317_v0  ;;  %v2377_v51 = vld [vmem:[#allocation2 + $0x8] sm:$0xff]  ;;  %v2635_v13 = vld [vmem:[#allocation2 + $0x30] sm:$0xff]  ;;  %v2636_v42 = vld [vmem:[#allocation2 + $0x38] sm:$0xff] }
 0x2e7   : > { %v2319_v44 = vsel %vm7796_vm7, %v6582_v11, %v2287_v52  ;;  %v2320_v50 = vsel %vm7797_vm8, %v6600_v61, %v2288_v26  ;;  %2351 = vst.msk [vmem:[#allocation2 + $0x69] sm:$0xff] %vm33_vm0, %v2318_v35  ;;  %v2321_v48 = vsel %vm2247_vm15, %v6607_v32, %v2289_v40  ;;  %v2322_v43 = vsel %vm2248_vm1, %v6610_v3, %v2290_v6  ;;  %v2825_v34 = vld [vmem:[#allocation2 + $0x1a] sm:$0xff]  ;;  %v2826_v52 = vld [vmem:[#allocation2 + $0x22] sm:$0xff]  ;;  %v2827_v26 = vld [vmem:[#allocation2 + $0x32] sm:$0xff] }
 0x2e8   : > { %2352 = vst.msk [vmem:[#allocation2 + $0x79] sm:$0xff] %vm33_vm0, %v2319_v44  ;;  %2353 = vst.msk [vmem:[#allocation2 + $0x81] sm:$0xff] %vm33_vm0, %v2320_v50  ;;  %v2323_v11 = vsel %vm2249_vm2, %v6613_v55, %v2291_v25  ;;  %v2665_v61 = vpack.c.bf16 %v2634_v29, %v2633_v10  ;;  %v2324_v49 = vsel %vm2250_vm14, %v6620_v9, %v2292_v24  ;;  %2721 = vrot.lane.b32.xlu1 %v2677_v12, %s5454_s12  ;;  %v2464_v55 = vld [vmem:[#allocation2 + $0x121] sm:$0xff]  ;;  %v2660_v2 = vld [vmem:[#allocation2 + $0x158] sm:$0xff] }
 0x2e9   : > { %2354 = vst.msk [vmem:[#allocation2 + $0x91] sm:$0xff] %vm33_vm0, %v2321_v48  ;;  %2355 = vst.msk [vmem:[#allocation2 + $0x99] sm:$0xff] %vm33_vm0, %v2322_v43  ;;  %v2293_v32 = vmul.f32 %v6637_v63, %v6623_v21  ;;  %v2226_v3 = vadd.f32 %v6446_v20, %v6650_v5  ;;  %v2294_v14 = vmul.f32 %v6637_v63, %v6626_v30  ;;  %vm2255_vm1 = vcmp.gt.f32.partialorder %v6644_v19, 0.0  ;;  %v2467_v31 = vld [vmem:[#allocation2 + $0x141] sm:$0xff]  ;;  %v2662_v0 = vld [vmem:[#allocation2 + $0x170] sm:$0xff] }
 0x2ea   : > { %2356 = vst.msk [vmem:[#allocation2 + $0xa9] sm:$0xff] %vm33_vm0, %v2323_v11  ;;  %2357 = vst.msk [vmem:[#allocation2 + $0xb1] sm:$0xff] %vm33_vm0, %v2324_v49  ;;  %v2295_v9 = vmul.f32 %v6637_v63, %v6629_v16  ;;  %v2296_v17 = vmul.f32 %v6637_v63, %v6632_v4  ;;  %2697 = vrot.lane.b32.xlu0 %v2665_v61, %s5454_s12  ;;  %vm2256_vm2 = vcmp.gt.f32.partialorder %v6647_v8, 0.0  ;;  %vm2257_vm14 = vcmp.gt.f32.partialorder %v6653_v36, 0.0  ;;  %v2828_v6 = vld [vmem:[#allocation2 + $0x3a] sm:$0xff]  ;;  %v2637_v24 = vld [vmem:[#allocation2 + $0x48] sm:$0xff] }
 0x2eb   : > { %v2325_v20 = vsel %vm2251_vm3, %v6623_v21, %v2293_v32  ;;  %v2297_v5 = vmul.f32 %v6637_v63, %v6644_v19  ;;  %v2326_v23 = vsel %vm2252_vm4, %v6626_v30, %v2294_v14  ;;  %v6852_v57 = vpack.c.bf16 %v2465_v45, %v2464_v55  ;;  %v2638_v15 = vld [vmem:[#allocation2 + $0x50] sm:$0xff]  ;;  %v2661_v10 = vld [vmem:[#allocation2 + $0x168] sm:$0xff]  ;;  %v2445_v11 = vld [vmem:[#allocation2 + $0x39] sm:$0xff] }
 0x2ec   : > { %2358 = vst.msk [vmem:[#allocation2 + $0xc1] sm:$0xff] %vm33_vm0, %v2325_v20  ;;  %v2327_v46 = vsel %vm2253_vm5, %v6629_v16, %v2295_v9  ;;  %v2328_v21 = vsel %vm2254_vm6, %v6632_v4, %v2296_v17  ;;  %2359 = vst.msk [vmem:[#allocation2 + $0xc9] sm:$0xff] %vm33_vm0, %v2326_v23  ;;  %v2298_v30 = vmul.f32 %v6637_v63, %v6647_v8  ;;  %vm2258_vm15 = vcmp.gt.f32.partialorder %v2226_v3, 0.0  ;;  %v2659_v4 = vld [vmem:[#allocation2 + $0x150] sm:$0xff] }
 0x2ed   : > { %2360 = vst.msk [vmem:[#allocation2 + $0xd9] sm:$0xff] %vm33_vm0, %v2327_v46  ;;  %2361 = vst.msk [vmem:[#allocation2 + $0xe1] sm:$0xff] %vm33_vm0, %v2328_v21  ;;  %v2329_v16 = vsel %vm2255_vm1, %v6644_v19, %v2297_v5  ;;  %2504 = vrot.lane.b32.xlu1 %v2472_v47, %s5454_s12  ;;  %v2299_v28 = vmul.f32 %v6637_v63, %v6653_v36  ;;  %v2300_v27 = vmul.f32 %v6637_v63, %v2226_v3  ;;  %v2829_v59 = vld [vmem:[#allocation2 + $0x4a] sm:$0xff]  ;;  %v2830_v35 = vld [vmem:[#allocation2 + $0x52] sm:$0xff]  ;;  %vm7798_vm3 = vcmask 1048064  }
 0x2ee   : > { %2362 = vst.msk [vmem:[#allocation2 + $0xf1] sm:$0xff] %vm33_vm0, %v2329_v16  ;;  %v2601_v37 = vpack.c.bf16 %v2570_v58, %v2569_v62  ;;  %2528 = vrot.lane.b32.xlu0 %v6852_v57, %s5454_s12  ;;  %v2330_v19 = vsel %vm2256_vm2, %v6647_v8, %v2298_v30  ;;  %v2408_v7 = vpack.c.bf16 %v2377_v51, %v2376_v38  ;;  %v2466_v8 = vld [vmem:[#allocation2 + $0x139] sm:$0xff]  ;;  %v2831_v50 = vld [vmem:[#allocation2 + $0x62] sm:$0xff]  ;;  %v2832_v29 = vld [vmem:[#allocation2 + $0x6a] sm:$0xff] }
 0x2ef   : > { %v2666_v39 = vpack.c.bf16 %v2636_v42, %v2635_v13  ;;  %2363 = vst.msk [vmem:[#allocation2 + $0xf9] sm:$0xff] %vm33_vm0, %v2330_v19  ;;  %v2331_v60 = vsel %vm2257_vm14, %v6653_v36, %v2299_v28  ;;  %v2332_v47 = vsel %vm2258_vm15, %v2226_v3, %v2300_v27  ;;  %v2678_v63 = vpack.c.bf16 %v2660_v2, %v2659_v4  ;;  %v2444_v43 = vld [vmem:[#allocation2 + $0x31] sm:$0xff]  ;;  %v2833_v49 = vld [vmem:[#allocation2 + $0x7a] sm:$0xff]  ;;  %v2834_v55 = vld [vmem:[#allocation2 + $0x82] sm:$0xff] }
 0x2f0   : > { %2617 = vst.msk [vmem:[#allocation3 + $0x8] sm:$0xff] %vm33_vm0, %v2601_v37  ;;  %2364 = vst.msk [vmem:[#allocation2 + $0x109] sm:$0xff] %vm33_vm0, %v2331_v60  ;;  %v6885_v36 = vpack.c.bf16 %v2826_v52, %v2825_v34  ;;  %v2473_v40 = vpack.c.bf16 %v2443_v53, %v2442_v22  ;;  %v6887_v25 = vpack.c.bf16 %v2467_v31, %v2466_v8  ;;  %v2468_v32 = vld [vmem:[#allocation2 + $0x151] sm:$0xff]  ;;  %v2469_v3 = vld [vmem:[#allocation2 + $0x159] sm:$0xff] }
 0x2f1   : > { %2365 = vst.msk [vmem:[#allocation2 + $0x111] sm:$0xff] %vm33_vm0, %v2332_v47  ;;  %2424 = vst.msk [vmem:[#allocation3] sm:$0xff] %vm33_vm0, %v2408_v7  ;;  %2699 = vrot.lane.b32.xlu1 %v2666_v39, %s5454_s12  ;;  %v6889_v33 = vpack.c.bf16 %v2828_v6, %v2827_v26  ;;  %v6896_v44 = vpack.c.bf16 %v2830_v35, %v2829_v59  ;;  %v2667_v12 = vpack.c.bf16 %v2638_v15, %v2637_v24  ;;  %v2835_v14 = vld [vmem:[#allocation2 + $0x92] sm:$0xff]  ;;  %v2836_v17 = vld [vmem:[#allocation2 + $0x9a] sm:$0xff] }
 0x2f2   : > { %2723 = vrot.lane.b32.xlu0 %v2678_v63, %s5454_s12  ;;  %2618 = vst.msk [vmem:[#allocation3 + $0x30] sm:$0xff] %vm33_vm0, %v6885_v36  ;;  %v2679_v48 = vpack.c.bf16 %v2662_v0, %v2661_v10  ;;  %v6900_v61 = vpack.c.bf16 %v2832_v29, %v2831_v50  ;;  %v6906_v45 = vpack.c.bf16 %v2834_v55, %v2833_v49  ;;  %v2639_v5 = vld [vmem:[#allocation2 + $0x60] sm:$0xff]  ;;  %v2640_v62 = vld [vmem:[#allocation2 + $0x68] sm:$0xff]  ;;  %v2838_v38 = vld [vmem:[#allocation2 + $0xb2] sm:$0xff] }
 0x2f3   : > { %2619 = vst.msk [vmem:[#allocation3 + $0x58] sm:$0xff] %vm33_vm0, %v6889_v33  ;;  %2620 = vst.msk [vmem:[#allocation3 + $0x80] sm:$0xff] %vm33_vm0, %v6896_v44  ;;  %v6910_v9 = vpack.c.bf16 %v2445_v11, %v2444_v43  ;;  %v6912_v20 = vpack.c.bf16 %v2469_v3, %v2468_v32  ;;  %v6914_v58 = vpack.c.bf16 %v2836_v17, %v2835_v14  ;;  %v2837_v23 = vld [vmem:[#allocation2 + $0xaa] sm:$0xff]  ;;  %v2663_v46 = vld [vmem:[#allocation2 + $0x180] sm:$0xff] }
 0x2f4   : > { %2621 = vst.msk [vmem:[#allocation3 + $0xa8] sm:$0xff] %vm33_vm0, %v6900_v61  ;;  %2622 = vst.msk [vmem:[#allocation3 + $0xd0] sm:$0xff] %vm33_vm0, %v6906_v45  ;;  %v2664_v21 = vld [vmem:[#allocation2 + $0x188] sm:$0xff]  ;;  %v6922_v51 = vpack.c.bf16 %v2838_v38, %v2837_v23  ;;  %v2655_v13 = vld [vmem:[#allocation2 + $0x120] sm:$0xff]  ;;  %v2668_v16 = vpack.c.bf16 %v2640_v62, %v2639_v5 }
 0x2f5   : > { %2506 = vrot.lane.b32.xlu1 %v2473_v40, %s5454_s12  ;;  %v2656_v42 = vld [vmem:[#allocation2 + $0x128] sm:$0xff]  ;;  %2623 = vst.msk [vmem:[#allocation3 + $0xf8] sm:$0xff] %vm33_vm0, %v6914_v58  ;;  %v2680_v27 = vpack.c.bf16 %v2664_v21, %v2663_v46  ;;  %v2447_v37 = vld [vmem:[#allocation2 + $0x51] sm:$0xff]  ;;  %v2841_v7 = vld [vmem:[#allocation2 + $0xda] sm:$0xff] }
 0x2f6   : > { %2530 = vrot.lane.b32.xlu0 %v6887_v25, %s5454_s12  ;;  %v2839_v30 = vld [vmem:[#allocation2 + $0xc2] sm:$0xff]  ;;  %v6926_v2 = vpack.c.bf16 %v2656_v42, %v2655_v13  ;;  %v2840_v28 = vld [vmem:[#allocation2 + $0xca] sm:$0xff]  ;;  %2624 = vst.msk [vmem:[#allocation3 + $0x120] sm:$0xff] %vm33_vm0, %v6922_v51  ;;  %v2641_v22 = vld [vmem:[#allocation2 + $0x78] sm:$0xff] }
 0x2f7   : > { %v2446_v4 = vld [vmem:[#allocation2 + $0x49] sm:$0xff]  ;;  %v6928_v19 = vpack.c.bf16 %v2840_v28, %v2839_v30  ;;  %v2471_v47 = vld [vmem:[#allocation2 + $0x171] sm:$0xff]  ;;  %v2849_v8 = vld [vmem:[#allocation2 + $0x13a] sm:$0xff] }
 0x2f8   : > { %v2842_v39 = vld [vmem:[#allocation2 + $0xe2] sm:$0xff]  ;;  %2436 = vst.msk [vmem:[#allocation3 + $0x1e0] sm:$0xff] %vm33_vm0, %v6926_v2  ;;  %v2848_v34 = vld [vmem:[#allocation2 + $0x12a] sm:$0xff]  ;;  %v6940_v31 = vpack.c.bf16 %v2447_v37, %v2446_v4  ;;  %v2851_v40 = vld [vmem:[#allocation2 + $0x152] sm:$0xff] }
 0x2f9   : > { %2701 = vrot.lane.b32.xlu1 %v2667_v12, %s5454_s12  ;;  %v2470_v60 = vld [vmem:[#allocation2 + $0x169] sm:$0xff]  ;;  %v6933_v63 = vpack.c.bf16 %v2842_v39, %v2841_v7  ;;  %2625 = vst.msk [vmem:[#allocation3 + $0x148] sm:$0xff] %vm33_vm0, %v6928_v19  ;;  %v2852_v6 = vld [vmem:[#allocation2 + $0x15a] sm:$0xff]  ;;  %v2854_v35 = vld [vmem:[#allocation2 + $0x172] sm:$0xff] }
 0x2fa   : > { %2725 = vrot.lane.b32.xlu0 %v2679_v48, %s5454_s12  ;;  %v2847_v53 = vld [vmem:[#allocation2 + $0x122] sm:$0xff]  ;;  %v6946_v24 = vpack.c.bf16 %v2471_v47, %v2470_v60  ;;  %v6950_v10 = vpack.c.bf16 %v2852_v6, %v2851_v40  ;;  %v2853_v0 = vld [vmem:[#allocation2 + $0x16a] sm:$0xff]  ;;  %v2402_v48 = vld [vmem:[#allocation2 + $0x138] sm:$0xff] }
 0x2fb   : > { %v6942_v52 = vpack.c.bf16 %v2848_v34, %v2847_v53  ;;  %v2850_v26 = vld [vmem:[#allocation2 + $0x142] sm:$0xff]  ;;  %2626 = vst.msk [vmem:[#allocation3 + $0x170] sm:$0xff] %vm33_vm0, %v6933_v63  ;;  %v6956_v50 = vpack.c.bf16 %v2854_v35, %v2853_v0  ;;  %v2378_v49 = vld [vmem:[#allocation2 + $0x18] sm:$0xff]  ;;  %v2404_v5 = vld [vmem:[#allocation2 + $0x150] sm:$0xff] }
 0x2fc   : > { %v2642_v15 = vld [vmem:[#allocation2 + $0x80] sm:$0xff]  ;;  %v6948_v59 = vpack.c.bf16 %v2850_v26, %v2849_v8  ;;  %2631 = vst.msk [vmem:[#allocation3 + $0x238] sm:$0xff] %vm33_vm0, %v6950_v10  ;;  %v2449_v55 = vld [vmem:[#allocation2 + $0x69] sm:$0xff]  ;;  %v2405_v62 = vld [vmem:[#allocation2 + $0x158] sm:$0xff] }
 0x2fd   : > { %2508 = vrot.lane.b32.xlu1 %v6910_v9, %s5454_s12  ;;  %2629 = vst.msk [vmem:[#allocation3 + $0x1e8] sm:$0xff] %vm33_vm0, %v6942_v52  ;;  %v5381_v12 = vld [vmem:[%s7783_s5 + $0xc0] sm:$0xff]   ;;  %v2669_v43 = vpack.c.bf16 %v2642_v15, %v2641_v22  ;;  %2632 = vst.msk [vmem:[#allocation3 + $0x260] sm:$0xff] %vm33_vm0, %v6956_v50  ;;  %v2422_v23 = vpack.c.bf16 %v2405_v62, %v2404_v5  ;;  %v2380_v46 = vld [vmem:[#allocation2 + $0x30] sm:$0xff] }
 0x2fe   : > { %2532 = vrot.lane.b32.xlu0 %v6912_v20, %s5454_s12  ;;  %2630 = vst.msk [vmem:[#allocation3 + $0x210] sm:$0xff] %vm33_vm0, %v6948_v59  ;;  %v6968_v29 = vld [vmem:[%s7783_s5 + $0x100] sm:$0xff]   ;;  %5051 = vmatprep.subr.bf16.mxu1 %v5381_v12  ;;  %v2381_v21 = vld [vmem:[#allocation2 + $0x38] sm:$0xff]  ;;  %v2643_v13 = vld [vmem:[#allocation2 + $0x90] sm:$0xff] }
 0x2ff   : > { %v2403_v11 = vld [vmem:[#allocation2 + $0x140] sm:$0xff]  ;;  %5223 = vmatprep.subr.bf16.mxu0 %v6968_v29  ;;  %v2644_v42 = vld [vmem:[#allocation2 + $0x98] sm:$0xff]  ;;  %v2410_v30 = vpack.c.bf16 %v2381_v21, %v2380_v46  ;;  %2438 = vst.msk [vmem:[#allocation3 + $0x230] sm:$0xff] %vm33_vm0, %v2422_v23  ;;  %v2407_v4 = vld [vmem:[#allocation2 + $0x170] sm:$0xff] }
 0x300   : > { %v2379_v32 = vld [vmem:[#allocation2 + $0x20] sm:$0xff]  ;;  %v2421_v14 = vpack.c.bf16 %v2403_v11, %v2402_v48  ;;  %v2382_v28 = vld [vmem:[#allocation2 + $0x48] sm:$0xff]  ;;  %3014 = vst.msk [vmem:[#allocation3 + $0x1f8] sm:$0xff] %vm33_vm0, %v2422_v23  ;;  %v2670_v7 = vpack.c.bf16 %v2644_v42, %v2643_v13  ;;  %v2646_v40 = vld [vmem:[#allocation2 + $0xb0] sm:$0xff] }
 0x301   : > { %2703 = vrot.lane.b32.xlu1 %v2668_v16, %s5454_s12  ;;  %v2448_v3 = vld [vmem:[#allocation2 + $0x61] sm:$0xff]  ;;  %v2409_v17 = vpack.c.bf16 %v2379_v32, %v2378_v49  ;;  %2426 = vst.msk [vmem:[#allocation3 + $0x50] sm:$0xff] %vm33_vm0, %v2410_v30  ;;  %3002 = vst.msk [vmem:[#allocation3 + $0x18] sm:$0xff] %vm33_vm0, %v2410_v30  ;;  %v2761_v39 = vld [vmem:[#allocation2 + $0x19] sm:$0xff] }
 0x302   : > { %2727 = vrot.lane.b32.xlu0 %v2680_v27, %s5454_s12  ;;  %2437 = vst.msk [vmem:[#allocation3 + $0x208] sm:$0xff] %vm33_vm0, %v2421_v14  ;;  %3013 = vst.msk [vmem:[#allocation3 + $0x1d0] sm:$0xff] %vm33_vm0, %v2421_v14  ;;  %v6981_v38 = vpack.c.bf16 %v2449_v55, %v2448_v3  ;;  %v2406_v16 = vld [vmem:[#allocation2 + $0x168] sm:$0xff]  ;;  %v2383_v27 = vld [vmem:[#allocation2 + $0x50] sm:$0xff] }
 0x303   : > { %2425 = vst.msk [vmem:[#allocation3 + $0x28] sm:$0xff] %vm33_vm0, %v2409_v17  ;;  %v2411_v37 = vpack.c.bf16 %v2383_v27, %v2382_v28  ;;  %v2762_v60 = vld [vmem:[#allocation2 + $0x21] sm:$0xff]  ;;  %v2450_v22 = vld [vmem:[#allocation2 + $0x79] sm:$0xff]  ;;  %v2763_v6 = vld [vmem:[#allocation2 + $0x31] sm:$0xff] }
 0x304   : > { %v2384_v47 = vld [vmem:[#allocation2 + $0x60] sm:$0xff]  ;;  %v2793_v34 = vpack.c.bf16 %v2762_v60, %v2761_v39  ;;  %v2385_v8 = vld [vmem:[#allocation2 + $0x68] sm:$0xff]  ;;  %v2386_v0 = vld [vmem:[#allocation2 + $0x78] sm:$0xff] }
 0x305   : > { %2510 = vrot.lane.b32.xlu1 %v6940_v31, %s5454_s12  ;;  %v2451_v53 = vld [vmem:[#allocation2 + $0x81] sm:$0xff]  ;;  %2427 = vst.msk [vmem:[#allocation3 + $0x78] sm:$0xff] %vm33_vm0, %v2411_v37  ;;  %3003 = vst.msk [vmem:[#allocation3 + $0x40] sm:$0xff] %vm33_vm0, %v2411_v37  ;;  %v2764_v15 = vld [vmem:[#allocation2 + $0x39] sm:$0xff] }
 0x306   : > { %2534 = vrot.lane.b32.xlu0 %v6946_v24, %s5454_s12  ;;  %v2645_v26 = vld [vmem:[#allocation2 + $0xa8] sm:$0xff]  ;;  %2809 = vst.msk [vmem:[#allocation3 + $0x10] sm:$0xff] %vm33_vm0, %v2793_v34  ;;  %v6999_v35 = vpack.c.bf16 %v2451_v53, %v2450_v22  ;;  %v2794_v12 = vpack.c.bf16 %v2764_v15, %v2763_v6  ;;  %v2387_v48 = vld [vmem:[#allocation2 + $0x80] sm:$0xff]  ;;  %v2766_v11 = vld [vmem:[#allocation2 + $0x51] sm:$0xff] }
 0x307   : > { %v2413_v49 = vpack.c.bf16 %v2387_v48, %v2386_v0  ;;  %v2389_v3 = vld [vmem:[#allocation2 + $0x98] sm:$0xff]  ;;  %v2767_v55 = vld [vmem:[#allocation2 + $0x61] sm:$0xff]  ;;  %v2768_v17 = vld [vmem:[#allocation2 + $0x69] sm:$0xff]  ;;  %v2671_v30 = vpack.c.bf16 %v2646_v40, %v2645_v26 }
 0x308   : > { %2810 = vst.msk [vmem:[#allocation3 + $0x38] sm:$0xff] %vm33_vm0, %v2794_v12  ;;  %v2390_v5 = vld [vmem:[#allocation2 + $0xa8] sm:$0xff]  ;;  %v2452_v62 = vld [vmem:[#allocation2 + $0x91] sm:$0xff]  ;;  %v2453_v23 = vld [vmem:[#allocation2 + $0x99] sm:$0xff]  ;;  %v2796_v46 = vpack.c.bf16 %v2768_v17, %v2767_v55 }
 0x309   : > { %2705 = vrot.lane.b32.xlu1 %v2669_v43, %s5454_s12  ;;  %v2765_v43 = vld [vmem:[#allocation2 + $0x49] sm:$0xff]  ;;  %2429 = vst.msk [vmem:[#allocation3 + $0xc8] sm:$0xff] %vm33_vm0, %v2413_v49  ;;  %3005 = vst.msk [vmem:[#allocation3 + $0x90] sm:$0xff] %vm33_vm0, %v2413_v49  ;;  %v2769_v13 = vld [vmem:[#allocation2 + $0x79] sm:$0xff]  ;;  %v7022_v0 = vpack.c.bf16 %v2453_v23, %v2452_v62 }
 0x30a   : > { %3082 = vrot.lane.b32.xlu0 %v6910_v9, %s5454_s12  ;;  %v2423_v9 = vpack.c.bf16 %v2407_v4, %v2406_v16  ;;  %v2795_v32 = vpack.c.bf16 %v2766_v11, %v2765_v43  ;;  %v2391_v21 = vld [vmem:[#allocation2 + $0xb0] sm:$0xff]  ;;  %v2770_v42 = vld [vmem:[#allocation2 + $0x81] sm:$0xff]  ;;  %2812 = vst.msk [vmem:[#allocation3 + $0x88] sm:$0xff] %vm33_vm0, %v2796_v46  ;;  %v2772_v37 = vld [vmem:[#allocation2 + $0x99] sm:$0xff] }
 0x30b   : > { %v2415_v16 = vpack.c.bf16 %v2391_v21, %v2390_v5  ;;  %v2797_v4 = vpack.c.bf16 %v2770_v42, %v2769_v13  ;;  %v2393_v28 = vld [vmem:[#allocation2 + $0xc8] sm:$0xff]  ;;  %v2395_v39 = vld [vmem:[#allocation2 + $0xe0] sm:$0xff]  ;;  %v2589_v22 = vld [vmem:[#allocation2 + $0xf2] sm:$0xff] }
 0x30c   : > { %2439 = vst.msk [vmem:[#allocation3 + $0x258] sm:$0xff] %vm33_vm0, %v2423_v9  ;;  %3015 = vst.msk [vmem:[#allocation3 + $0x220] sm:$0xff] %vm33_vm0, %v2423_v9  ;;  %v2771_v9 = vld [vmem:[#allocation2 + $0x91] sm:$0xff]  ;;  %v2590_v53 = vld [vmem:[#allocation2 + $0xfa] sm:$0xff] }
 0x30d   : > { %2512 = vrot.lane.b32.xlu1 %v6981_v38, %s5454_s12  ;;  %2811 = vst.msk [vmem:[#allocation3 + $0x60] sm:$0xff] %vm33_vm0, %v2795_v32  ;;  %2431 = vst.msk [vmem:[#allocation3 + $0x118] sm:$0xff] %vm33_vm0, %v2415_v16  ;;  %v2798_v60 = vpack.c.bf16 %v2772_v37, %v2771_v9  ;;  %v2773_v34 = vld [vmem:[#allocation2 + $0xa9] sm:$0xff]  ;;  %v2611_v26 = vpack.c.bf16 %v2590_v53, %v2589_v22  ;;  %v2774_v40 = vld [vmem:[#allocation2 + $0xb1] sm:$0xff] }
 0x30e   : > { %2889 = vrot.lane.b32.xlu0 %v6885_v36, %s5454_s12  ;;  %v2412_v36 = vpack.c.bf16 %v2385_v8, %v2384_v47  ;;  %2813 = vst.msk [vmem:[#allocation3 + $0xb0] sm:$0xff] %vm33_vm0, %v2797_v4  ;;  %3007 = vst.msk [vmem:[#allocation3 + $0xe0] sm:$0xff] %vm33_vm0, %v2415_v16  ;;  %v2647_v8 = vld [vmem:[#allocation2 + $0xc0] sm:$0xff]  ;;  %v2396_v6 = vld [vmem:[#allocation2 + $0xf0] sm:$0xff]  ;;  %v2799_v12 = vpack.c.bf16 %v2774_v40, %v2773_v34 }
 0x30f   : > { %v2397_v15 = vld [vmem:[#allocation2 + $0xf8] sm:$0xff]  ;;  %2814 = vst.msk [vmem:[#allocation3 + $0xd8] sm:$0xff] %vm33_vm0, %v2798_v60  ;;  %v2775_v11 = vld [vmem:[#allocation2 + $0xc1] sm:$0xff]  ;;  %2627 = vst.msk [vmem:[#allocation3 + $0x198] sm:$0xff] %vm33_vm0, %v2611_v26 }
 0x310   : > { %2428 = vst.msk [vmem:[#allocation3 + $0xa0] sm:$0xff] %vm33_vm0, %v2412_v36  ;;  %3004 = vst.msk [vmem:[#allocation3 + $0x68] sm:$0xff] %vm33_vm0, %v2412_v36  ;;  %v2648_v36 = vld [vmem:[#allocation2 + $0xc8] sm:$0xff]  ;;  %v2418_v48 = vpack.c.bf16 %v2397_v15, %v2396_v6  ;;  %v2592_v43 = vld [vmem:[#allocation2 + $0x112] sm:$0xff] }
 0x311   : > { %2707 = vrot.lane.b32.xlu1 %v2670_v7, %s5454_s12  ;;  %v2394_v7 = vld [vmem:[#allocation2 + $0xd8] sm:$0xff]  ;;  %v2776_v32 = vld [vmem:[#allocation2 + $0xc9] sm:$0xff]  ;;  %3202 = vst.msk [vmem:[#allocation3 + $0x160] sm:$0xff] %vm33_vm0, %v2611_v26  ;;  %2815 = vst.msk [vmem:[#allocation3 + $0x100] sm:$0xff] %vm33_vm0, %v2799_v12  ;;  %v2672_v16 = vpack.c.bf16 %v2648_v36, %v2647_v8 }
 0x312   : > { %3084 = vrot.lane.b32.xlu0 %v6940_v31, %s5454_s12  ;;  %v2388_v31 = vld [vmem:[#allocation2 + $0x90] sm:$0xff]  ;;  %v2417_v47 = vpack.c.bf16 %v2395_v39, %v2394_v7  ;;  %2434 = vst.msk [vmem:[#allocation3 + $0x190] sm:$0xff] %vm33_vm0, %v2418_v48  ;;  %v2800_v55 = vpack.c.bf16 %v2776_v32, %v2775_v11  ;;  %v2777_v17 = vld [vmem:[#allocation2 + $0xd9] sm:$0xff]  ;;  %v2778_v5 = vld [vmem:[#allocation2 + $0xe1] sm:$0xff] }
 0x313   : > { %v2414_v14 = vpack.c.bf16 %v2389_v3, %v2388_v31  ;;  %v2398_v31 = vld [vmem:[#allocation2 + $0x108] sm:$0xff]  ;;  %v2399_v3 = vld [vmem:[#allocation2 + $0x110] sm:$0xff]  ;;  %3010 = vst.msk [vmem:[#allocation3 + $0x158] sm:$0xff] %vm33_vm0, %v2418_v48  ;;  %v2801_v21 = vpack.c.bf16 %v2778_v5, %v2777_v17  ;;  %v2780_v13 = vld [vmem:[#allocation2 + $0xf9] sm:$0xff] }
 0x314   : > { %2433 = vst.msk [vmem:[#allocation3 + $0x168] sm:$0xff] %vm33_vm0, %v2417_v47  ;;  %3009 = vst.msk [vmem:[#allocation3 + $0x130] sm:$0xff] %vm33_vm0, %v2417_v47  ;;  %v2779_v62 = vld [vmem:[#allocation2 + $0xf1] sm:$0xff]  ;;  %v2454_v23 = vld [vmem:[#allocation2 + $0xa9] sm:$0xff] }
 0x315   : > { %2514 = vrot.lane.b32.xlu1 %v6999_v35, %s5454_s12  ;;  %2430 = vst.msk [vmem:[#allocation3 + $0xf0] sm:$0xff] %vm33_vm0, %v2414_v14  ;;  %3006 = vst.msk [vmem:[#allocation3 + $0xb8] sm:$0xff] %vm33_vm0, %v2414_v14  ;;  %v2419_v14 = vpack.c.bf16 %v2399_v3, %v2398_v31  ;;  %v2455_v46 = vld [vmem:[#allocation2 + $0xb1] sm:$0xff]  ;;  %v2802_v4 = vpack.c.bf16 %v2780_v13, %v2779_v62  ;;  %v2974_v9 = vld [vmem:[#allocation2 + $0x120] sm:$0xff] }
 0x316   : > { %2891 = vrot.lane.b32.xlu0 %v6889_v33, %s5454_s12  ;;  %v2392_v33 = vld [vmem:[#allocation2 + $0xc0] sm:$0xff]  ;;  %v3146_v42 = vld [vmem:[#allocation2 + $0x32] sm:$0xff]  ;;  %2816 = vst.msk [vmem:[#allocation3 + $0x128] sm:$0xff] %vm33_vm0, %v2800_v55  ;;  %2817 = vst.msk [vmem:[#allocation3 + $0x150] sm:$0xff] %vm33_vm0, %v2801_v21  ;;  %v7048_v12 = vpack.c.bf16 %v2455_v46, %v2454_v23 }
 0x317   : > { %v2416_v27 = vpack.c.bf16 %v2393_v28, %v2392_v33  ;;  %2435 = vst.msk [vmem:[#allocation3 + $0x1b8] sm:$0xff] %vm33_vm0, %v2419_v14  ;;  %3011 = vst.msk [vmem:[#allocation3 + $0x180] sm:$0xff] %vm33_vm0, %v2419_v14  ;;  %v2782_v28 = vld [vmem:[#allocation2 + $0x111] sm:$0xff]  ;;  %v2975_v37 = vld [vmem:[#allocation2 + $0x128] sm:$0xff] }
 0x318   : > { %v2783_v7 = vld [vmem:[#allocation2 + $0x121] sm:$0xff]  ;;  %v2784_v39 = vld [vmem:[#allocation2 + $0x129] sm:$0xff]  ;;  %2818 = vst.msk [vmem:[#allocation3 + $0x178] sm:$0xff] %vm33_vm0, %v2802_v4  ;;  %v2996_v60 = vpack.c.bf16 %v2975_v37, %v2974_v9  ;;  %v3149_v53 = vld [vmem:[#allocation2 + $0x52] sm:$0xff] }
 0x319   : > { %2709 = vrot.lane.b32.xlu1 %v2671_v30, %s5454_s12  ;;  %2432 = vst.msk [vmem:[#allocation3 + $0x140] sm:$0xff] %vm33_vm0, %v2416_v27  ;;  %3008 = vst.msk [vmem:[#allocation3 + $0x108] sm:$0xff] %vm33_vm0, %v2416_v27  ;;  %v3147_v30 = vld [vmem:[#allocation2 + $0x3a] sm:$0xff]  ;;  %v2804_v47 = vpack.c.bf16 %v2784_v39, %v2783_v7  ;;  %v3148_v22 = vld [vmem:[#allocation2 + $0x4a] sm:$0xff] }
 0x31a   : > { %3086 = vrot.lane.b32.xlu0 %v6981_v38, %s5454_s12  ;;  %v2591_v38 = vld [vmem:[#allocation2 + $0x10a] sm:$0xff]  ;;  %v3178_v33 = vpack.c.bf16 %v3147_v30, %v3146_v42  ;;  %v3150_v34 = vld [vmem:[#allocation2 + $0x62] sm:$0xff]  ;;  %v2649_v8 = vld [vmem:[#allocation2 + $0xd8] sm:$0xff]  ;;  %v3179_v26 = vpack.c.bf16 %v3149_v53, %v3148_v22  ;;  %3012 = vst.msk [vmem:[#allocation3 + $0x1a8] sm:$0xff] %vm33_vm0, %v2996_v60 }
 0x31b   : > { %v2612_v49 = vpack.c.bf16 %v2592_v43, %v2591_v38  ;;  %v2650_v36 = vld [vmem:[#allocation2 + $0xe0] sm:$0xff]  ;;  %v3151_v40 = vld [vmem:[#allocation2 + $0x6a] sm:$0xff]  ;;  %2820 = vst.msk [vmem:[#allocation3 + $0x1c8] sm:$0xff] %vm33_vm0, %v2804_v47  ;;  %v3154_v31 = vld [vmem:[#allocation2 + $0x92] sm:$0xff] }
 0x31c   : > { %3194 = vst.msk [vmem:[#allocation3 + $0x20] sm:$0xff] %vm33_vm0, %v3178_v33  ;;  %v2785_v6 = vld [vmem:[#allocation2 + $0x139] sm:$0xff]  ;;  %v2786_v15 = vld [vmem:[#allocation2 + $0x141] sm:$0xff]  ;;  %v3180_v48 = vpack.c.bf16 %v3151_v40, %v3150_v34  ;;  %v2787_v43 = vld [vmem:[#allocation2 + $0x151] sm:$0xff]  ;;  %v2673_v30 = vpack.c.bf16 %v2650_v36, %v2649_v8 }
 0x31d   : > { %2516 = vrot.lane.b32.xlu1 %v7022_v0, %s5454_s12  ;;  %2628 = vst.msk [vmem:[#allocation3 + $0x1c0] sm:$0xff] %vm33_vm0, %v2612_v49  ;;  %3203 = vst.msk [vmem:[#allocation3 + $0x188] sm:$0xff] %vm33_vm0, %v2612_v49  ;;  %v2805_v38 = vpack.c.bf16 %v2786_v15, %v2785_v6  ;;  %v2788_v11 = vld [vmem:[#allocation2 + $0x159] sm:$0xff]  ;;  %v3153_v32 = vld [vmem:[#allocation2 + $0x82] sm:$0xff] }
 0x31e   : > { %2893 = vrot.lane.b32.xlu0 %v6896_v44, %s5454_s12  ;;  %v2781_v44 = vld [vmem:[#allocation2 + $0x109] sm:$0xff]  ;;  %v3152_v49 = vld [vmem:[#allocation2 + $0x7a] sm:$0xff]  ;;  %3195 = vst.msk [vmem:[#allocation3 + $0x48] sm:$0xff] %vm33_vm0, %v3179_v26  ;;  %3196 = vst.msk [vmem:[#allocation3 + $0x70] sm:$0xff] %vm33_vm0, %v3180_v48 }
 0x31f   : > { %v2803_v27 = vpack.c.bf16 %v2782_v28, %v2781_v44  ;;  %v3155_v3 = vld [vmem:[#allocation2 + $0x9a] sm:$0xff]  ;;  %2821 = vst.msk [vmem:[#allocation3 + $0x1f0] sm:$0xff] %vm33_vm0, %v2805_v38  ;;  %v3181_v55 = vpack.c.bf16 %v3153_v32, %v3152_v49  ;;  %v2789_v17 = vld [vmem:[#allocation2 + $0x169] sm:$0xff]  ;;  %v2790_v5 = vld [vmem:[#allocation2 + $0x171] sm:$0xff] }
 0x320   : > { %v3182_v14 = vpack.c.bf16 %v3155_v3, %v3154_v31  ;;  %v2982_v62 = vld [vmem:[#allocation2 + $0x180] sm:$0xff]  ;;  %v2807_v46 = vpack.c.bf16 %v2790_v5, %v2789_v17  ;;  %v2983_v21 = vld [vmem:[#allocation2 + $0x188] sm:$0xff]  ;;  %v3157_v44 = vld [vmem:[#allocation2 + $0xb2] sm:$0xff] }
 0x321   : > { %2711 = vrot.lane.b32.xlu1 %v2672_v16, %s5454_s12  ;;  %2819 = vst.msk [vmem:[#allocation3 + $0x1a0] sm:$0xff] %vm33_vm0, %v2803_v27  ;;  %v2456_v23 = vld [vmem:[#allocation2 + $0xc1] sm:$0xff]  ;;  %v2792_v42 = vld [vmem:[#allocation2 + $0x189] sm:$0xff]  ;;  %3197 = vst.msk [vmem:[#allocation3 + $0x98] sm:$0xff] %vm33_vm0, %v3181_v55  ;;  %v3000_v16 = vpack.c.bf16 %v2983_v21, %v2982_v62 }
 0x322   : > { %3088 = vrot.lane.b32.xlu0 %v6999_v35, %s5454_s12  ;;  %v2806_v35 = vpack.c.bf16 %v2788_v11, %v2787_v43  ;;  %v2791_v13 = vld [vmem:[#allocation2 + $0x181] sm:$0xff]  ;;  %3198 = vst.msk [vmem:[#allocation3 + $0xc0] sm:$0xff] %vm33_vm0, %v3182_v14  ;;  %v3156_v33 = vld [vmem:[#allocation2 + $0xaa] sm:$0xff]  ;;  %2823 = vst.msk [vmem:[#allocation3 + $0x240] sm:$0xff] %vm33_vm0, %v2807_v46 }
 0x323   : > { %v2808_v4 = vpack.c.bf16 %v2792_v42, %v2791_v13  ;;  %v3158_v28 = vld [vmem:[#allocation2 + $0xc2] sm:$0xff]  ;;  %v3159_v27 = vld [vmem:[#allocation2 + $0xca] sm:$0xff]  ;;  %v3160_v37 = vld [vmem:[#allocation2 + $0xda] sm:$0xff]  ;;  %3016 = vst.msk [vmem:[#allocation3 + $0x248] sm:$0xff] %vm33_vm0, %v3000_v16 }
 0x324   : > { %2822 = vst.msk [vmem:[#allocation3 + $0x218] sm:$0xff] %vm33_vm0, %v2806_v35  ;;  %v2457_v9 = vld [vmem:[#allocation2 + $0xc9] sm:$0xff]  ;;  %v3184_v7 = vpack.c.bf16 %v3159_v27, %v3158_v28  ;;  %v3168_v53 = vld [vmem:[#allocation2 + $0x13a] sm:$0xff]  ;;  %v3170_v40 = vld [vmem:[#allocation2 + $0x152] sm:$0xff] }
 0x325   : > { %2518 = vrot.lane.b32.xlu1 %v7048_v12, %s5454_s12  ;;  %2824 = vst.msk [vmem:[#allocation3 + $0x268] sm:$0xff] %vm33_vm0, %v2808_v4  ;;  %v3161_v39 = vld [vmem:[#allocation2 + $0xe2] sm:$0xff]  ;;  %v3167_v22 = vld [vmem:[#allocation2 + $0x12a] sm:$0xff]  ;;  %v2480_v34 = vpack.c.bf16 %v2457_v9, %v2456_v23  ;;  %v2652_v6 = vld [vmem:[#allocation2 + $0xf8] sm:$0xff] }
 0x326   : > { %2895 = vrot.lane.b32.xlu0 %v6900_v61, %s5454_s12  ;;  %v3183_v61 = vpack.c.bf16 %v3157_v44, %v3156_v33  ;;  %v3185_v60 = vpack.c.bf16 %v3161_v39, %v3160_v37  ;;  %v3166_v47 = vld [vmem:[#allocation2 + $0x122] sm:$0xff]  ;;  %v2651_v8 = vld [vmem:[#allocation2 + $0xf0] sm:$0xff]  ;;  %3200 = vst.msk [vmem:[#allocation3 + $0x110] sm:$0xff] %vm33_vm0, %v3184_v7  ;;  %v3171_v48 = vld [vmem:[#allocation2 + $0x15a] sm:$0xff] }
 0x327   : > { %v3188_v36 = vpack.c.bf16 %v3167_v22, %v3166_v47  ;;  %v3169_v26 = vld [vmem:[#allocation2 + $0x142] sm:$0xff]  ;;  %v3172_v38 = vld [vmem:[#allocation2 + $0x16a] sm:$0xff]  ;;  %v3173_v43 = vld [vmem:[#allocation2 + $0x172] sm:$0xff]  ;;  %v2674_v32 = vpack.c.bf16 %v2652_v6, %v2651_v8 }
 0x328   : > { %3199 = vst.msk [vmem:[#allocation3 + $0xe8] sm:$0xff] %vm33_vm0, %v3183_v61  ;;  %3201 = vst.msk [vmem:[#allocation3 + $0x138] sm:$0xff] %vm33_vm0, %v3185_v60  ;;  %v3189_v15 = vpack.c.bf16 %v3169_v26, %v3168_v53  ;;  %v3174_v11 = vld [vmem:[#allocation2 + $0x182] sm:$0xff]  ;;  %v3191_v49 = vpack.c.bf16 %v3173_v43, %v3172_v38  ;;  %v3175_v35 = vld [vmem:[#allocation2 + $0x18a] sm:$0xff] }
 0x329   : > { %2713 = vrot.lane.b32.xlu1 %v2673_v30, %s5454_s12  ;;  %3204 = vst.msk [vmem:[#allocation3 + $0x1b0] sm:$0xff] %vm33_vm0, %v3188_v36  ;;  %v3192_v31 = vpack.c.bf16 %v3175_v35, %v3174_v11  ;;  %v2458_v3 = vld [vmem:[#allocation2 + $0xd9] sm:$0xff]  ;;  %v2459_v55 = vld [vmem:[#allocation2 + $0xe1] sm:$0xff]  ;;  %v2654_v17 = vld [vmem:[#allocation2 + $0x110] sm:$0xff] }
 0x32a   : > { %3090 = vrot.lane.b32.xlu0 %v7022_v0, %s5454_s12  ;;  %v3190_v0 = vpack.c.bf16 %v3171_v48, %v3170_v40  ;;  %3205 = vst.msk [vmem:[#allocation3 + $0x1d8] sm:$0xff] %vm33_vm0, %v3189_v15  ;;  %3207 = vst.msk [vmem:[#allocation3 + $0x228] sm:$0xff] %vm33_vm0, %v3191_v49  ;;  %v2653_v14 = vld [vmem:[#allocation2 + $0x108] sm:$0xff]  ;;  %v2460_v62 = vld [vmem:[#allocation2 + $0xf1] sm:$0xff] }
 0x32b   : > { %3208 = vst.msk [vmem:[#allocation3 + $0x250] sm:$0xff] %vm33_vm0, %v3192_v31  ;;  %v2675_v5 = vpack.c.bf16 %v2654_v17, %v2653_v14  ;;  %v2461_v23 = vld [vmem:[#allocation2 + $0xf9] sm:$0xff]  ;;  %v2463_v21 = vld [vmem:[#allocation2 + $0x111] sm:$0xff]  ;;  %v3046_v4 = vld [vmem:[#allocation2 + $0x181] sm:$0xff] }
 0x32c   : > { %3206 = vst.msk [vmem:[#allocation3 + $0x200] sm:$0xff] %vm33_vm0, %v3190_v0  ;;  %v2482_v46 = vpack.c.bf16 %v2461_v23, %v2460_v62  ;;  %v2843_v13 = vld [vmem:[#allocation2 + $0xf2] sm:$0xff]  ;;  %v2844_v42 = vld [vmem:[#allocation2 + $0xfa] sm:$0xff]  ;;  %v2845_v30 = vld [vmem:[#allocation2 + $0x10a] sm:$0xff] }
 0x32d   : > { %2520 = vrot.lane.b32.xlu1 %v2480_v34, %s5454_s12  ;;  %vm7799_vm4 = vmmov %vm7798_vm3  ;;  %v2855_v44 = vld [vmem:[#allocation2 + $0x182] sm:$0xff]  ;;  %v2856_v28 = vld [vmem:[#allocation2 + $0x18a] sm:$0xff] }
 0x32e   : > { %2897 = vrot.lane.b32.xlu0 %v6906_v45, %s5454_s12  ;;  %v2481_v45 = vpack.c.bf16 %v2459_v55, %v2458_v3  ;;  %vm7800_vm5 = vmmov %vm7798_vm3  ;;  %v2872_v37 = vpack.c.bf16 %v2856_v28, %v2855_v44  ;;  %v5383_v7 = vld [vmem:[%s7783_s5 + $0x80] sm:$0xff]   ;;  %v5384_v47 = vld [vmem:[%s7783_s5 + $0xc8] sm:$0xff]  }
 0x32f   : > { %vm7801_vm6 = vmmov %vm7798_vm3  ;;  %v5399_v8 = vld [vmem:[%s7783_s5 + $0x110] sm:$0xff]   ;;  %v5400_v48 = vld [vmem:[%s7783_s5 + $0x118] sm:$0xff]  }
 0x330   : > { %vm7802_vm9 = vmmov %vm7798_vm3  ;;  %v5386_v40 = vld [vmem:[%s7783_s5 + $0xd0] sm:$0xff]   ;;  %v5388_v43 = vld [vmem:[%s7783_s5 + $0xd8] sm:$0xff]  }
 0x331   : > { %2715 = vrot.lane.b32.xlu1 %v2674_v32, %s5454_s12  ;;  %vm7803_vm10 = vmmov %vm7798_vm3  ;;  %v5387_v15 = vld [vmem:[%s7783_s5 + $0x90] sm:$0xff]   ;;  %v5389_v35 = vld [vmem:[%s7783_s5 + $0x98] sm:$0xff]  }
 0x332   : > { %3092 = vrot.lane.b32.xlu0 %v7048_v12, %s5454_s12  ;;  %v2462_v12 = vld [vmem:[#allocation2 + $0x109] sm:$0xff]  ;;  %vm7804_vm11 = vmmov %vm7798_vm3  ;;  %v2984_v32 = vld [vmem:[#allocation2 + $0x198] sm:$0xff] }
 0x333   : > { %vm7805_vm12 = vmmov %vm7798_vm3  ;;  %v2985_v31 = vld [vmem:[#allocation2 + $0x1a0] sm:$0xff] }
 0x334   : > { %vm7806_vm13 = vmmov %vm7798_vm3  ;;  %v3001_v14 = vpack.c.bf16 %v2985_v31, %v2984_v32  ;;  %v5391_v62 = vld [vmem:[%s7783_s5 + $0xa0] sm:$0xff]  }
 0x335   : > { %2522 = vrot.lane.b32.xlu1 %v2481_v45, %s5454_s12  ;;  %vm7807_vm7 = vmmov %vm7798_vm3 }
 0x336   : > { %2899 = vrot.lane.b32.xlu0 %v6914_v58, %s5454_s12  ;;  %v2483_v58 = vpack.c.bf16 %v2463_v21, %v2462_v12  ;;  %vm7808_vm8 = vmmov %vm7798_vm3  ;;  %3017 = vst.msk [vmem:[#allocation3 + $0x270] sm:$0xff] %vm33_vm0, %v3001_v14  ;;  %v5392_v12 = vld [vmem:[%s7783_s5 + $0xe8] sm:$0xff]  }
 0x337   : > { %vm7809_vm1 = vmmov %vm7798_vm3 }
 0x338   : > { %vm7810_vm2 = vmmov %vm7809_vm1 }
 0x339   : > { %2717 = vrot.lane.b32.xlu1 %v2675_v5, %s5454_s12  ;;  %vm7811_vm14 = vmmov %vm7809_vm1 }
 0x33a   : > { %3094 = vrot.lane.b32.xlu0 %v2480_v34, %s5454_s12  ;;  %v5385_v34 = vld [vmem:[%s7783_s5 + $0x88] sm:$0xff]   ;;  %vm7812_vm15 = vmmov %vm7809_vm1 }
 0x33d   : > { %2524 = vrot.lane.b32.xlu1 %v2482_v46, %s5454_s12 }
 0x33e   : > { %2901 = vrot.lane.b32.xlu0 %v6922_v51, %s5454_s12  ;;  %v2866_v51 = vpack.c.bf16 %v2844_v42, %v2843_v13  ;;  %v5393_v13 = vld [vmem:[%s7783_s5 + $0xa8] sm:$0xff]  }
 0x341   : > { %2719 = vrot.lane.b32.xlu1 %v6926_v2, %s5454_s12  ;;  %v2846_v2 = vld [vmem:[#allocation2 + $0x112] sm:$0xff] }
 0x342   : > { %3096 = vrot.lane.b32.xlu0 %v2481_v45, %s5454_s12  ;;  %v2867_v16 = vpack.c.bf16 %v2846_v2, %v2845_v30  ;;  %v5390_v45 = vld [vmem:[%s7783_s5 + $0xe0] sm:$0xff]   ;;  %v5394_v30 = vld [vmem:[%s7783_s5 + $0xf0] sm:$0xff]  }
 0x345   : > { %2526 = vrot.lane.b32.xlu1 %v2483_v58, %s5454_s12 }
 0x346   : > { %2903 = vrot.lane.b32.xlu0 %v6928_v19, %s5454_s12 }
 0x349   : > { %3098 = vrot.lane.b32.xlu1 %v2482_v46, %s5454_s12 }
 0x34a   : > { %2905 = vrot.lane.b32.xlu0 %v6933_v63, %s5454_s12 }
 0x34d   : > { %3100 = vrot.lane.b32.xlu1 %v2483_v58, %s5454_s12 }
 0x34e   : > { %2907 = vrot.lane.b32.xlu0 %v2866_v51, %s5454_s12 }
 0x351   : > { %3102 = vrot.lane.b32.xlu1 %v6852_v57, %s5454_s12  ;;  %v3047_v57 = vld [vmem:[#allocation2 + $0x189] sm:$0xff] }
 0x352   : > { %2909 = vrot.lane.b32.xlu0 %v2867_v16, %s5454_s12  ;;  %v3064_v33 = vpack.c.bf16 %v3047_v57, %v3046_v4  ;;  %v5397_v57 = vld [vmem:[%s7783_s5 + $0xf8] sm:$0xff]  }
 0x355   : > { %3104 = vrot.lane.b32.xlu1 %v6887_v25, %s5454_s12  ;;  %v3048_v25 = vld [vmem:[#allocation2 + $0x199] sm:$0xff] }
 0x356   : > { %2911 = vrot.lane.b32.xlu0 %v6942_v52, %s5454_s12  ;;  %v3049_v52 = vld [vmem:[#allocation2 + $0x1a1] sm:$0xff] }
 0x357   : > { %v3065_v9 = vpack.c.bf16 %v3049_v52, %v3048_v25 }
 0x359   : > { %3106 = vrot.lane.b32.xlu1 %v6912_v20, %s5454_s12 }
 0x35a   : > { %2913 = vrot.lane.b32.xlu0 %v6948_v59, %s5454_s12  ;;  %v2722_v19 = vpop.permute.xlu1 %2721 }
 0x35b   : > { %2757 = vst.msk [vmem:[#allocation3 + $0x1e8] sm:$0xff] %vm7798_vm3, %v2722_v19  ;;  %vm7813_vm3 = vmmov %vm7809_vm1  ;;  %v5396_v19 = vld [vmem:[%s7783_s5 + $0xb0] sm:$0xff]  }
 0x35c   : > { %v2698_v63 = vpop.permute.xlu0 %2697 }
 0x35d   : > { %2745 = vst.msk [vmem:[#allocation3 + $0x8] sm:$0xff] %vm7799_vm4, %v2698_v63  ;;  %3108 = vrot.lane.b32.xlu1 %v6946_v24, %s5454_s12  ;;  %vm7814_vm4 = vmmov %vm7809_vm1 }
 0x35e   : > { %2915 = vrot.lane.b32.xlu0 %v6950_v10, %s5454_s12 }
 0x35f   : > { %v2505_v20 = vpop.permute.xlu1 %2504 }
 0x360   : > { %2553 = vst.msk [vmem:[#allocation3] sm:$0xff] %vm7800_vm5, %v2505_v20  ;;  %v2529_v59 = vpop.permute.xlu0 %2528  ;;  %vm7815_vm5 = vmmov %vm7809_vm1  ;;  %v3176_v20 = vld [vmem:[#allocation2 + $0x19a] sm:$0xff] }
 0x361   : > { %2565 = vst.msk [vmem:[#allocation3 + $0x1e0] sm:$0xff] %vm7801_vm6, %v2529_v59  ;;  %3110 = vrot.lane.b32.xlu1 %v3064_v33, %s5454_s12  ;;  %vm7816_vm6 = vmmov %vm7809_vm1  ;;  %v3177_v33 = vld [vmem:[#allocation2 + $0x1a2] sm:$0xff]  ;;  %v5398_v59 = vld [vmem:[%s7783_s5 + $0xb8] sm:$0xff]  }
 0x362   : > { %2917 = vrot.lane.b32.xlu0 %v6956_v50, %s5454_s12  ;;  %v3271_v61 = vld [vmem:[#allocation3 + $0x1e8] sm:$0xff]  ;;  %v5395_v50 = vld [vmem:[%s7783_s5 + $0x108] sm:$0xff]   ;;  %v3193_v44 = vpack.c.bf16 %v3177_v33, %v3176_v20  ;;  %s7541_s5 = smov (%p2123_p1), 0  }
 0x363   : > { %v2700_v24 = vpop.permute.xlu1 %2699  ;;  %3754 = vmatprep.mubr.bf16.mxu1 %v3271_v61 }
 0x364   : > { %2746 = vst.msk [vmem:[#allocation3 + $0x30] sm:$0xff] %vm7802_vm9, %v2700_v24  ;;  %v2724_v10 = vpop.permute.xlu0 %2723  ;;  %v3211_v27 = vld [vmem:[#allocation3 + $0x8] sm:$0xff]  ;;  %vm7817_vm9 = vmmov %vm7809_vm1 }
 0x365   : > { %2758 = vst.msk [vmem:[#allocation3 + $0x210] sm:$0xff] %vm7803_vm10, %v2724_v10  ;;  %3658 = vmatprep.mubr.bf16.mxu0 %v3211_v27  ;;  %3112 = vrot.lane.b32.xlu1 %v3065_v9, %s5454_s12  ;;  %vm7818_vm10 = vmmov %vm7809_vm1 }
 0x366   : > { %2919 = vrot.lane.b32.xlu0 %v2872_v37, %s5454_s12  ;;  %3209 = vst.msk [vmem:[#allocation3 + $0x278] sm:$0xff] %vm33_vm0, %v3193_v44 }
 0x367   : > { %v2507_v39 = vpop.permute.xlu1 %2506  ;;  %v3210_v60 = vld [vmem:[#allocation3] sm:$0xff] }
 0x368   : > { %v2531_v22 = vpop.permute.xlu0 %2530  ;;  %2554 = vst.msk [vmem:[#allocation3 + $0x28] sm:$0xff] %vm7804_vm11, %v2507_v39  ;;  %3659 = vmatmul.mubr.bf16.vlgmr.msra.gmra.mrb[0].mxu0 %v3210_v60  ;;  %v3270_v53 = vld [vmem:[#allocation3 + $0x1e0] sm:$0xff]  ;;  %vm7819_vm11 = vmmov %vm7809_vm1 }
 0x369   : > { %2566 = vst.msk [vmem:[#allocation3 + $0x208] sm:$0xff] %vm7805_vm12, %v2531_v22  ;;  %3755 = vmatmul.mubr.bf16.vlgmr.msra.gmra.mrb[0].mxu1 %v3270_v53  ;;  %5224 = vmatpush3.bf16.msra.mxu0 %v6968_v29  ;;  %vm7820_vm12 = vmmov %vm7809_vm1 }
 0x36a   : > { %5052 = vmatpush3.bf16.msra.mxu1 %v5383_v7  ;;  %5225 = vmatprep.subr.bf16.mxu0 %v5395_v50 }
 0x36b   : > { %5053 = vmatprep.subr.bf16.mxu1 %v5384_v47  ;;  %v2702_v36 = vpop.permute.xlu1 %2701  ;;  %v3216_v26 = vld [vmem:[#allocation3 + $0x30] sm:$0xff] }
 0x36c   : > { %v2726_v6 = vpop.permute.xlu0 %2725  ;;  %2747 = vst.msk [vmem:[#allocation3 + $0x58] sm:$0xff] %vm7806_vm13, %v2702_v36  ;;  %3666 = vmatprep.mubr.bf16.mxu0 %v3216_v26  ;;  %v3276_v29 = vld [vmem:[#allocation3 + $0x210] sm:$0xff]  ;;  %vm7821_vm13 = vmmov %vm7809_vm1 }
 0x36d   : > { %2759 = vst.msk [vmem:[#allocation3 + $0x238] sm:$0xff] %vm7807_vm7, %v2726_v6  ;;  %3762 = vmatprep.mubr.bf16.mxu1 %v3276_v29  ;;  %5226 = vmatpush3.bf16.msra.mxu0 %v5395_v50  ;;  %vm7822_vm7 = vmmov %vm7809_vm1 }
 0x36e   : > { %5054 = vmatpush3.bf16.msra.mxu1 %v5385_v34  ;;  %5227 = vmatprep.subr.bf16.mxu0 %v5399_v8 }
 0x36f   : > { %5055 = vmatprep.subr.bf16.mxu1 %v5386_v40  ;;  %v2509_v38 = vpop.permute.xlu1 %2508  ;;  %v3215_v0 = vld [vmem:[#allocation3 + $0x28] sm:$0xff] }
 0x370   : > { %v2533_v11 = vpop.permute.xlu0 %2532  ;;  %2555 = vst.msk [vmem:[#allocation3 + $0x50] sm:$0xff] %vm7808_vm8, %v2509_v38  ;;  %3667 = vmatmul.mubr.bf16.gmra.mrb[4].mxu0 %v3215_v0  ;;  %v3275_v49 = vld [vmem:[#allocation3 + $0x208] sm:$0xff]  ;;  %vm7823_vm8 = vmmov %vm7809_vm1 }
 0x371   : > { %2567 = vst.msk [vmem:[#allocation3 + $0x230] sm:$0xff] %vm7809_vm1, %v2533_v11  ;;  %3763 = vmatmul.mubr.bf16.gmra.mrb[4].mxu1 %v3275_v49  ;;  %5228 = vmatpush3.bf16.msra.mxu0 %v5399_v8 }
 0x372   : > { %5056 = vmatpush3.bf16.msra.mxu1 %v5387_v15  ;;  %5229 = vmatprep.subr.bf16.mxu0 %v5400_v48 }
 0x373   : > { %5057 = vmatprep.subr.bf16.mxu1 %v5388_v43  ;;  %v2704_v3 = vpop.permute.xlu1 %2703  ;;  %v3221_v55 = vld [vmem:[#allocation3 + $0x58] sm:$0xff] }
 0x374   : > { %v2728_v17 = vpop.permute.xlu0 %2727  ;;  %2748 = vst.msk [vmem:[#allocation3 + $0x80] sm:$0xff] %vm7810_vm2, %v2704_v3  ;;  %3674 = vmatprep.mubr.bf16.mxu0 %v3221_v55  ;;  %v3281_v5 = vld [vmem:[#allocation3 + $0x238] sm:$0xff]  ;;  %vm7824_vm2 = vmmov %vm7809_vm1 }
 0x375   : > { %2760 = vst.msk [vmem:[#allocation3 + $0x260] sm:$0xff] %vm7811_vm14, %v2728_v17  ;;  %3770 = vmatprep.mubr.bf16.mxu1 %v3281_v5  ;;  %5230 = vmatpush3.bf16.msra.mxu0 %v5400_v48  ;;  %vm7825_vm14 = vmmov %vm7809_vm1 }
 0x376   : > { %5058 = vmatpush3.bf16.msra.mxu1 %v5389_v35 }
 0x377   : > { %5059 = vmatprep.subr.bf16.mxu1 %v5390_v45  ;;  %v2511_v23 = vpop.permute.xlu1 %2510  ;;  %v3220_v46 = vld [vmem:[#allocation3 + $0x50] sm:$0xff] }
 0x378   : > { %v2535_v21 = vpop.permute.xlu0 %2534  ;;  %2556 = vst.msk [vmem:[#allocation3 + $0x78] sm:$0xff] %vm7812_vm15, %v2511_v23  ;;  %3675 = vmatmul.mubr.bf16.gmra.mrb[8].mxu0 %v3220_v46  ;;  %v3280_v58 = vld [vmem:[#allocation3 + $0x230] sm:$0xff]  ;;  %vm7826_vm15 = vmmov %vm7809_vm1 }
 0x379   : > { %2568 = vst.msk [vmem:[#allocation3 + $0x258] sm:$0xff] %vm7813_vm3, %v2535_v21  ;;  %3771 = vmatmul.mubr.bf16.gmra.mrb[8].mxu1 %v3280_v58  ;;  %vm7827_vm3 = vmmov %vm7809_vm1 }
 0x37a   : > { %5060 = vmatpush3.bf16.msra.mxu1 %v5391_v62 }
 0x37b   : > { %5061 = vmatprep.subr.bf16.mxu1 %v5392_v12  ;;  %v2706_v42 = vpop.permute.xlu1 %2705  ;;  %v3226_v51 = vld [vmem:[#allocation3 + $0x80] sm:$0xff] }
 0x37c   : > { %v3083_v2 = vpop.permute.xlu0 %3082  ;;  %2749 = vst.msk [vmem:[#allocation3 + $0xa8] sm:$0xff] %vm7814_vm4, %v2706_v42  ;;  %3682 = vmatprep.mubr.bf16.mxu0 %v3226_v51  ;;  %v3286_v16 = vld [vmem:[#allocation3 + $0x260] sm:$0xff]  ;;  %vm7828_vm4 = vmmov %vm7809_vm1 }
 0x37d   : > { %3130 = vst.msk [vmem:[#allocation3 + $0x18] sm:$0xff] %vm7815_vm5, %v3083_v2  ;;  %3778 = vmatprep.mubr.bf16.mxu1 %v3286_v16  ;;  %vm7829_vm5 = vmmov %vm7809_vm1 }
 0x37e   : > { %5062 = vmatpush3.bf16.msra.mxu1 %v5393_v13 }
 0x37f   : > { %5063 = vmatprep.subr.bf16.mxu1 %v5394_v30  ;;  %v2513_v63 = vpop.permute.xlu1 %2512  ;;  %v3225_v4 = vld [vmem:[#allocation3 + $0x78] sm:$0xff] }
 0x380   : > { %v2890_v25 = vpop.permute.xlu0 %2889  ;;  %2557 = vst.msk [vmem:[#allocation3 + $0xa0] sm:$0xff] %vm7816_vm6, %v2513_v63  ;;  %3683 = vmatmul.mubr.bf16.gmra.mrb[12].mxu0 %v3225_v4  ;;  %v3285_v52 = vld [vmem:[#allocation3 + $0x258] sm:$0xff]  ;;  %vm7830_vm6 = vmmov %vm7809_vm1 }
 0x381   : > { %2937 = vst.msk [vmem:[#allocation3 + $0x10] sm:$0xff] %vm7817_vm9, %v2890_v25  ;;  %3779 = vmatmul.mubr.bf16.gmra.mrb[12].mxu1 %v3285_v52  ;;  %vm7831_vm9 = vmmov %vm7809_vm1 }
 0x382   : > { %5064 = vmatpush3.bf16.msra.mxu1 %v5396_v19 }
 0x383   : > { %5065 = vmatprep.subr.bf16.mxu1 %v5397_v57  ;;  %v2708_v28 = vpop.permute.xlu1 %2707  ;;  %v3231_v9 = vld [vmem:[#allocation3 + $0xa8] sm:$0xff] }
 0x384   : > { %v3085_v24 = vpop.permute.xlu0 %3084  ;;  %2750 = vst.msk [vmem:[#allocation3 + $0xd0] sm:$0xff] %vm7818_vm10, %v2708_v28  ;;  %v3213_v61 = vld [vmem:[#allocation3 + $0x18] sm:$0xff]  ;;  %3690 = vmatprep.mubr.bf16.mxu0 %v3231_v9  ;;  %vm7832_vm10 = vmmov %vm7809_vm1 }
 0x385   : > { %3131 = vst.msk [vmem:[#allocation3 + $0x40] sm:$0xff] %vm7819_vm11, %v3085_v24  ;;  %3819 = vmatprep.mubr.bf16.mxu1 %v3213_v61  ;;  %vm7833_vm11 = vmmov %vm7809_vm1 }
 0x386   : > { %5066 = vmatpush3.bf16.msra.mxu1 %v5398_v59 }
 0x387   : > { %v2515_v10 = vpop.permute.xlu1 %2514  ;;  %v3230_v27 = vld [vmem:[#allocation3 + $0xa0] sm:$0xff] }
 0x388   : > { %v2892_v37 = vpop.permute.xlu0 %2891  ;;  %2558 = vst.msk [vmem:[#allocation3 + $0xc8] sm:$0xff] %vm7820_vm12, %v2515_v10  ;;  %3691 = vmatmul.mubr.bf16.gmra.mrb[16].mxu0 %v3230_v27  ;;  %v3212_v7 = vld [vmem:[#allocation3 + $0x10] sm:$0xff]  ;;  %vm7834_vm12 = vmmov %vm7809_vm1  ;;  %v3214_v27 = vld [vmem:[#allocation3 + $0x20] sm:$0xff] }
 0x389   : > { %2938 = vst.msk [vmem:[#allocation3 + $0x38] sm:$0xff] %vm7821_vm13, %v2892_v37  ;;  %3820 = vmatmul.mubr.bf16.vlgmr.msra.gmra.mrb[16].mxu1 %v3212_v7  ;;  %vm7835_vm13 = vmmov %vm7809_vm1 }
 0x38b   : > { %v2710_v50 = vpop.permute.xlu1 %2709  ;;  %v3236_v39 = vld [vmem:[#allocation3 + $0xd0] sm:$0xff] }
 0x38c   : > { %v3087_v60 = vpop.permute.xlu0 %3086  ;;  %2751 = vst.msk [vmem:[#allocation3 + $0xf8] sm:$0xff] %vm7822_vm7, %v2710_v50  ;;  %3698 = vmatprep.mubr.bf16.mxu0 %v3236_v39  ;;  %v3218_v47 = vld [vmem:[#allocation3 + $0x40] sm:$0xff]  ;;  %vm7836_vm7 = vmmov %vm7809_vm1 }
 0x38d   : > { %3132 = vst.msk [vmem:[#allocation3 + $0x68] sm:$0xff] %vm7823_vm8, %v3087_v60  ;;  %3827 = vmatprep.mubr.bf16.mxu1 %v3218_v47  ;;  %vm7837_vm8 = vmmov %vm7809_vm1  ;;  %v3219_v60 = vld [vmem:[#allocation3 + $0x48] sm:$0xff] }
 0x38f   : > { %v2517_v22 = vpop.permute.xlu1 %2516  ;;  %v3235_v53 = vld [vmem:[#allocation3 + $0xc8] sm:$0xff] }
 0x390   : > { %v2894_v34 = vpop.permute.xlu0 %2893  ;;  %2559 = vst.msk [vmem:[#allocation3 + $0xf0] sm:$0xff] %vm7809_vm1, %v2517_v22  ;;  %3699 = vmatmul.mubr.bf16.gmra.mrb[20].mxu0 %v3235_v53  ;;  %v3217_v8 = vld [vmem:[#allocation3 + $0x38] sm:$0xff] }
 0x391   : > { %2939 = vst.msk [vmem:[#allocation3 + $0x60] sm:$0xff] %vm7824_vm2, %v2894_v34  ;;  %3828 = vmatmul.mubr.bf16.gmra.mrb[20].mxu1 %v3217_v8  ;;  %vm7838_vm2 = vmmov %vm7809_vm1  ;;  %v3224_v34 = vld [vmem:[#allocation3 + $0x70] sm:$0xff] }
 0x393   : > { %v2712_v36 = vpop.permute.xlu1 %2711  ;;  %v3241_v26 = vld [vmem:[#allocation3 + $0xf8] sm:$0xff] }
 0x394   : > { %v3089_v40 = vpop.permute.xlu0 %3088  ;;  %2752 = vst.msk [vmem:[#allocation3 + $0x120] sm:$0xff] %vm7825_vm14, %v2712_v36  ;;  %3706 = vmatprep.mubr.bf16.mxu0 %v3241_v26  ;;  %v3223_v6 = vld [vmem:[#allocation3 + $0x68] sm:$0xff]  ;;  %vm7839_vm14 = vmmov %vm7809_vm1 }
 0x395   : > { %3133 = vst.msk [vmem:[#allocation3 + $0x90] sm:$0xff] %vm7826_vm15, %v3089_v40  ;;  %3835 = vmatprep.mubr.bf16.mxu1 %v3223_v6  ;;  %vm7840_vm15 = vmmov %vm7809_vm1  ;;  %v3229_v40 = vld [vmem:[#allocation3 + $0x98] sm:$0xff] }
 0x397   : > { %v2519_v29 = vpop.permute.xlu1 %2518  ;;  %v3240_v15 = vld [vmem:[#allocation3 + $0xf0] sm:$0xff] }
 0x398   : > { %v2896_v48 = vpop.permute.xlu0 %2895  ;;  %2560 = vst.msk [vmem:[#allocation3 + $0x118] sm:$0xff] %vm7827_vm3, %v2519_v29  ;;  %3707 = vmatmul.mubr.bf16.gmra.mrb[24].mxu0 %v3240_v15  ;;  %v3222_v38 = vld [vmem:[#allocation3 + $0x60] sm:$0xff]  ;;  %vm7841_vm3 = vmmov %vm7809_vm1 }
 0x399   : > { %2940 = vst.msk [vmem:[#allocation3 + $0x88] sm:$0xff] %vm7828_vm4, %v2896_v48  ;;  %3836 = vmatmul.mubr.bf16.gmra.mrb[24].mxu1 %v3222_v38  ;;  %vm7842_vm4 = vmmov %vm7809_vm1  ;;  %v3234_v15 = vld [vmem:[#allocation3 + $0xc0] sm:$0xff] }
 0x39b   : > { %v2714_v0 = vpop.permute.xlu1 %2713  ;;  %v3246_v43 = vld [vmem:[#allocation3 + $0x120] sm:$0xff] }
 0x39c   : > { %v3091_v11 = vpop.permute.xlu0 %3090  ;;  %2753 = vst.msk [vmem:[#allocation3 + $0x148] sm:$0xff] %vm7829_vm5, %v2714_v0  ;;  %3714 = vmatprep.mubr.bf16.mxu0 %v3246_v43  ;;  %v3228_v49 = vld [vmem:[#allocation3 + $0x90] sm:$0xff]  ;;  %vm7843_vm5 = vmmov %vm7809_vm1  ;;  %v3239_v43 = vld [vmem:[#allocation3 + $0xe8] sm:$0xff] }
 0x39d   : > { %3134 = vst.msk [vmem:[#allocation3 + $0xb8] sm:$0xff] %vm7830_vm6, %v3091_v11  ;;  %3843 = vmatprep.mubr.bf16.mxu1 %v3228_v49  ;;  %vm7844_vm6 = vmmov %vm7809_vm1 }
 0x39f   : > { %v2521_v35 = vpop.permute.xlu1 %2520  ;;  %v3245_v32 = vld [vmem:[#allocation3 + $0x118] sm:$0xff] }
 0x3a0   : > { %v2898_v31 = vpop.permute.xlu0 %2897  ;;  %2561 = vst.msk [vmem:[#allocation3 + $0x140] sm:$0xff] %vm7831_vm9, %v2521_v35  ;;  %3715 = vmatmul.mubr.bf16.gmra.mrb[28].mxu0 %v3245_v32  ;;  %v3227_v3 = vld [vmem:[#allocation3 + $0x88] sm:$0xff]  ;;  %vm7845_vm9 = vmmov %vm7809_vm1  ;;  %v3244_v32 = vld [vmem:[#allocation3 + $0x110] sm:$0xff] }
 0x3a1   : > { %2941 = vst.msk [vmem:[#allocation3 + $0xb0] sm:$0xff] %vm7832_vm10, %v2898_v31  ;;  %3844 = vmatmul.mubr.bf16.gmra.mrb[28].mxu1 %v3227_v3  ;;  %vm7846_vm10 = vmmov %vm7809_vm1  ;;  %v3249_v3 = vld [vmem:[#allocation3 + $0x138] sm:$0xff] }
 0x3a3   : > { %v2716_v55 = vpop.permute.xlu1 %2715  ;;  %v3251_v45 = vld [vmem:[#allocation3 + $0x148] sm:$0xff] }
 0x3a4   : > { %v3093_v14 = vpop.permute.xlu0 %3092  ;;  %2754 = vst.msk [vmem:[#allocation3 + $0x170] sm:$0xff] %vm7833_vm11, %v2716_v55  ;;  %3722 = vmatprep.mubr.bf16.mxu0 %v3251_v45  ;;  %v3233_v17 = vld [vmem:[#allocation3 + $0xb8] sm:$0xff]  ;;  %vm7847_vm11 = vmmov %vm7809_vm1  ;;  %v3254_v45 = vld [vmem:[#allocation3 + $0x160] sm:$0xff] }
 0x3a5   : > { %3135 = vst.msk [vmem:[#allocation3 + $0xe0] sm:$0xff] %vm7834_vm12, %v3093_v14  ;;  %3851 = vmatprep.mubr.bf16.mxu1 %v3233_v17  ;;  %vm7848_vm12 = vmmov %vm7809_vm1  ;;  %v3259_v17 = vld [vmem:[#allocation3 + $0x188] sm:$0xff] }
 0x3a7   : > { %v2523_v5 = vpop.permute.xlu1 %2522  ;;  %v3250_v62 = vld [vmem:[#allocation3 + $0x140] sm:$0xff] }
 0x3a8   : > { %v2900_v23 = vpop.permute.xlu0 %2899  ;;  %2562 = vst.msk [vmem:[#allocation3 + $0x168] sm:$0xff] %vm7835_vm13, %v2523_v5  ;;  %3723 = vmatmul.mubr.bf16.gmra.mrb[32].mxu0 %v3250_v62  ;;  %v3232_v46 = vld [vmem:[#allocation3 + $0xb0] sm:$0xff]  ;;  %vm7849_vm13 = vmmov %vm7809_vm1 }
 0x3a9   : > { %2942 = vst.msk [vmem:[#allocation3 + $0xd8] sm:$0xff] %vm7836_vm7, %v2900_v23  ;;  %3852 = vmatmul.mubr.bf16.gmra.mrb[32].mxu1 %v3232_v46  ;;  %vm7850_vm7 = vmmov %vm7809_vm1  ;;  %v3264_v62 = vld [vmem:[#allocation3 + $0x1b0] sm:$0xff]  ;;  %v3269_v46 = vld [vmem:[#allocation3 + $0x1d8] sm:$0xff] }
 0x3ab   : > { %v2718_v12 = vpop.permute.xlu1 %2717  ;;  %v3256_v21 = vld [vmem:[#allocation3 + $0x170] sm:$0xff] }
 0x3ac   : > { %v3095_v58 = vpop.permute.xlu0 %3094  ;;  %2755 = vst.msk [vmem:[#allocation3 + $0x198] sm:$0xff] %vm7837_vm8, %v2718_v12  ;;  %3730 = vmatprep.mubr.bf16.mxu0 %v3256_v21  ;;  %v3238_v13 = vld [vmem:[#allocation3 + $0xe0] sm:$0xff]  ;;  %vm7851_vm8 = vmmov %vm7809_vm1 }
 0x3ad   : > { %3136 = vst.msk [vmem:[#allocation3 + $0x108] sm:$0xff] %vm7809_vm1, %v3095_v58  ;;  %3859 = vmatprep.mubr.bf16.mxu1 %v3238_v13  ;;  %v3274_v21 = vld [vmem:[#allocation3 + $0x200] sm:$0xff]  ;;  %v3279_v13 = vld [vmem:[#allocation3 + $0x228] sm:$0xff] }
 0x3af   : > { %v2525_v42 = vpop.permute.xlu1 %2524  ;;  %v3255_v51 = vld [vmem:[#allocation3 + $0x168] sm:$0xff] }
 0x3b0   : > { %v2902_v30 = vpop.permute.xlu0 %2901  ;;  %2563 = vst.msk [vmem:[#allocation3 + $0x190] sm:$0xff] %vm7838_vm2, %v2525_v42  ;;  %3731 = vmatmul.mubr.bf16.gmra.mrb[36].mxu0 %v3255_v51  ;;  %v3237_v2 = vld [vmem:[#allocation3 + $0xd8] sm:$0xff]  ;;  %vm7852_vm2 = vmmov %vm7809_vm1 }
 0x3b1   : > { %2943 = vst.msk [vmem:[#allocation3 + $0x100] sm:$0xff] %vm7839_vm14, %v2902_v30  ;;  %3860 = vmatmul.mubr.bf16.gmra.mrb[36].mxu1 %v3237_v2  ;;  %vm7853_vm14 = vmmov %vm7809_vm1  ;;  %v3284_v30 = vld [vmem:[#allocation3 + $0x250] sm:$0xff]  ;;  %v3289_v2 = vld [vmem:[#allocation3 + $0x278] sm:$0xff] }
 0x3b3   : > { %v2720_v16 = vpop.permute.xlu1 %2719  ;;  %v3261_v19 = vld [vmem:[#allocation3 + $0x198] sm:$0xff] }
 0x3b4   : > { %v3097_v63 = vpop.permute.xlu0 %3096  ;;  %2756 = vst.msk [vmem:[#allocation3 + $0x1c0] sm:$0xff] %vm7840_vm15, %v2720_v16  ;;  %3738 = vmatprep.mubr.bf16.mxu0 %v3261_v19  ;;  %v3243_v4 = vld [vmem:[#allocation3 + $0x108] sm:$0xff]  ;;  %vm7854_vm15 = vmmov %vm7809_vm1 }
 0x3b5   : > { %3137 = vst.msk [vmem:[#allocation3 + $0x130] sm:$0xff] %vm7841_vm3, %v3097_v63  ;;  %3867 = vmatprep.mubr.bf16.mxu1 %v3243_v4  ;;  %vm7855_vm3 = vmmov %vm7809_vm1 }
 0x3b7   : > { %v2527_v57 = vpop.permute.xlu1 %2526  ;;  %v3260_v25 = vld [vmem:[#allocation3 + $0x190] sm:$0xff] }
 0x3b8   : > { %v2904_v52 = vpop.permute.xlu0 %2903  ;;  %2564 = vst.msk [vmem:[#allocation3 + $0x1b8] sm:$0xff] %vm7842_vm4, %v2527_v57  ;;  %3739 = vmatmul.mubr.bf16.gmra.mrb[40].mxu0 %v3260_v25  ;;  %v3242_v20 = vld [vmem:[#allocation3 + $0x100] sm:$0xff]  ;;  %vm7856_vm4 = vmmov %vm7809_vm1 }
 0x3b9   : > { %2944 = vst.msk [vmem:[#allocation3 + $0x128] sm:$0xff] %vm7843_vm5, %v2904_v52  ;;  %3868 = vmatmul.mubr.bf16.gmra.mrb[40].mxu1 %v3242_v20  ;;  %vm7857_vm5 = vmmov %vm7809_vm1 }
 0x3bb   : > { %v3099_v33 = vpop.permute.xlu1 %3098  ;;  %v3266_v59 = vld [vmem:[#allocation3 + $0x1c0] sm:$0xff] }
 0x3bc   : > { %v2906_v44 = vpop.permute.xlu0 %2905  ;;  %3138 = vst.msk [vmem:[#allocation3 + $0x158] sm:$0xff] %vm7844_vm6, %v3099_v33  ;;  %3746 = vmatprep.mubr.bf16.mxu0 %v3266_v59  ;;  %v3248_v28 = vld [vmem:[#allocation3 + $0x130] sm:$0xff]  ;;  %vm7858_vm6 = vmmov %vm7809_vm1 }
 0x3bd   : > { %2945 = vst.msk [vmem:[#allocation3 + $0x150] sm:$0xff] %vm7845_vm9, %v2906_v44  ;;  %3875 = vmatprep.mubr.bf16.mxu1 %v3248_v28  ;;  %vm7859_vm9 = vcmask 516096  }
 0x3bf   : > { %v3101_v9 = vpop.permute.xlu1 %3100  ;;  %v3265_v24 = vld [vmem:[#allocation3 + $0x1b8] sm:$0xff] }
 0x3c0   : > { %v2908_v61 = vpop.permute.xlu0 %2907  ;;  %3139 = vst.msk [vmem:[#allocation3 + $0x180] sm:$0xff] %vm7846_vm10, %v3101_v9  ;;  %3747 = vmatmul.mubr.bf16.gmra.mrb[44].mxu0 %v3265_v24  ;;  %v3247_v10 = vld [vmem:[#allocation3 + $0x128] sm:$0xff]  ;;  %vm7860_vm10 = vmmov %vm7859_vm9 }
 0x3c1   : > { %2946 = vst.msk [vmem:[#allocation3 + $0x178] sm:$0xff] %vm7847_vm11, %v2908_v61  ;;  %3876 = vmatmul.mubr.bf16.gmra.mrb[44].mxu1 %v3247_v10  ;;  %5231 = vmatprep.mubr.msk.bf16.mxu0 %vm33_vm0, %v3214_v27 }
 0x3c3   : > { %v3103_v37 = vpop.permute.xlu1 %3102  ;;  %v3253_v7 = vld [vmem:[#allocation3 + $0x158] sm:$0xff] }
 0x3c4   : > { %v2910_v50 = vpop.permute.xlu0 %2909  ;;  %3140 = vst.msk [vmem:[#allocation3 + $0x1a8] sm:$0xff] %vm7848_vm12, %v3103_v37  ;;  %3883 = vmatprep.mubr.bf16.mxu1 %v3253_v7  ;;  %v3252_v53 = vld [vmem:[#allocation3 + $0x150] sm:$0xff] }
 0x3c5   : > { %2947 = vst.msk [vmem:[#allocation3 + $0x1a0] sm:$0xff] %vm7849_vm13, %v2910_v50 }
 0x3c7   : > { %v3105_v39 = vpop.permute.xlu1 %3104  ;;  %v3258_v47 = vld [vmem:[#allocation3 + $0x180] sm:$0xff] }
 0x3c8   : > { %v2912_v22 = vpop.permute.xlu0 %2911  ;;  %3141 = vst.msk [vmem:[#allocation3 + $0x1d0] sm:$0xff] %vm7850_vm7, %v3105_v39  ;;  %5232 = vmatmul.mubr.msk.bf16.vlgmr.msra.gmra.mrb[48].mxu0 %vm33_vm0, %v3219_v60  ;;  %v3257_v29 = vld [vmem:[#allocation3 + $0x178] sm:$0xff] }
 0x3c9   : > { %2948 = vst.msk [vmem:[#allocation3 + $0x1c8] sm:$0xff] %vm7851_vm8, %v2912_v22  ;;  %3884 = vmatmul.mubr.bf16.gmra.mrb[48].mxu1 %v3252_v53  ;;  %5235 = vmatprep.mubr.msk.bf16.mxu0 %vm33_vm0, %v3224_v34 }
 0x3ca   : > { %3891 = vmatprep.mubr.bf16.mxu1 %v3258_v47 }
 0x3cb   : > { %v3107_v8 = vpop.permute.xlu1 %3106  ;;  %v3263_v48 = vld [vmem:[#allocation3 + $0x1a8] sm:$0xff] }
 0x3cc   : > { %v2914_v36 = vpop.permute.xlu0 %2913  ;;  %3142 = vst.msk [vmem:[#allocation3 + $0x1f8] sm:$0xff] %vm7809_vm1, %v3107_v8  ;;  %v3262_v35 = vld [vmem:[#allocation3 + $0x1a0] sm:$0xff] }
 0x3cd   : > { %2949 = vst.msk [vmem:[#allocation3 + $0x1f0] sm:$0xff] %vm7852_vm2, %v2914_v36 }
 0x3cf   : > { %v3109_v26 = vpop.permute.xlu1 %3108  ;;  %v3268_v31 = vld [vmem:[#allocation3 + $0x1d0] sm:$0xff] }
 0x3d0   : > { %v2916_v6 = vpop.permute.xlu0 %2915  ;;  %3143 = vst.msk [vmem:[#allocation3 + $0x220] sm:$0xff] %vm7853_vm14, %v3109_v26  ;;  %5236 = vmatmul.mubr.msk.bf16.gmra.mrb[52].mxu0 %vm33_vm0, %v3229_v40  ;;  %v3267_v55 = vld [vmem:[#allocation3 + $0x1c8] sm:$0xff] }
 0x3d1   : > { %2950 = vst.msk [vmem:[#allocation3 + $0x218] sm:$0xff] %vm7854_vm15, %v2916_v6  ;;  %3892 = vmatmul.mubr.bf16.gmra.mrb[52].mxu1 %v3257_v29  ;;  %5239 = vmatprep.mubr.msk.bf16.mxu0 %vm33_vm0, %v3234_v15 }
 0x3d2   : > { %3899 = vmatprep.mubr.bf16.mxu1 %v3263_v48 }
 0x3d3   : > { %v3111_v38 = vpop.permute.xlu1 %3110  ;;  %v3273_v14 = vld [vmem:[#allocation3 + $0x1f8] sm:$0xff] }
 0x3d4   : > { %v2918_v0 = vpop.permute.xlu0 %2917  ;;  %3144 = vst.msk [vmem:[#allocation3 + $0x248] sm:$0xff] %vm7855_vm3, %v3111_v38  ;;  %v3272_v5 = vld [vmem:[#allocation3 + $0x1f0] sm:$0xff] }
 0x3d5   : > { %2951 = vst.msk [vmem:[#allocation3 + $0x240] sm:$0xff] %vm7856_vm4, %v2918_v0 }
 0x3d7   : > { %v3113_v11 = vpop.permute.xlu1 %3112  ;;  %v3278_v23 = vld [vmem:[#allocation3 + $0x220] sm:$0xff] }
 0x3d8   : > { %v2920_v49 = vpop.permute.xlu0 %2919  ;;  %5240 = vmatmul.mubr.msk.bf16.gmra.mrb[56].mxu0 %vm33_vm0, %v3239_v43  ;;  %3145 = vst.msk [vmem:[#allocation3 + $0x270] sm:$0xff] %vm7857_vm5, %v3113_v11  ;;  %v3277_v12 = vld [vmem:[#allocation3 + $0x218] sm:$0xff] }
 0x3d9   : > { %2952 = vst.msk [vmem:[#allocation3 + $0x268] sm:$0xff] %vm7858_vm6, %v2920_v49  ;;  %3900 = vmatmul.mubr.bf16.gmra.mrb[56].mxu1 %v3262_v35  ;;  %5243 = vmatprep.mubr.msk.bf16.mxu0 %vm33_vm0, %v3244_v32 }
 0x3da   : > { %3907 = vmatprep.mubr.bf16.mxu1 %v3268_v31 }
 0x3db   : > { %v3283_v58 = vld [vmem:[#allocation3 + $0x248] sm:$0xff] }
 0x3dc   : > { %v3282_v51 = vld [vmem:[#allocation3 + $0x240] sm:$0xff] }
 0x3df   : > { %v3288_v42 = vld [vmem:[#allocation3 + $0x270] sm:$0xff] }
 0x3e0   : > { %5244 = vmatmul.mubr.msk.bf16.gmra.mrb[60].mxu0 %vm33_vm0, %v3249_v3  ;;  %v3287_v16 = vld [vmem:[#allocation3 + $0x268] sm:$0xff] }
 0x3e1   : > { %3908 = vmatmul.mubr.bf16.gmra.mrb[60].mxu1 %v3267_v55  ;;  %5247 = vmatprep.mubr.msk.bf16.mxu0 %vm33_vm0, %v3254_v45 }
 0x3e2   : > { %3915 = vmatprep.mubr.bf16.mxu1 %v3273_v14 }
 0x3e8   : > { %5248 = vmatmul.mubr.msk.bf16.gmra.mrb[64].mxu0 %vm33_vm0, %v3259_v17 }
 0x3e9   : > { %3916 = vmatmul.mubr.bf16.gmra.mrb[64].mxu1 %v3272_v5  ;;  %5251 = vmatprep.mubr.msk.bf16.mxu0 %vm33_vm0, %v3264_v62 }
 0x3ea   : > { %3923 = vmatprep.mubr.bf16.mxu1 %v3278_v23 }
 0x3f0   : > { %5252 = vmatmul.mubr.msk.bf16.gmra.mrb[68].mxu0 %vm33_vm0, %v3269_v46 }
 0x3f1   : > { %3924 = vmatmul.mubr.bf16.gmra.mrb[68].mxu1 %v3277_v12  ;;  %5255 = vmatprep.mubr.msk.bf16.mxu0 %vm33_vm0, %v3274_v21 }
 0x3f2   : > { %3931 = vmatprep.mubr.bf16.mxu1 %v3283_v58 }
 0x3f8   : > { %5256 = vmatmul.mubr.msk.bf16.gmra.mrb[72].mxu0 %vm33_vm0, %v3279_v13 }
 0x3f9   : > { %3932 = vmatmul.mubr.bf16.gmra.mrb[72].mxu1 %v3282_v51  ;;  %5259 = vmatprep.mubr.msk.bf16.mxu0 %vm33_vm0, %v3284_v30 }
 0x3fa   : > { %3939 = vmatprep.mubr.bf16.mxu1 %v3288_v42 }
 0x400   : > { %5260 = vmatmul.mubr.msk.bf16.gmra.mrb[76].mxu0 %vm33_vm0, %v3289_v2 }
 0x401   : > { %3940 = vmatmul.mubr.bf16.gmra.mrb[76].mxu1 %v3287_v16 }
 0x43b   : > { %v4955_v19 = vpop.f32.mrb[0].mxu0 }
 0x43c   : > { %v5027_v63 = vpop.f32.mrb[0].mxu1  ;;  %v4956_v4 = vpop.f32.mrb[1].mxu0 }
 0x43d   : > { %v4957_v57 = vadd.f32 %v4956_v4, %v4955_v19  ;;  %v5028_v25 = vpop.f32.mrb[1].mxu1  ;;  %v4958_v52 = vpop.f32.mrb[2].mxu0 }
 0x43e   : > { %v7258_v20 = vadd.f32 %v5028_v25, %v5027_v63  ;;  %v5030_v33 = vpop.f32.mrb[2].mxu1  ;;  %v4959_v59 = vpop.f32.mrb[3].mxu0 }
 0x43f   : > { %v4960_v44 = vadd.f32 %v4959_v59, %v4958_v52  ;;  %v5031_v28 = vpop.f32.mrb[3].mxu1 }
 0x440   : > { %v7260_v9 = vadd.f32 %v5031_v28, %v5030_v33 }
 0x443   : > { %v4961_v24 = vpop.f32.mrb[4].mxu0 }
 0x444   : > { %v5033_v61 = vpop.f32.mrb[4].mxu1  ;;  %v4962_v10 = vpop.f32.mrb[5].mxu0 }
 0x445   : > { %v4963_v27 = vadd.f32 %v4962_v10, %v4961_v24  ;;  %v5034_v37 = vpop.f32.mrb[5].mxu1  ;;  %v4964_v7 = vpop.f32.mrb[6].mxu0 }
 0x446   : > { %v7262_v50 = vadd.f32 %v5034_v37, %v5033_v61  ;;  %v5036_v39 = vpop.f32.mrb[6].mxu1  ;;  %v4965_v60 = vpop.f32.mrb[7].mxu0 }
 0x447   : > { %v4966_v47 = vadd.f32 %v4965_v60, %v4964_v7  ;;  %v5037_v22 = vpop.f32.mrb[7].mxu1 }
 0x448   : > { %v7264_v53 = vadd.f32 %v5037_v22, %v5036_v39 }
 0x44b   : > { %v4967_v34 = vpop.f32.mrb[8].mxu0 }
 0x44c   : > { %v5039_v8 = vpop.f32.mrb[8].mxu1  ;;  %v4968_v36 = vpop.f32.mrb[9].mxu0 }
 0x44d   : > { %v4969_v26 = vadd.f32 %v4968_v36, %v4967_v34  ;;  %v5040_v40 = vpop.f32.mrb[9].mxu1  ;;  %v4970_v6 = vpop.f32.mrb[10].mxu0 }
 0x44e   : > { %v7266_v29 = vadd.f32 %v5040_v40, %v5039_v8  ;;  %v5042_v15 = vpop.f32.mrb[10].mxu1  ;;  %v4971_v48 = vpop.f32.mrb[11].mxu0 }
 0x44f   : > { %v4972_v38 = vadd.f32 %v4971_v48, %v4970_v6  ;;  %v5043_v0 = vpop.f32.mrb[11].mxu1 }
 0x450   : > { %v7268_v43 = vadd.f32 %v5043_v0, %v5042_v15 }
 0x453   : > { %v4973_v11 = vpop.f32.mrb[12].mxu0 }
 0x454   : > { %v5045_v49 = vpop.f32.mrb[12].mxu1  ;;  %v4974_v35 = vpop.f32.mrb[13].mxu0 }
 0x455   : > { %v7270_v32 = vadd.f32 %v4974_v35, %v4973_v11  ;;  %v5046_v31 = vpop.f32.mrb[13].mxu1  ;;  %v4976_v3 = vpop.f32.mrb[14].mxu0 }
 0x456   : > { %v7272_v55 = vadd.f32 %v5046_v31, %v5045_v49  ;;  %v5048_v45 = vpop.f32.mrb[14].mxu1  ;;  %v4977_v14 = vpop.f32.mrb[15].mxu0 }
 0x457   : > { %v4978_v17 = vadd.f32 %v4977_v14, %v4976_v3  ;;  %v5049_v5 = vpop.f32.mrb[15].mxu1 }
 0x458   : > { %v7274_v62 = vadd.f32 %v5049_v5, %v5048_v45 }
 0x45b   : > { %v4979_v23 = vpop.f32.mrb[16].mxu0 }
 0x45c   : > { %v5067_v46 = vpop.f32.mrb[16].mxu1  ;;  %v4980_v12 = vpop.f32.mrb[17].mxu0 }
 0x45d   : > { %v7276_v21 = vadd.f32 %v4980_v12, %v4979_v23  ;;  %v5068_v58 = vpop.f32.mrb[17].mxu1  ;;  %v4982_v13 = vpop.f32.mrb[18].mxu0 }
 0x45e   : > { %v5069_v42 = vadd.f32 %v5068_v58, %v5067_v46  ;;  %v5070_v51 = vpop.f32.mrb[18].mxu1  ;;  %v4983_v30 = vpop.f32.mrb[19].mxu0 }
 0x45f   : > { %v4984_v2 = vadd.f32 %v4983_v30, %v4982_v13  ;;  %v5071_v16 = vpop.f32.mrb[19].mxu1 }
 0x460   : > { %v5072_v19 = vadd.f32 %v5071_v16, %v5070_v51  ;;  %v7278_v63 = vadd.f32 %v5069_v42, %v4957_v57 }
 0x462   : > { %v7280_v4 = vadd.f32 %v5072_v19, %v4960_v44 }
 0x463   : > { %v4985_v25 = vpop.f32.mrb[20].mxu0 }
 0x464   : > { %v5073_v52 = vpop.f32.mrb[20].mxu1  ;;  %v4986_v33 = vpop.f32.mrb[21].mxu0 }
 0x465   : > { %v7282_v59 = vadd.f32 %v4986_v33, %v4985_v25  ;;  %v5074_v28 = vpop.f32.mrb[21].mxu1  ;;  %v4988_v24 = vpop.f32.mrb[22].mxu0 }
 0x466   : > { %v5075_v61 = vadd.f32 %v5074_v28, %v5073_v52  ;;  %v5076_v10 = vpop.f32.mrb[22].mxu1  ;;  %v4989_v37 = vpop.f32.mrb[23].mxu0 }
 0x467   : > { %v4990_v7 = vadd.f32 %v4989_v37, %v4988_v24  ;;  %v5077_v39 = vpop.f32.mrb[23].mxu1 }
 0x468   : > { %v5078_v60 = vadd.f32 %v5077_v39, %v5076_v10  ;;  %v7284_v22 = vadd.f32 %v5075_v61, %v4963_v27 }
 0x46a   : > { %v7286_v34 = vadd.f32 %v5078_v60, %v4966_v47 }
 0x46b   : > { %v4991_v57 = vpop.f32.mrb[24].mxu0 }
 0x46c   : > { %v5079_v44 = vpop.f32.mrb[24].mxu1  ;;  %v4992_v8 = vpop.f32.mrb[25].mxu0 }
 0x46d   : > { %v7288_v36 = vadd.f32 %v4992_v8, %v4991_v57  ;;  %v5080_v40 = vpop.f32.mrb[25].mxu1  ;;  %v4994_v6 = vpop.f32.mrb[26].mxu0 }
 0x46e   : > { %v5081_v15 = vadd.f32 %v5080_v40, %v5079_v44  ;;  %v5082_v48 = vpop.f32.mrb[26].mxu1  ;;  %v4995_v0 = vpop.f32.mrb[27].mxu0 }
 0x46f   : > { %v4996_v11 = vadd.f32 %v4995_v0, %v4994_v6  ;;  %v5083_v49 = vpop.f32.mrb[27].mxu1 }
 0x470   : > { %v5084_v35 = vadd.f32 %v5083_v49, %v5082_v48  ;;  %v7290_v31 = vadd.f32 %v5081_v15, %v4969_v26 }
 0x472   : > { %v7292_v3 = vadd.f32 %v5084_v35, %v4972_v38 }
 0x473   : > { %v4997_v27 = vpop.f32.mrb[28].mxu0 }
 0x474   : > { %v5085_v47 = vpop.f32.mrb[28].mxu1  ;;  %v4998_v45 = vpop.f32.mrb[29].mxu0 }
 0x475   : > { %v7294_v14 = vadd.f32 %v4998_v45, %v4997_v27  ;;  %v5086_v5 = vpop.f32.mrb[29].mxu1  ;;  %v5000_v23 = vpop.f32.mrb[30].mxu0 }
 0x476   : > { %v5087_v46 = vadd.f32 %v5086_v5, %v5085_v47  ;;  %v5088_v12 = vpop.f32.mrb[30].mxu1  ;;  %v5001_v58 = vpop.f32.mrb[31].mxu0 }
 0x477   : > { %v5002_v13 = vadd.f32 %v5001_v58, %v5000_v23  ;;  %v5089_v42 = vpop.f32.mrb[31].mxu1 }
 0x478   : > { %v5090_v51 = vadd.f32 %v5089_v42, %v5088_v12  ;;  %v7297_v30 = vadd.f32 %v5087_v46, %v7270_v32 }
 0x47a   : > { %v7299_v26 = vadd.f32 %v5090_v51, %v4978_v17 }
 0x47b   : > { %v5003_v38 = vpop.f32.mrb[32].mxu0 }
 0x47c   : > { %v5091_v16 = vpop.f32.mrb[32].mxu1  ;;  %v5004_v19 = vpop.f32.mrb[33].mxu0 }
 0x47d   : > { %v7301_v25 = vadd.f32 %v5004_v19, %v5003_v38  ;;  %v5092_v52 = vpop.f32.mrb[33].mxu1  ;;  %v5006_v33 = vpop.f32.mrb[34].mxu0 }
 0x47e   : > { %v5093_v28 = vadd.f32 %v5092_v52, %v5091_v16  ;;  %v5094_v24 = vpop.f32.mrb[34].mxu1  ;;  %v5007_v61 = vpop.f32.mrb[35].mxu0 }
 0x47f   : > { %v7303_v10 = vadd.f32 %v5007_v61, %v5006_v33  ;;  %v5095_v37 = vpop.f32.mrb[35].mxu1 }
 0x480   : > { %v5096_v39 = vadd.f32 %v5095_v37, %v5094_v24  ;;  %v7306_v60 = vadd.f32 %v5093_v28, %v7276_v21 }
 0x482   : > { %v7308_v32 = vadd.f32 %v5096_v39, %v4984_v2 }
 0x483   : > { %v5009_v17 = vpop.f32.mrb[36].mxu0 }
 0x484   : > { %v5097_v57 = vpop.f32.mrb[36].mxu1  ;;  %v5010_v44 = vpop.f32.mrb[37].mxu0 }
 0x485   : > { %v7310_v8 = vadd.f32 %v5010_v44, %v5009_v17  ;;  %v5098_v40 = vpop.f32.mrb[37].mxu1  ;;  %v5012_v6 = vpop.f32.mrb[38].mxu0 }
 0x486   : > { %v5099_v15 = vadd.f32 %v5098_v40, %v5097_v57  ;;  %v5100_v48 = vpop.f32.mrb[38].mxu1  ;;  %v5013_v0 = vpop.f32.mrb[39].mxu0 }
 0x487   : > { %v7312_v49 = vadd.f32 %v5013_v0, %v5012_v6  ;;  %v5101_v35 = vpop.f32.mrb[39].mxu1 }
 0x488   : > { %v5102_v27 = vadd.f32 %v5101_v35, %v5100_v48  ;;  %v7315_v47 = vadd.f32 %v5099_v15, %v7282_v59 }
 0x48a   : > { %v7317_v21 = vadd.f32 %v5102_v27, %v4990_v7 }
 0x48b   : > { %v5015_v2 = vpop.f32.mrb[40].mxu0 }
 0x48c   : > { %v5103_v45 = vpop.f32.mrb[40].mxu1  ;;  %v5016_v5 = vpop.f32.mrb[41].mxu0 }
 0x48d   : > { %v7319_v23 = vadd.f32 %v5016_v5, %v5015_v2  ;;  %v5104_v46 = vpop.f32.mrb[41].mxu1  ;;  %v5018_v12 = vpop.f32.mrb[42].mxu0 }
 0x48e   : > { %v5105_v58 = vadd.f32 %v5104_v46, %v5103_v45  ;;  %v5106_v42 = vpop.f32.mrb[42].mxu1  ;;  %v5019_v51 = vpop.f32.mrb[43].mxu0 }
 0x48f   : > { %v7321_v38 = vadd.f32 %v5019_v51, %v5018_v12  ;;  %v5107_v16 = vpop.f32.mrb[43].mxu1 }
 0x490   : > { %v5108_v19 = vadd.f32 %v5107_v16, %v5106_v42  ;;  %v7324_v52 = vadd.f32 %v5105_v58, %v7288_v36 }
 0x492   : > { %v7326_v59 = vadd.f32 %v5108_v19, %v4996_v11 }
 0x493   : > { %v5021_v7 = vpop.f32.mrb[44].mxu0 }
 0x494   : > { %v5109_v33 = vpop.f32.mrb[44].mxu1  ;;  %v5022_v28 = vpop.f32.mrb[45].mxu0 }
 0x495   : > { %v7328_v24 = vadd.f32 %v5022_v28, %v5021_v7  ;;  %v5110_v61 = vpop.f32.mrb[45].mxu1  ;;  %v5024_v37 = vpop.f32.mrb[46].mxu0 }
 0x496   : > { %v5111_v39 = vadd.f32 %v5110_v61, %v5109_v33  ;;  %v5112_v17 = vpop.f32.mrb[46].mxu1  ;;  %v5025_v57 = vpop.f32.mrb[47].mxu0 }
 0x497   : > { %v7330_v44 = vadd.f32 %v5025_v57, %v5024_v37  ;;  %v5113_v40 = vpop.f32.mrb[47].mxu1 }
 0x498   : > { %v5114_v6 = vadd.f32 %v5113_v40, %v5112_v17  ;;  %v7333_v36 = vadd.f32 %v5111_v39, %v7294_v14 }
 0x49a   : > { %v7335_v11 = vadd.f32 %v5114_v6, %v5002_v13 }
 0x49b   : > { %v5233_v15 = vpop.f32.mrb[48].mxu0 }
 0x49c   : > { %v5115_v48 = vpop.f32.mrb[48].mxu1  ;;  %v3991_v0 = vadd.f32 %v5233_v15, %v7284_v22  ;;  %v3982_v35 = vpop.f32.mrb[49].mxu0 }
 0x49d   : > { %v5116_v27 = vpop.f32.mrb[49].mxu1  ;;  %v3983_v2 = vadd.f32 %v3982_v35, %v7278_v63  ;;  %v5234_v45 = vpop.f32.mrb[50].mxu0 }
 0x49e   : > { %4111 = vst.msk [vmem:[%s6427_s3 + $0x10] sm:$0xff] %vm33_vm0, %v3991_v0  ;;  %v5117_v5 = vadd.f32 %v5116_v27, %v5115_v48  ;;  %v5118_v46 = vpop.f32.mrb[50].mxu1  ;;  %v3994_v14 = vadd.f32 %v5234_v45, %v7286_v34  ;;  %v3985_v12 = vpop.f32.mrb[51].mxu0  ;;  %v4216_v22 = vmul.f32 %v3991_v0, %v3991_v0 }
 0x49f   : > { %4109 = vst.msk [vmem:[%s6427_s3] sm:$0xff] %vm33_vm0, %v3983_v2  ;;  %v4214_v13 = vmul.f32 %v3983_v2, %v3983_v2  ;;  %v5119_v58 = vpop.f32.mrb[51].mxu1  ;;  %v3986_v42 = vadd.f32 %v3985_v12, %v7280_v4  ;;  %v4142_v63 = vsel %vm33_vm0, %v3983_v2, 0.0  ;;  %v4145_v4 = vsel %vm33_vm0, %v3991_v0, 0.0 }
 0x4a0   : > { %4112 = vst.msk [vmem:[%s6427_s3 + $0x18] sm:$0xff] %vm33_vm0, %v3994_v14  ;;  %v5120_v51 = vadd.f32 %v5119_v58, %v5118_v46  ;;  %v7352_v34 = vadd.f32 %v5117_v5, %v7301_v25  ;;  %v4217_v7 = vmul.f32 %v3994_v14, %v3994_v14  ;;  %v4249_v15 = vsel %vm33_vm0, %v4216_v22, 0.0 }
 0x4a1   : > { %4110 = vst.msk [vmem:[%s6427_s3 + $0x8] sm:$0xff] %vm33_vm0, %v3986_v42  ;;  %v4143_v16 = vsel %vm33_vm0, %v3986_v42, 0.0  ;;  %v4215_v19 = vmul.f32 %v3986_v42, %v3986_v42  ;;  %v4246_v61 = vsel %vm33_vm0, %v4214_v13, 0.0  ;;  %v4147_v0 = vsel %vm33_vm0, %v3994_v14, 0.0 }
 0x4a2   : > { %v4144_v33 = vadd.f32 %v4143_v16, %v4142_v63  ;;  %v7355_v28 = vadd.f32 %v5120_v51, %v7303_v10  ;;  %v4251_v27 = vsel %vm33_vm0, %v4217_v7, 0.0 }
 0x4a3   : > { %v4247_v37 = vsel %vm33_vm0, %v4215_v19, 0.0  ;;  %v5237_v39 = vpop.f32.mrb[52].mxu0 }
 0x4a4   : > { %v4146_v17 = vadd.f32 %v4145_v4, %v4144_v33  ;;  %v4248_v57 = vadd.f32 %v4247_v37, %v4246_v61  ;;  %v5121_v40 = vpop.f32.mrb[52].mxu1  ;;  %v4007_v25 = vadd.f32 %v5237_v39, %v7297_v30  ;;  %v3998_v6 = vpop.f32.mrb[53].mxu0 }
 0x4a5   : > { %v5122_v48 = vpop.f32.mrb[53].mxu1  ;;  %v3999_v10 = vadd.f32 %v3998_v6, %v7290_v31  ;;  %v5238_v35 = vpop.f32.mrb[54].mxu0 }
 0x4a6   : > { %v4250_v2 = vadd.f32 %v4249_v15, %v4248_v57  ;;  %4115 = vst.msk [vmem:[%s6427_s3 + $0x30] sm:$0xff] %vm33_vm0, %v4007_v25  ;;  %v5123_v45 = vadd.f32 %v5122_v48, %v5121_v40  ;;  %v5124_v5 = vpop.f32.mrb[54].mxu1  ;;  %v4001_v46 = vpop.f32.mrb[55].mxu0  ;;  %v4148_v30 = vadd.f32 %v4147_v0, %v4146_v17  ;;  %v4010_v31 = vadd.f32 %v5238_v35, %v7299_v26 }
 0x4a7   : > { %4113 = vst.msk [vmem:[%s6427_s3 + $0x20] sm:$0xff] %vm33_vm0, %v3999_v10  ;;  %v4149_v12 = vsel %vm33_vm0, %v3999_v10, 0.0  ;;  %v4218_v13 = vmul.f32 %v3999_v10, %v3999_v10  ;;  %v5125_v58 = vpop.f32.mrb[55].mxu1  ;;  %v4002_v22 = vadd.f32 %v4001_v46, %v7292_v3  ;;  %v4220_v51 = vmul.f32 %v4007_v25, %v4007_v25 }
 0x4a8   : > { %v4252_v14 = vadd.f32 %v4251_v27, %v4250_v2  ;;  %v5126_v42 = vadd.f32 %v5125_v58, %v5124_v5  ;;  %v4150_v63 = vadd.f32 %v4149_v12, %v4148_v30  ;;  %4116 = vst.msk [vmem:[%s6427_s3 + $0x38] sm:$0xff] %vm33_vm0, %v4010_v31  ;;  %v7379_v4 = vadd.f32 %v5123_v45, %v7310_v8 }
 0x4a9   : > { %v4253_v16 = vsel %vm33_vm0, %v4218_v13, 0.0  ;;  %4114 = vst.msk [vmem:[%s6427_s3 + $0x28] sm:$0xff] %vm33_vm0, %v4002_v22  ;;  %v4151_v7 = vsel %vm33_vm0, %v4002_v22, 0.0  ;;  %v4219_v33 = vmul.f32 %v4002_v22, %v4002_v22  ;;  %v4153_v37 = vsel %vm33_vm0, %v4007_v25, 0.0 }
 0x4aa   : > { %v4254_v19 = vadd.f32 %v4253_v16, %v4252_v14  ;;  %v4152_v26 = vadd.f32 %v4151_v7, %v4150_v63  ;;  %v7382_v3 = vadd.f32 %v5126_v42, %v7312_v49  ;;  %v4221_v39 = vmul.f32 %v4010_v31, %v4010_v31 }
 0x4ab   : > { %v5241_v61 = vpop.f32.mrb[56].mxu0  ;;  %v4255_v17 = vsel %vm33_vm0, %v4219_v33, 0.0  ;;  %v4257_v49 = vsel %vm33_vm0, %v4220_v51, 0.0  ;;  %v4155_v0 = vsel %vm33_vm0, %v4010_v31, 0.0 }
 0x4ac   : > { %v5127_v57 = vpop.f32.mrb[56].mxu1  ;;  %v4023_v40 = vadd.f32 %v5241_v61, %v7315_v47  ;;  %v4014_v6 = vpop.f32.mrb[57].mxu0  ;;  %v4154_v15 = vadd.f32 %v4153_v37, %v4152_v26  ;;  %v4256_v48 = vadd.f32 %v4255_v17, %v4254_v19  ;;  %v4259_v12 = vsel %vm33_vm0, %v4221_v39, 0.0 }
 0x4ad   : > { %v5128_v8 = vpop.f32.mrb[57].mxu1  ;;  %v4015_v10 = vadd.f32 %v4014_v6, %v7306_v60  ;;  %v5242_v35 = vpop.f32.mrb[58].mxu0 }
 0x4ae   : > { %4119 = vst.msk [vmem:[%s6427_s3 + $0x50] sm:$0xff] %vm33_vm0, %v4023_v40  ;;  %v5129_v25 = vadd.f32 %v5128_v8, %v5127_v57  ;;  %v5130_v27 = vpop.f32.mrb[58].mxu1  ;;  %v4026_v2 = vadd.f32 %v5242_v35, %v7317_v21  ;;  %v4017_v45 = vpop.f32.mrb[59].mxu0  ;;  %v4258_v47 = vadd.f32 %v4257_v49, %v4256_v48  ;;  %v4156_v5 = vadd.f32 %v4155_v0, %v4154_v15 }
 0x4af   : > { %4117 = vst.msk [vmem:[%s6427_s3 + $0x40] sm:$0xff] %vm33_vm0, %v4015_v10  ;;  %v4157_v60 = vsel %vm33_vm0, %v4015_v10, 0.0  ;;  %v4222_v46 = vmul.f32 %v4015_v10, %v4015_v10  ;;  %v5131_v30 = vpop.f32.mrb[59].mxu1  ;;  %v4018_v21 = vadd.f32 %v4017_v45, %v7308_v32  ;;  %v4224_v42 = vmul.f32 %v4023_v40, %v4023_v40 }
 0x4b0   : > { %4120 = vst.msk [vmem:[%s6427_s3 + $0x58] sm:$0xff] %vm33_vm0, %v4026_v2  ;;  %v5132_v13 = vadd.f32 %v5131_v30, %v5130_v27  ;;  %v4158_v31 = vadd.f32 %v4157_v60, %v4156_v5  ;;  %v4260_v58 = vadd.f32 %v4259_v12, %v4258_v47  ;;  %v7402_v22 = vadd.f32 %v5129_v25, %v7319_v23 }
 0x4b1   : > { %v4261_v14 = vsel %vm33_vm0, %v4222_v46, 0.0  ;;  %4118 = vst.msk [vmem:[%s6427_s3 + $0x48] sm:$0xff] %vm33_vm0, %v4018_v21  ;;  %v4159_v16 = vsel %vm33_vm0, %v4018_v21, 0.0  ;;  %v4223_v19 = vmul.f32 %v4018_v21, %v4018_v21  ;;  %v4161_v23 = vsel %vm33_vm0, %v4023_v40, 0.0 }
 0x4b2   : > { %v7405_v51 = vadd.f32 %v5132_v13, %v7321_v38  ;;  %v4262_v63 = vadd.f32 %v4261_v14, %v4260_v58  ;;  %v4160_v33 = vadd.f32 %v4159_v16, %v4158_v31  ;;  %v4225_v37 = vmul.f32 %v4026_v2, %v4026_v2 }
 0x4b3   : > { %v5245_v7 = vpop.f32.mrb[60].mxu0  ;;  %v4263_v38 = vsel %vm33_vm0, %v4223_v19, 0.0  ;;  %v4265_v6 = vsel %vm33_vm0, %v4224_v42, 0.0  ;;  %v4163_v15 = vsel %vm33_vm0, %v4026_v2, 0.0 }
 0x4b4   : > { %v5133_v26 = vpop.f32.mrb[60].mxu1  ;;  %v4039_v61 = vadd.f32 %v5245_v7, %v7333_v36  ;;  %v4030_v32 = vpop.f32.mrb[61].mxu0  ;;  %v4162_v48 = vadd.f32 %v4161_v23, %v4160_v33  ;;  %v4264_v8 = vadd.f32 %v4263_v38, %v4262_v63  ;;  %v4267_v45 = vsel %vm33_vm0, %v4225_v37, 0.0 }
 0x4b5   : > { %v5134_v39 = vpop.f32.mrb[61].mxu1  ;;  %v4031_v17 = vadd.f32 %v4030_v32, %v7324_v52  ;;  %v5246_v57 = vpop.f32.mrb[62].mxu0 }
 0x4b6   : > { %4123 = vst.msk [vmem:[%s6427_s3 + $0x70] sm:$0xff] %vm33_vm0, %v4039_v61  ;;  %v5136_v36 = vpop.f32.mrb[62].mxu1  ;;  %v4033_v10 = vpop.f32.mrb[63].mxu0  ;;  %v5135_v35 = vadd.f32 %v5134_v39, %v5133_v26  ;;  %v4042_v52 = vadd.f32 %v5246_v57, %v7335_v11  ;;  %v4266_v25 = vadd.f32 %v4265_v6, %v4264_v8  ;;  %v4164_v27 = vadd.f32 %v4163_v15, %v4162_v48 }
 0x4b7   : > { %4121 = vst.msk [vmem:[%s6427_s3 + $0x60] sm:$0xff] %vm33_vm0, %v4031_v17  ;;  %v4165_v40 = vsel %vm33_vm0, %v4031_v17, 0.0  ;;  %v4226_v49 = vmul.f32 %v4031_v17, %v4031_v17  ;;  %v5137_v0 = vpop.f32.mrb[63].mxu1  ;;  %v4228_v47 = vmul.f32 %v4039_v61, %v4039_v61  ;;  %v4034_v60 = vadd.f32 %v4033_v10, %v7326_v59 }
 0x4b8   : > { %v5138_v2 = vadd.f32 %v5137_v0, %v5136_v36  ;;  %4124 = vst.msk [vmem:[%s6427_s3 + $0x78] sm:$0xff] %vm33_vm0, %v4042_v52  ;;  %v4166_v46 = vadd.f32 %v4165_v40, %v4164_v27  ;;  %v4268_v30 = vadd.f32 %v4267_v45, %v4266_v25  ;;  %v3910_v12 = vadd.f32 %v5135_v35, %v7328_v24 }
 0x4b9   : > { %v4269_v5 = vsel %vm33_vm0, %v4226_v49, 0.0  ;;  %4122 = vst.msk [vmem:[%s6427_s3 + $0x68] sm:$0xff] %vm33_vm0, %v4034_v60  ;;  %v4167_v11 = vsel %vm33_vm0, %v4034_v60, 0.0  ;;  %v4227_v31 = vmul.f32 %v4034_v60, %v4034_v60  ;;  %v4169_v16 = vsel %vm33_vm0, %v4039_v61, 0.0 }
 0x4ba   : > { %v7429_v13 = vadd.f32 %v5138_v2, %v7330_v44  ;;  %v4270_v14 = vadd.f32 %v4269_v5, %v4268_v30  ;;  %v4168_v21 = vadd.f32 %v4167_v11, %v4166_v46  ;;  %v4229_v24 = vmul.f32 %v4042_v52, %v4042_v52 }
 0x4bb   : > { %v5249_v58 = vpop.f32.mrb[64].mxu0  ;;  %v4271_v44 = vsel %vm33_vm0, %v4227_v31, 0.0  ;;  %v4273_v26 = vsel %vm33_vm0, %v4228_v47, 0.0  ;;  %v4171_v32 = vsel %vm33_vm0, %v4042_v52, 0.0 }
 0x4bc   : > { %v5139_v42 = vpop.f32.mrb[64].mxu1  ;;  %v4055_v63 = vadd.f32 %v5249_v58, %v7379_v4  ;;  %v4046_v59 = vpop.f32.mrb[65].mxu0  ;;  %v4170_v23 = vadd.f32 %v4169_v16, %v4168_v21  ;;  %v4272_v37 = vadd.f32 %v4271_v44, %v4270_v14  ;;  %v4275_v8 = vsel %vm33_vm0, %v4229_v24, 0.0 }
 0x4bd   : > { %v5140_v19 = vpop.f32.mrb[65].mxu1  ;;  %v4047_v7 = vadd.f32 %v4046_v59, %v7352_v34  ;;  %v5250_v33 = vpop.f32.mrb[66].mxu0 }
 0x4be   : > { %4127 = vst.msk [vmem:[%s6427_s3 + $0x90] sm:$0xff] %vm33_vm0, %v4055_v63  ;;  %v5142_v4 = vpop.f32.mrb[66].mxu1  ;;  %v4049_v38 = vpop.f32.mrb[67].mxu0  ;;  %v5141_v39 = vadd.f32 %v5140_v19, %v5139_v42  ;;  %v4058_v34 = vadd.f32 %v5250_v33, %v7382_v3  ;;  %v4274_v6 = vadd.f32 %v4273_v26, %v4272_v37  ;;  %v4172_v15 = vadd.f32 %v4171_v32, %v4170_v23 }
 0x4bf   : > { %4125 = vst.msk [vmem:[%s6427_s3 + $0x80] sm:$0xff] %vm33_vm0, %v4047_v7  ;;  %v4173_v61 = vsel %vm33_vm0, %v4047_v7, 0.0  ;;  %v4230_v17 = vmul.f32 %v4047_v7, %v4047_v7  ;;  %v5143_v57 = vpop.f32.mrb[67].mxu1  ;;  %v4232_v36 = vmul.f32 %v4055_v63, %v4055_v63  ;;  %v4050_v35 = vadd.f32 %v4049_v38, %v7355_v28 }
 0x4c0   : > { %v5144_v48 = vadd.f32 %v5143_v57, %v5142_v4  ;;  %4128 = vst.msk [vmem:[%s6427_s3 + $0x98] sm:$0xff] %vm33_vm0, %v4058_v34  ;;  %v4174_v40 = vadd.f32 %v4173_v61, %v4172_v15  ;;  %v4276_v49 = vadd.f32 %v4275_v8, %v4274_v6  ;;  %v3918_v52 = vadd.f32 %v5141_v39, %v7258_v20 }
 0x4c1   : > { %v4277_v10 = vsel %vm33_vm0, %v4230_v17, 0.0  ;;  %4126 = vst.msk [vmem:[%s6427_s3 + $0x88] sm:$0xff] %vm33_vm0, %v4050_v35  ;;  %v4175_v3 = vsel %vm33_vm0, %v4050_v35, 0.0  ;;  %v4231_v25 = vmul.f32 %v4050_v35, %v4050_v35  ;;  %v4177_v60 = vsel %vm33_vm0, %v4055_v63, 0.0 }
 0x4c2   : > { %v7453_v0 = vadd.f32 %v5144_v48, %v7260_v9  ;;  %v4278_v2 = vadd.f32 %v4277_v10, %v4276_v49  ;;  %v4176_v45 = vadd.f32 %v4175_v3, %v4174_v40  ;;  %v4233_v46 = vmul.f32 %v4058_v34, %v4058_v34 }
 0x4c3   : > { %v5253_v27 = vpop.f32.mrb[68].mxu0  ;;  %v4279_v20 = vsel %vm33_vm0, %v4231_v25, 0.0  ;;  %v4281_v31 = vsel %vm33_vm0, %v4232_v36, 0.0  ;;  %v4179_v58 = vsel %vm33_vm0, %v4058_v34, 0.0 }
 0x4c4   : > { %v5145_v47 = vpop.f32.mrb[68].mxu1  ;;  %v4071_v5 = vadd.f32 %v5253_v27, %v3910_v12  ;;  %v4062_v28 = vpop.f32.mrb[69].mxu0  ;;  %v4178_v14 = vadd.f32 %v4177_v60, %v4176_v45  ;;  %v4280_v21 = vadd.f32 %v4279_v20, %v4278_v2  ;;  %v4283_v33 = vsel %vm33_vm0, %v4233_v46, 0.0 }
 0x4c5   : > { %v5146_v9 = vpop.f32.mrb[69].mxu1  ;;  %v4063_v30 = vadd.f32 %v4062_v28, %v7402_v22  ;;  %v5254_v11 = vpop.f32.mrb[70].mxu0 }
 0x4c6   : > { %4131 = vst.msk [vmem:[%s6427_s3 + $0xb0] sm:$0xff] %vm33_vm0, %v4071_v5  ;;  %v5148_v12 = vpop.f32.mrb[70].mxu1  ;;  %v4065_v42 = vpop.f32.mrb[71].mxu0  ;;  %v5147_v59 = vadd.f32 %v5146_v9, %v5145_v47  ;;  %v4074_v22 = vadd.f32 %v5254_v11, %v7429_v13  ;;  %v4282_v44 = vadd.f32 %v4281_v31, %v4280_v21  ;;  %v4180_v19 = vadd.f32 %v4179_v58, %v4178_v14 }
 0x4c7   : > { %4129 = vst.msk [vmem:[%s6427_s3 + $0xa0] sm:$0xff] %vm33_vm0, %v4063_v30  ;;  %v4181_v63 = vsel %vm33_vm0, %v4063_v30, 0.0  ;;  %v4234_v16 = vmul.f32 %v4063_v30, %v4063_v30  ;;  %v5149_v24 = vpop.f32.mrb[71].mxu1  ;;  %v4236_v26 = vmul.f32 %v4071_v5, %v4071_v5  ;;  %v4066_v23 = vadd.f32 %v4065_v42, %v7405_v51 }
 0x4c8   : > { %v5150_v7 = vadd.f32 %v5149_v24, %v5148_v12  ;;  %4132 = vst.msk [vmem:[%s6427_s3 + $0xb8] sm:$0xff] %vm33_vm0, %v4074_v22  ;;  %v4182_v37 = vadd.f32 %v4181_v63, %v4180_v19  ;;  %v4284_v4 = vadd.f32 %v4283_v33, %v4282_v44  ;;  %v3926_v38 = vadd.f32 %v5147_v59, %v7262_v50 }
 0x4c9   : > { %v4285_v32 = vsel %vm33_vm0, %v4234_v16, 0.0  ;;  %4130 = vst.msk [vmem:[%s6427_s3 + $0xa8] sm:$0xff] %vm33_vm0, %v4066_v23  ;;  %v4183_v13 = vsel %vm33_vm0, %v4066_v23, 0.0  ;;  %v4235_v61 = vmul.f32 %v4066_v23, %v4066_v23  ;;  %v4185_v51 = vsel %vm33_vm0, %v4071_v5, 0.0 }
 0x4ca   : > { %v3929_v39 = vadd.f32 %v5150_v7, %v7264_v53  ;;  %v4286_v34 = vadd.f32 %v4285_v32, %v4284_v4  ;;  %v4184_v57 = vadd.f32 %v4183_v13, %v4182_v37  ;;  %v4237_v8 = vmul.f32 %v4074_v22, %v4074_v22 }
 0x4cb   : > { %v5257_v17 = vpop.f32.mrb[72].mxu0  ;;  %v4287_v50 = vsel %vm33_vm0, %v4235_v61, 0.0  ;;  %v4289_v35 = vsel %vm33_vm0, %v4236_v26, 0.0  ;;  %v4187_v40 = vsel %vm33_vm0, %v4074_v22, 0.0 }
 0x4cc   : > { %v5151_v6 = vpop.f32.mrb[72].mxu1  ;;  %v4087_v15 = vadd.f32 %v5257_v17, %v3926_v38  ;;  %v4078_v48 = vpop.f32.mrb[73].mxu0  ;;  %v4186_v49 = vadd.f32 %v4185_v51, %v4184_v57  ;;  %v4288_v3 = vadd.f32 %v4287_v50, %v4286_v34  ;;  %v4291_v20 = vsel %vm33_vm0, %v4237_v8, 0.0 }
 0x4cd   : > { %v5152_v36 = vpop.f32.mrb[73].mxu1  ;;  %v4079_v53 = vadd.f32 %v4078_v48, %v3918_v52  ;;  %v5258_v10 = vpop.f32.mrb[74].mxu0 }
 0x4ce   : > { %4135 = vst.msk [vmem:[%s6427_s3 + $0xd0] sm:$0xff] %vm33_vm0, %v4087_v15  ;;  %v5154_v25 = vpop.f32.mrb[74].mxu1  ;;  %v4081_v27 = vpop.f32.mrb[75].mxu0  ;;  %v5153_v2 = vadd.f32 %v5152_v36, %v5151_v6  ;;  %v4090_v52 = vadd.f32 %v5258_v10, %v3929_v39  ;;  %v4290_v28 = vadd.f32 %v4289_v35, %v4288_v3  ;;  %v4188_v60 = vadd.f32 %v4187_v40, %v4186_v49 }
 0x4cf   : > { %4133 = vst.msk [vmem:[%s6427_s3 + $0xc0] sm:$0xff] %vm33_vm0, %v4079_v53  ;;  %v4189_v45 = vsel %vm33_vm0, %v4079_v53, 0.0  ;;  %v4238_v47 = vmul.f32 %v4079_v53, %v4079_v53  ;;  %v5155_v5 = vpop.f32.mrb[75].mxu1  ;;  %v4240_v9 = vmul.f32 %v4087_v15, %v4087_v15  ;;  %v4082_v11 = vadd.f32 %v4081_v27, %v7453_v0 }
 0x4d0   : > { %v5156_v46 = vadd.f32 %v5155_v5, %v5154_v25  ;;  %4136 = vst.msk [vmem:[%s6427_s3 + $0xd8] sm:$0xff] %vm33_vm0, %v4090_v52  ;;  %v4190_v31 = vadd.f32 %v4189_v45, %v4188_v60  ;;  %v4292_v58 = vadd.f32 %v4291_v20, %v4290_v28  ;;  %v3934_v14 = vadd.f32 %v5153_v2, %v7266_v29 }
 0x4d1   : > { %v4293_v30 = vsel %vm33_vm0, %v4238_v47, 0.0  ;;  %4134 = vst.msk [vmem:[%s6427_s3 + $0xc8] sm:$0xff] %vm33_vm0, %v4082_v11  ;;  %v4191_v12 = vsel %vm33_vm0, %v4082_v11, 0.0  ;;  %v4239_v42 = vmul.f32 %v4082_v11, %v4082_v11  ;;  %v4193_v44 = vsel %vm33_vm0, %v4087_v15, 0.0 }
 0x4d2   : > { %v3937_v21 = vadd.f32 %v5156_v46, %v7268_v43  ;;  %v4294_v63 = vadd.f32 %v4293_v30, %v4292_v58  ;;  %v4192_v16 = vadd.f32 %v4191_v12, %v4190_v31  ;;  %v4241_v0 = vmul.f32 %v4090_v52, %v4090_v52 }
 0x4d3   : > { %v5261_v59 = vpop.f32.mrb[76].mxu0  ;;  %v4295_v19 = vsel %vm33_vm0, %v4239_v42, 0.0  ;;  %v4297_v43 = vsel %vm33_vm0, %v4240_v9, 0.0  ;;  %v4195_v38 = vsel %vm33_vm0, %v4090_v52, 0.0  ;;  %v4141_v42 = vld [vmem:[#allocation5] sm:$0x1] }
 0x4d4   : > { %v5157_v22 = vpop.f32.mrb[76].mxu1  ;;  %v4094_v24 = vpop.f32.mrb[77].mxu0  ;;  %v4194_v26 = vadd.f32 %v4193_v44, %v4192_v16  ;;  %v4296_v32 = vadd.f32 %v4295_v19, %v4294_v63  ;;  %v4299_v48 = vsel %vm33_vm0, %v4241_v0, 0.0  ;;  %v4213_v16 = vld [vmem:[#allocation6] sm:$0x1] }
 0x4d5   : > { %v5158_v7 = vpop.f32.mrb[77].mxu1  ;;  %v4095_v29 = vadd.f32 %v4094_v24, %v3934_v14  ;;  %v5262_v33 = vpop.f32.mrb[78].mxu0 }
 0x4d6   : > { %v5159_v23 = vadd.f32 %v5158_v7, %v5157_v22  ;;  %v5160_v37 = vpop.f32.mrb[78].mxu1  ;;  %v4097_v4 = vpop.f32.mrb[79].mxu0  ;;  %v4298_v34 = vadd.f32 %v4297_v43, %v4296_v32  ;;  %v4196_v6 = vadd.f32 %v4195_v38, %v4194_v26  ;;  %v4323_v32 = vld [vmem:[%s7784_s6] sm:$0x1] (%p2123_p1) }
 0x4d7   : > { %4137 = vst.msk [vmem:[%s6427_s3 + $0xe0] sm:$0xff] %vm33_vm0, %v4095_v29  ;;  %v4197_v39 = vsel %vm33_vm0, %v4095_v29, 0.0  ;;  %v4242_v13 = vmul.f32 %v4095_v29, %v4095_v29  ;;  %v5161_v61 = vpop.f32.mrb[79].mxu1  ;;  %v4098_v17 = vadd.f32 %v4097_v4, %v3937_v21  ;;  %v7534_v4 = vld [vmem:[%s7785_s7] sm:$0x1] (%p2123_p1) }
 0x4d8   : > { %v3942_v57 = vadd.f32 %v5159_v23, %v7272_v55  ;;  %v5162_v15 = vadd.f32 %v5161_v61, %v5160_v37  ;;  %v4198_v53 = vadd.f32 %v4197_v39, %v4196_v6  ;;  %v4300_v10 = vadd.f32 %v4299_v48, %v4298_v34 }
 0x4d9   : > { %v4301_v51 = vsel %vm33_vm0, %v4242_v13, 0.0  ;;  %4138 = vst.msk [vmem:[%s6427_s3 + $0xe8] sm:$0xff] %vm33_vm0, %v4098_v17  ;;  %v4199_v8 = vsel %vm33_vm0, %v4098_v17, 0.0  ;;  %v4243_v50 = vmul.f32 %v4098_v17, %v4098_v17 }
 0x4da   : > { %v4103_v36 = vadd.f32 %v5261_v59, %v3942_v57  ;;  %v3945_v35 = vadd.f32 %v5162_v15, %v7274_v62  ;;  %v4302_v49 = vadd.f32 %v4301_v51, %v4300_v10  ;;  %v4200_v25 = vadd.f32 %v4199_v8, %v4198_v53 }
 0x4db   : > { %v4303_v40 = vsel %vm33_vm0, %v4243_v50, 0.0 }
 0x4dc   : > { %4139 = vst.msk [vmem:[%s6427_s3 + $0xf0] sm:$0xff] %vm33_vm0, %v4103_v36  ;;  %v4244_v55 = vmul.f32 %v4103_v36, %v4103_v36  ;;  %v4106_v3 = vadd.f32 %v5262_v33, %v3945_v35  ;;  %v4201_v27 = vsel %vm33_vm0, %v4103_v36, 0.0  ;;  %v4304_v52 = vadd.f32 %v4303_v40, %v4302_v49 }
 0x4dd   : > { %v4202_v47 = vadd.f32 %v4201_v27, %v4200_v25 }
 0x4de   : > { %4140 = vst.msk [vmem:[%s6427_s3 + $0xf8] sm:$0xff] %vm33_vm0, %v4106_v3  ;;  %v4203_v2 = vsel %vm33_vm0, %v4106_v3, 0.0  ;;  %v4245_v45 = vmul.f32 %v4106_v3, %v4106_v3  ;;  %v4305_v5 = vsel %vm33_vm0, %v4244_v55, 0.0 }
 0x4df   : > { %v4204_v28 = vadd.f32 %v4203_v2, %v4202_v47  ;;  %v4306_v60 = vadd.f32 %v4305_v5, %v4304_v52 }
 0x4e0   : > { %v4307_v62 = vsel %vm33_vm0, %v4245_v45, 0.0 }
 0x4e1   : > { %v4205_v46 = vrot.slane %v4204_v28, 4  ;;  %v4308_v20 = vadd.f32 %v4307_v62, %v4306_v60 }
 0x4e3   : > { %v4206_v9 = vadd.f32 %v4205_v46, %v4204_v28  ;;  %v4309_v30 = vrot.slane %v4308_v20, 4 }
 0x4e5   : > { %v4207_v11 = vrot.slane %v4206_v9, 2  ;;  %v4310_v31 = vadd.f32 %v4309_v30, %v4308_v20 }
 0x4e7   : > { %v4208_v58 = vadd.f32 %v4207_v11, %v4206_v9  ;;  %v4311_v14 = vrot.slane %v4310_v31, 2 }
 0x4e9   : > { %v4209_v21 = vrot.slane %v4208_v58, 1  ;;  %v4312_v12 = vadd.f32 %v4311_v14, %v4310_v31 }
 0x4eb   : > { %v4210_v59 = vadd.f32 %v4209_v21, %v4208_v58  ;;  %v4313_v63 = vrot.slane %v4312_v12, 1  ;;  %2125 = sbr.rel (!%p2123_p1) target bundleno = 599 (0x257), region = 94 }
 0x4ed   : > { %v4211_v22 = vadd.f32 %v4210_v59, %v4141_v42  ;;  %v4314_v24 = vadd.f32 %v4313_v63, %v4312_v12 }
 0x4ef   : > { %4212 = vst.msk [vmem:[#allocation5] sm:$0x1] %vm7859_vm9, %v4211_v22  ;;  %v4315_v44 = vadd.f32 %v4314_v24, %v4213_v16 }
 0x4f1   : > { %4316 = vst.msk [vmem:[#allocation6] sm:$0x1] %vm7860_vm10, %v4315_v44 }
 0x4f6   :  { %v4317_v0 = vld [vmem:[#allocation5] sm:$0x1] }
 0x4f7   :  { %v4318_v7 = vmul.f32 0.001953125, %v4317_v0 }
 0x4f8   :  { %v4319_v19 = vld [vmem:[#allocation6] sm:$0x1] }
 0x4f9   :  { %v4320_v29 = vmul.f32 0.001953125, %v4319_v19  ;;  %v4321_v33 = vmul.f32 %v4318_v7, %v4318_v7 }
 0x4fb   :  { %v4322_v43 = vsub.f32 %v4320_v29, %v4321_v33 }
 0x4fd   :  { %v4324_v26 = vadd.f32 1e-05, %v4322_v43 }
 0x4ff   :  { %5401 = vrsqrt.f32 %v4324_v26 }
 0x509   :  { %v5402_v23 = vpop.eup %5401 }
 0x50a   :  { %v7529_v37 = vmul.f32 %v5402_v23, %v4323_v32 }
 0x50c   :  { %v7537_v56 = vmul.f32 %v7529_v37, %v4318_v7 }
 0x50e   :  { %v4329_v41 = vsub.f32 %v7534_v4, %v7537_v56 }
 0x50f LB: > { %v7548_v18 = vrot.slane %v7529_v37, %v6421_v54  ;;  %s7551_s6 = sshll.u32 %s5449_s5, 8  ;;  %s4335_s5 = sadd.s32 1, %s5449_s5   ;;  %s5449_s5 = sphi %s7541_s5, %s4335_s5  }
 0x510   : > { %v7557_v1 = vrot.slane %v4329_v41, %v6421_v54  ;;  %s7563_s29 = scalar_lea.vmem %s7778_s0, %s7551_s6  ;;  %s7566_s30 = scalar_lea.vmem [#allocation4], %s7551_s6 }
 0x511   : > { %v4338_v38 = vld [vmem:[%s7566_s30] sm:$0xff]  ;;  %v4339_v39 = vld [vmem:[%s7566_s30 + $0x8] sm:$0xff]  ;;  %v4340_v34 = vld [vmem:[%s7566_s30 + $0x10] sm:$0xff]  ;;  %s7601_s10 = scalar_lea.vmem [#allocation8], %s7551_s6  ;;  %p4332_p2 = scmp.ge.s32.totalorder %s4335_s5, 2  }
 0x512   : > { %v4376_v13 = vmul.f32 %v7548_v18, %v4338_v38  ;;  %v4447_v61 = vld [vmem:[%s7563_s29] sm:$0xff]  ;;  %v4377_v17 = vmul.f32 %v7548_v18, %v4339_v39  ;;  %v4448_v57 = vld [vmem:[%s7563_s29 + $0x8] sm:$0xff]  ;;  %v4378_v6 = vmul.f32 %v7548_v18, %v4340_v34  ;;  %v4341_v15 = vld [vmem:[%s7566_s30 + $0x18] sm:$0xff]  ;;  %s5455_s11 = smov (%p4332_p2), [#allocation8]  }
 0x513   : > { %v4342_v48 = vld [vmem:[%s7566_s30 + $0x20] sm:$0xff]  ;;  %v4449_v50 = vld [vmem:[%s7563_s29 + $0x10] sm:$0xff]  ;;  %v4379_v36 = vmul.f32 %v7548_v18, %v4341_v15  ;;  %v4450_v53 = vld [vmem:[%s7563_s29 + $0x18] sm:$0xff]  ;;  %s4549_s12 = sshll.u32 (%p4332_p2), %s5455_s11, 4  ;;  %s4550_s12 = int_to_ptr.vmem [resolvable:$true] %s4549_s12 }
 0x514   : > { %v4414_v51 = vadd.f32 %v7557_v1, %v4376_v13  ;;  %v4415_v8 = vadd.f32 %v7557_v1, %v4377_v17  ;;  %v4380_v10 = vmul.f32 %v7548_v18, %v4342_v48  ;;  %v4343_v35 = vld [vmem:[%s7566_s30 + $0x28] sm:$0xff]  ;;  %v4416_v40 = vadd.f32 %v7557_v1, %v4378_v6  ;;  %v4451_v55 = vld [vmem:[%s7563_s29 + $0x20] sm:$0xff]  ;;  %v4344_v3 = vld [vmem:[%s7566_s30 + $0x30] sm:$0xff]  ;;  %s5403_s15 = scalar_lea.vmem (%p4332_p2), %s4550_s12, 8192  ;;  %p5408_p4 = scmp.lt.s32.totalorder (%p4332_p2), %s4550_s12, %s4550_s12 }
 0x515   : > { %v4381_v49 = vmul.f32 %v7548_v18, %v4343_v35  ;;  %v4345_v25 = vld [vmem:[%s7566_s30 + $0x38] sm:$0xff]  ;;  %v4417_v45 = vadd.f32 %v7557_v1, %v4379_v36  ;;  %v4452_v52 = vld [vmem:[%s7563_s29 + $0x28] sm:$0xff]  ;;  %v4346_v5 = vld [vmem:[%s7566_s30 + $0x40] sm:$0xff]  ;;  %v4382_v60 = vmul.f32 %v7548_v18, %v4344_v3  ;;  %p5404_p3 = scmp.ne.s32.totalorder (%p4332_p2), %s4550_s12, %s5403_s15  ;;  %p5409_p5 = scmp.lt.s32.totalorder (%p4332_p2), %s5403_s15, %s5403_s15 }
 0x516   : > { %v4479_v27 = vadd.f32 %v4447_v61, %v4414_v51  ;;  %v4480_v2 = vadd.f32 %v4448_v57, %v4415_v8  ;;  %v4418_v47 = vadd.f32 %v7557_v1, %v4380_v10  ;;  %v4481_v62 = vadd.f32 %v4449_v50, %v4416_v40  ;;  %v4453_v46 = vld [vmem:[%s7563_s29 + $0x30] sm:$0xff]  ;;  %v4347_v9 = vld [vmem:[%s7566_s30 + $0x48] sm:$0xff]  ;;  %v4454_v58 = vld [vmem:[%s7563_s29 + $0x38] sm:$0xff] }
 0x517   : > { %v4419_v28 = vadd.f32 %v7557_v1, %v4381_v49  ;;  %v4383_v20 = vmul.f32 %v7548_v18, %v4345_v25  ;;  %v4348_v30 = vld [vmem:[%s7566_s30 + $0x50] sm:$0xff]  ;;  %v4482_v11 = vadd.f32 %v4450_v53, %v4417_v45  ;;  %v4384_v14 = vmul.f32 %v7548_v18, %v4346_v5  ;;  %v4455_v21 = vld [vmem:[%s7563_s29 + $0x40] sm:$0xff]  ;;  %v4349_v42 = vld [vmem:[%s7566_s30 + $0x58] sm:$0xff]  ;;  %p5410_p6 = por (%p4332_p2), %p5409_p5, %p5408_p4 }
 0x518   : > { %4512 = vst.msk [vmem:[%s7601_s10] sm:$0xff] %vm33_vm0, %v4479_v27  ;;  %4513 = vst.msk [vmem:[%s7601_s10 + $0x8] sm:$0xff] %vm33_vm0, %v4480_v2  ;;  %v4483_v31 = vadd.f32 %v4451_v55, %v4418_v47  ;;  %v4385_v12 = vmul.f32 %v7548_v18, %v4347_v9  ;;  %v4420_v63 = vadd.f32 %v7557_v1, %v4382_v60  ;;  %v4456_v22 = vld [vmem:[%s7563_s29 + $0x48] sm:$0xff]  ;;  %v4350_v44 = vld [vmem:[%s7566_s30 + $0x60] sm:$0xff] }
 0x519   : > { %4514 = vst.msk [vmem:[%s7601_s10 + $0x10] sm:$0xff] %vm33_vm0, %v4481_v62  ;;  %v4484_v59 = vadd.f32 %v4452_v52, %v4419_v28  ;;  %v4421_v16 = vadd.f32 %v7557_v1, %v4383_v20  ;;  %v4386_v24 = vmul.f32 %v7548_v18, %v4348_v30  ;;  %v4351_v0 = vld [vmem:[%s7566_s30 + $0x68] sm:$0xff]  ;;  %4515 = vst.msk [vmem:[%s7601_s10 + $0x18] sm:$0xff] %vm33_vm0, %v4482_v11  ;;  %v4457_v29 = vld [vmem:[%s7563_s29 + $0x50] sm:$0xff]  ;;  %p5411_p7 = pnand (%p4332_p2), %p5410_p6, %p5404_p3 }
 0x51a   : > { %4516 = vst.msk [vmem:[%s7601_s10 + $0x20] sm:$0xff] %vm33_vm0, %v4483_v31  ;;  %v4422_v19 = vadd.f32 %v7557_v1, %v4384_v14  ;;  %v4423_v7 = vadd.f32 %v7557_v1, %v4385_v12  ;;  %v4387_v33 = vmul.f32 %v7548_v18, %v4349_v42  ;;  %v4458_v43 = vld [vmem:[%s7563_s29 + $0x58] sm:$0xff]  ;;  %v4388_v26 = vmul.f32 %v7548_v18, %v4350_v44  ;;  %v4352_v32 = vld [vmem:[%s7566_s30 + $0x70] sm:$0xff]  ;;  %v4459_v13 = vld [vmem:[%s7563_s29 + $0x60] sm:$0xff] }
 0x51b   : > { %4517 = vst.msk [vmem:[%s7601_s10 + $0x28] sm:$0xff] %vm33_vm0, %v4484_v59  ;;  %v4485_v23 = vadd.f32 %v4453_v46, %v4420_v63  ;;  %v4486_v38 = vadd.f32 %v4454_v58, %v4421_v16  ;;  %v4424_v39 = vadd.f32 %v7557_v1, %v4386_v24  ;;  %v4389_v61 = vmul.f32 %v7548_v18, %v4351_v0  ;;  %v4353_v17 = vld [vmem:[%s7566_s30 + $0x78] sm:$0xff]  ;;  %v4354_v34 = vld [vmem:[%s7566_s30 + $0x80] sm:$0xff]  ;;  %v4460_v51 = vld [vmem:[%s7563_s29 + $0x68] sm:$0xff] }
 0x51c   : > { %v4487_v57 = vadd.f32 %v4455_v21, %v4422_v19  ;;  %v4488_v6 = vadd.f32 %v4456_v22, %v4423_v7  ;;  %v4425_v15 = vadd.f32 %v7557_v1, %v4387_v33  ;;  %v4426_v48 = vadd.f32 %v7557_v1, %v4388_v26  ;;  %v4355_v8 = vld [vmem:[%s7566_s30 + $0x88] sm:$0xff]  ;;  %v4461_v10 = vld [vmem:[%s7563_s29 + $0x70] sm:$0xff]  ;;  %v4357_v55 = vld [vmem:[%s7566_s30 + $0x98] sm:$0xff] }
 0x51d   : > { %4518 = vst.msk [vmem:[%s7601_s10 + $0x30] sm:$0xff] %vm33_vm0, %v4485_v23  ;;  %4519 = vst.msk [vmem:[%s7601_s10 + $0x38] sm:$0xff] %vm33_vm0, %v4486_v38  ;;  %v4489_v50 = vadd.f32 %v4457_v29, %v4424_v39  ;;  %v4427_v36 = vadd.f32 %v7557_v1, %v4389_v61  ;;  %v4390_v53 = vmul.f32 %v7548_v18, %v4352_v32  ;;  %v4356_v40 = vld [vmem:[%s7566_s30 + $0x90] sm:$0xff]  ;;  %v4462_v25 = vld [vmem:[%s7563_s29 + $0x78] sm:$0xff] }
 0x51e   : > { %v4391_v35 = vmul.f32 %v7548_v18, %v4353_v17  ;;  %4520 = vst.msk [vmem:[%s7601_s10 + $0x40] sm:$0xff] %vm33_vm0, %v4487_v57  ;;  %4521 = vst.msk [vmem:[%s7601_s10 + $0x48] sm:$0xff] %vm33_vm0, %v4488_v6  ;;  %v4490_v49 = vadd.f32 %v4458_v43, %v4425_v15  ;;  %v4491_v3 = vadd.f32 %v4459_v13, %v4426_v48  ;;  %v4463_v2 = vld [vmem:[%s7563_s29 + $0x80] sm:$0xff]  ;;  %v4464_v28 = vld [vmem:[%s7563_s29 + $0x88] sm:$0xff] }
 0x51f   : > { %v4392_v27 = vmul.f32 %v7548_v18, %v4354_v34  ;;  %v4393_v45 = vmul.f32 %v7548_v18, %v4355_v8  ;;  %v4358_v47 = vld [vmem:[%s7566_s30 + $0xa0] sm:$0xff]  ;;  %4522 = vst.msk [vmem:[%s7601_s10 + $0x50] sm:$0xff] %vm33_vm0, %v4489_v50  ;;  %v4492_v52 = vadd.f32 %v4460_v51, %v4427_v36  ;;  %v4428_v5 = vadd.f32 %v7557_v1, %v4390_v53  ;;  %v4465_v46 = vld [vmem:[%s7563_s29 + $0x90] sm:$0xff]  ;;  %v4359_v20 = vld [vmem:[%s7566_s30 + $0xa8] sm:$0xff] }
 0x520   : > { %v4429_v62 = vadd.f32 %v7557_v1, %v4391_v35  ;;  %v4394_v60 = vmul.f32 %v7548_v18, %v4356_v40  ;;  %4523 = vst.msk [vmem:[%s7601_s10 + $0x58] sm:$0xff] %vm33_vm0, %v4490_v49  ;;  %4524 = vst.msk [vmem:[%s7601_s10 + $0x60] sm:$0xff] %vm33_vm0, %v4491_v3  ;;  %v4395_v11 = vmul.f32 %v7548_v18, %v4357_v55  ;;  %v4466_v31 = vld [vmem:[%s7563_s29 + $0x98] sm:$0xff]  ;;  %v4360_v14 = vld [vmem:[%s7566_s30 + $0xb0] sm:$0xff] }
 0x521   : > { %v4430_v9 = vadd.f32 %v7557_v1, %v4392_v27  ;;  %v4431_v30 = vadd.f32 %v7557_v1, %v4393_v45  ;;  %v4396_v58 = vmul.f32 %v7548_v18, %v4358_v47  ;;  %v4361_v21 = vld [vmem:[%s7566_s30 + $0xb8] sm:$0xff]  ;;  %4525 = vst.msk [vmem:[%s7601_s10 + $0x68] sm:$0xff] %vm33_vm0, %v4492_v52  ;;  %v4493_v12 = vadd.f32 %v4461_v10, %v4428_v5  ;;  %v4467_v63 = vld [vmem:[%s7563_s29 + $0xa0] sm:$0xff]  ;;  %v4363_v24 = vld [vmem:[%s7566_s30 + $0xc8] sm:$0xff] }
 0x522   : > { %v4494_v42 = vadd.f32 %v4462_v25, %v4429_v62  ;;  %v4432_v59 = vadd.f32 %v7557_v1, %v4394_v60  ;;  %v4397_v16 = vmul.f32 %v7548_v18, %v4359_v20  ;;  %v4362_v22 = vld [vmem:[%s7566_s30 + $0xc0] sm:$0xff]  ;;  %v4433_v19 = vadd.f32 %v7557_v1, %v4395_v11  ;;  %v4468_v29 = vld [vmem:[%s7563_s29 + $0xa8] sm:$0xff]  ;;  %v4364_v33 = vld [vmem:[%s7566_s30 + $0xd0] sm:$0xff] }
 0x523   : > { %v4495_v44 = vadd.f32 %v4463_v2, %v4430_v9  ;;  %v4496_v0 = vadd.f32 %v4464_v28, %v4431_v30  ;;  %v4434_v7 = vadd.f32 %v7557_v1, %v4396_v58  ;;  %4526 = vst.msk [vmem:[%s7601_s10 + $0x70] sm:$0xff] %vm33_vm0, %v4493_v12  ;;  %v4398_v32 = vmul.f32 %v7548_v18, %v4360_v14  ;;  %v4365_v38 = vld [vmem:[%s7566_s30 + $0xd8] sm:$0xff]  ;;  %v4366_v39 = vld [vmem:[%s7566_s30 + $0xe0] sm:$0xff]  ;;  %v4469_v17 = vld [vmem:[%s7563_s29 + $0xb0] sm:$0xff] }
 0x524   : > { %4527 = vst.msk [vmem:[%s7601_s10 + $0x78] sm:$0xff] %vm33_vm0, %v4494_v42  ;;  %v4497_v43 = vadd.f32 %v4465_v46, %v4432_v59  ;;  %v4435_v26 = vadd.f32 %v7557_v1, %v4397_v16  ;;  %v4399_v23 = vmul.f32 %v7548_v18, %v4361_v21  ;;  %v4498_v13 = vadd.f32 %v4466_v31, %v4433_v19  ;;  %v4470_v34 = vld [vmem:[%s7563_s29 + $0xb8] sm:$0xff]  ;;  %v4367_v15 = vld [vmem:[%s7566_s30 + $0xe8] sm:$0xff]  ;;  %v4471_v50 = vld [vmem:[%s7563_s29 + $0xc0] sm:$0xff] }
 0x525   : > { %4528 = vst.msk [vmem:[%s7601_s10 + $0x80] sm:$0xff] %vm33_vm0, %v4495_v44  ;;  %4529 = vst.msk [vmem:[%s7601_s10 + $0x88] sm:$0xff] %vm33_vm0, %v4496_v0  ;;  %v4499_v61 = vadd.f32 %v4467_v63, %v4434_v7  ;;  %v4400_v57 = vmul.f32 %v7548_v18, %v4362_v22  ;;  %v4401_v6 = vmul.f32 %v7548_v18, %v4363_v24  ;;  %v4472_v36 = vld [vmem:[%s7563_s29 + $0xc8] sm:$0xff]  ;;  %v4473_v40 = vld [vmem:[%s7563_s29 + $0xd0] sm:$0xff] }
 0x526   : > { %4530 = vst.msk [vmem:[%s7601_s10 + $0x90] sm:$0xff] %vm33_vm0, %v4497_v43  ;;  %v4500_v48 = vadd.f32 %v4468_v29, %v4435_v26  ;;  %v4436_v51 = vadd.f32 %v7557_v1, %v4398_v32  ;;  %v4437_v8 = vadd.f32 %v7557_v1, %v4399_v23  ;;  %v4402_v53 = vmul.f32 %v7548_v18, %v4364_v33  ;;  %v4368_v3 = vld [vmem:[%s7566_s30 + $0xf0] sm:$0xff]  ;;  %v4369_v25 = vld [vmem:[%s7566_s30 + $0xf8] sm:$0xff]  ;;  %v4475_v52 = vld [vmem:[%s7563_s29 + $0xe0] sm:$0xff] }
 0x527   : > { %4531 = vst.msk [vmem:[%s7601_s10 + $0x98] sm:$0xff] %vm33_vm0, %v4498_v13  ;;  %4532 = vst.msk [vmem:[%s7601_s10 + $0xa0] sm:$0xff] %vm33_vm0, %v4499_v61  ;;  %v4438_v10 = vadd.f32 %v7557_v1, %v4400_v57  ;;  %v4439_v35 = vadd.f32 %v7557_v1, %v4401_v6  ;;  %v4403_v55 = vmul.f32 %v7548_v18, %v4365_v38  ;;  %v4474_v47 = vld [vmem:[%s7563_s29 + $0xd8] sm:$0xff]  ;;  %v4476_v20 = vld [vmem:[%s7563_s29 + $0xe8] sm:$0xff] }
 0x528   : > { %v4404_v49 = vmul.f32 %v7548_v18, %v4366_v39  ;;  %4533 = vst.msk [vmem:[%s7601_s10 + $0xa8] sm:$0xff] %vm33_vm0, %v4500_v48  ;;  %v4501_v27 = vadd.f32 %v4469_v17, %v4436_v51  ;;  %v4502_v2 = vadd.f32 %v4470_v34, %v4437_v8  ;;  %v4440_v45 = vadd.f32 %v7557_v1, %v4402_v53  ;;  %v4477_v21 = vld [vmem:[%s7563_s29 + $0xf0] sm:$0xff]  ;;  %v4478_v12 = vld [vmem:[%s7563_s29 + $0xf8] sm:$0xff] }
 0x529   : > { %v4405_v5 = vmul.f32 %v7548_v18, %v4367_v15  ;;  %v4503_v62 = vadd.f32 %v4471_v50, %v4438_v10  ;;  %v4504_v28 = vadd.f32 %v4472_v36, %v4439_v35  ;;  %v4441_v60 = vadd.f32 %v7557_v1, %v4403_v55 }
 0x52a   : > { %v4442_v46 = vadd.f32 %v7557_v1, %v4404_v49  ;;  %4534 = vst.msk [vmem:[%s7601_s10 + $0xb0] sm:$0xff] %vm33_vm0, %v4501_v27  ;;  %4535 = vst.msk [vmem:[%s7601_s10 + $0xb8] sm:$0xff] %vm33_vm0, %v4502_v2  ;;  %v4505_v9 = vadd.f32 %v4473_v40, %v4440_v45  ;;  %v4406_v11 = vmul.f32 %v7548_v18, %v4368_v3 }
 0x52b   : > { %v4443_v30 = vadd.f32 %v7557_v1, %v4405_v5  ;;  %v4407_v31 = vmul.f32 %v7548_v18, %v4369_v25  ;;  %4536 = vst.msk [vmem:[%s7601_s10 + $0xc0] sm:$0xff] %vm33_vm0, %v4503_v62  ;;  %4537 = vst.msk [vmem:[%s7601_s10 + $0xc8] sm:$0xff] %vm33_vm0, %v4504_v28  ;;  %v4506_v58 = vadd.f32 %v4474_v47, %v4441_v60  ;;  %4334 = sbr.rel (!%p4332_p2) target bundleno = 1295 (0x50f), region = 105 }
 0x52c   : > { %v4507_v14 = vadd.f32 %v4475_v52, %v4442_v46  ;;  %4538 = vst.msk [vmem:[%s7601_s10 + $0xd0] sm:$0xff] %vm33_vm0, %v4505_v9  ;;  %v4444_v59 = vadd.f32 %v7557_v1, %v4406_v11 }
 0x52d   : > { %v4508_v42 = vadd.f32 %v4476_v20, %v4443_v30  ;;  %v4445_v63 = vadd.f32 %v7557_v1, %v4407_v31  ;;  %4539 = vst.msk [vmem:[%s7601_s10 + $0xd8] sm:$0xff] %vm33_vm0, %v4506_v58 }
 0x52e   : > { %4540 = vst.msk [vmem:[%s7601_s10 + $0xe0] sm:$0xff] %vm33_vm0, %v4507_v14  ;;  %v4509_v18 = vadd.f32 %v4477_v21, %v4444_v59 }
 0x52f   : > { %4541 = vst.msk [vmem:[%s7601_s10 + $0xe8] sm:$0xff] %vm33_vm0, %v4508_v42  ;;  %v4510_v16 = vadd.f32 %v4478_v12, %v4445_v63 }
 0x530   : > { %4542 = vst.msk [vmem:[%s7601_s10 + $0xf0] sm:$0xff] %vm33_vm0, %v4509_v18 }
 0x531   : > { %4543 = vst.msk [vmem:[%s7601_s10 + $0xf8] sm:$0xff] %vm33_vm0, %v4510_v16 }
 0x532   :  { %5414 = shalt.err (!%p5411_p7)
}
 0x533   :  { %s5415_s16 = scalar_lea.hbm %s7786_s8, 8192 }
 0x534   :  { %p5416_p8 = scmp.ne.s32.totalorder %s7786_s8, %s5415_s16  ;;  %p5419_p9 = scmp.lt.u32.totalorder %s5415_s16, %s7786_s8 }
 0x536   :  { %p5421_p10 = pnand %p5419_p9, %p5416_p8 }
 0x538   :  { %5424 = shalt.err (!%p5421_p10)
}
 0x539   :  { %s5456_s0 = smov 128   ;;  %s5457_s21 = smov 8  }
 0x53a   :  { %4555 = dma.vmem_to_hbm [thread:$0]  %s4550_s12, 8192, %s7786_s8, [#allocation9], %s5456_s0, %s5456_s0, %s5457_s21  }
 0x53b   :  { %5437 = dma.done.wait [#allocation9], 8192  }
 0x53c   :  { %5438 = vsyncadd [#allocation9], 4294959104 }
 0x53d   :  { %4559 = vsyncpa [#allocation9], 1 }

</bundles_post_ra>
